<compile_context>
chip_gen: v7x
topology: tpu7x:2x2x1
jax: 0.10.0
libtpu: 0.0.40
codegen_flags: <defaults>
</compile_context>

<pallas_src>
import functools
import math

import jax
import jax.numpy as jnp
from jax.experimental import pallas as pl
from jax.experimental.pallas import tpu as pltpu

_INV_SQRT2 = 1.0 / math.sqrt(2.0)
_IN_EPS = 1e-5  # nn.InstanceNorm2d default


def _gelu(x):
    # exact GELU (matches torch.nn.GELU(), approximate='none')
    return 0.5 * x * (1.0 + jax.lax.erf(x * _INV_SQRT2))


# -----------------------------------------------------------------------------
# Fused Pallas kernel: 4 convs + GELUs + InstanceNorm for one image per step.
#
# Flat-frame bookkeeping: interior pixel (h, w) lives at frame index
# q = base + h*W_pad + w  (base, W_pad multiples of 8).  Chunk row r in [0, L)
# maps to frame q = base + r; rows with (r mod W_pad) >= W are padding-column
# garbage, zeroed by `mcol` before they feed conv3 or the IN statistics and
# sliced away by the wrapper.
#
# The conv3 wide-frame scratch fw has lane groups s=0,1,2 holding the frame
# shifted by (s-1)*W_pad rows, so the three dy taps sit side by side in the
# contraction dimension and the 3x3 conv becomes 3 matmuls (one per dx).
# -----------------------------------------------------------------------------
def _eem_fused_kernel(p_ref, mcol_ref, mrow_ref,
                      w1_ref, b1_ref, w2_ref, b2_ref,
                      w3_ref, b3_ref, w4_ref,
                      g_ref, bt_ref,
                      o_ref,
                      fw_ref,
                      *, H, W, W_pad, base):
    L = H * W_pad
    C2 = w2_ref.shape[1]
    P_ext = fw_ref.shape[0]
    inv_hw = 1.0 / float(H * W)

    # ---- conv1 (3x3 via wrapper im2col) + GELU, conv2 (1x1) + GELU ---------
    a1 = _gelu(jnp.dot(p_ref[0], w1_ref[...],
                       preferred_element_type=jnp.float32) + b1_ref[...])
    a2 = _gelu(jnp.dot(a1, w2_ref[...],
                       preferred_element_type=jnp.float32) + b2_ref[...])
    a2 = a2 * mcol_ref[...]                       # zero padding-column rows

    # ---- build the dy-packed wide frame for conv3 ---------------------------
    za = base + W_pad                             # leading halo rows [0, za)
    zb = base + L - W_pad                         # trailing halo rows [zb, P_ext)
    fw_ref[0:za, :] = jnp.zeros((za, 3 * C2), jnp.float32)
    fw_ref[zb:P_ext, :] = jnp.zeros((P_ext - zb, 3 * C2), jnp.float32)
    # lane group s holds frame shifted by (s-1)*W_pad rows (all starts 8-aligned)
    fw_ref[base + W_pad:base + W_pad + L, 0:C2] = a2          # s=0 -> dy=-1
    fw_ref[base:base + L, C2:2 * C2] = a2                     # s=1 -> dy= 0
    fw_ref[base - W_pad:base - W_pad + L, 2 * C2:3 * C2] = a2  # s=2 -> dy=+1

    # ---- conv3 (3x3): 3 matmuls, dy packed into a 3*C2-deep contraction ----
    q_l = fw_ref[base - 1:base - 1 + L, :]        # dx = -1
    q_c = fw_ref[base:base + L, :]                # dx =  0 (aligned)
    q_r = fw_ref[base + 1:base + 1 + L, :]        # dx = +1
    acc3 = (jnp.dot(q_l, w3_ref[0], preferred_element_type=jnp.float32)
            + jnp.dot(q_c, w3_ref[1], preferred_element_type=jnp.float32)
            + jnp.dot(q_r, w3_ref[2], preferred_element_type=jnp.float32))
    a3 = _gelu(acc3 + b3_ref[...])

    # ---- conv4 (1x1), emitted transposed so the store is lane-dense --------
    # b4 is omitted on purpose: InstanceNorm removes any per-channel constant.
    y4t = jnp.einsum('oc,lc->ol', w4_ref[...], a3,
                     preferred_element_type=jnp.float32)       # (C4, L)

    # ---- InstanceNorm2d(affine=True) over the H*W interior columns ---------
    mrow = mrow_ref[...]                                       # (1, L)
    mean = jnp.sum(y4t * mrow, axis=1, keepdims=True) * inv_hw  # (C4, 1)
    xc = (y4t - mean) * mrow                                   # two-pass var
    var = jnp.sum(xc * xc, axis=1, keepdims=True) * inv_hw
    inv = jax.lax.rsqrt(var + _IN_EPS)
    o_ref[0] = ((y4t - mean) * inv * g_ref[...] + bt_ref[...]).astype(o_ref.dtype)


# -----------------------------------------------------------------------------
# Wrapper: NCHW in, NCHW out (PyTorch convention).
# -----------------------------------------------------------------------------
@jax.jit
def eem_forward(x_nchw, params):
    N, cin0, H, W = x_nchw.shape
    W_pad = ((W + 2 + 7) // 8) * 8          # 8-aligned frame row stride
    base = W_pad + 8                        # 8-aligned interior offset
    L = H * W_pad
    P_ext = base + L + W_pad + 8            # frame rows (halo + tap overshoot)

    C1 = params["w1"].shape[0]
    C2 = params["w3"].shape[0]
    C4 = params["w4"].shape[0]

    # ---- XLA glue: im2col for conv1 on the tiny 3-channel input ------------
    xt = jnp.transpose(x_nchw, (0, 2, 3, 1))                       # (N,H,W,3)
    xt = jnp.pad(xt, ((0, 0), (0, 0), (0, W_pad - W), (0, 0)))     # row stride
    xf = xt.reshape(N, L, cin0)
    xf = jnp.pad(xf, ((0, 0), (base, P_ext - base - L), (0, 0)))   # flat frame
    taps = []
    for i in range(3):
        for j in range(3):
            off = base + (i - 1) * W_pad + (j - 1)
            taps.append(jax.lax.slice_in_dim(xf, off, off + L, axis=1))
    patches = jnp.concatenate(taps, axis=-1)                       # (N, L, 27)

    # interior-column masks (column and row forms, both VMEM-resident)
    r = jnp.arange(L, dtype=jnp.int32)
    m = ((r % W_pad) < W).astype(jnp.float32)
    mcol = m.reshape(L, 1)
    mrow = m.reshape(1, L)

    # weights: pack taps into the contraction dimension
    w1 = jnp.transpose(params["w1"], (2, 3, 1, 0)).reshape(9 * cin0, C1)
    w2 = jnp.transpose(params["w2"][:, :, 0, 0], (1, 0))           # (C1, C2)
    w3 = jnp.transpose(params["w3"], (3, 2, 1, 0)).reshape(3, 3 * C2, C2)
    w4 = params["w4"][:, :, 0, 0]                                  # (C4, C2)
    b1 = params["b1"].reshape(1, C1)
    b2 = params["b2"].reshape(1, C2)
    b3 = params["b3"].reshape(1, C2)
    gamma = params["gamma"].reshape(C4, 1)
    beta = params["beta"].reshape(C4, 1)

    kernel = functools.partial(_eem_fused_kernel, H=H, W=W, W_pad=W_pad, base=base)

    flops = int(2 * N * L * (9 * cin0 * C1 + C1 * C2 + 9 * C2 * C2 + C2 * C4))
    transcendentals = int(N * L * (C1 + 2 * C2))
    bytes_accessed = int(4 * (N * L * 9 * cin0 + N * C4 * L + 2 * L
                              + 9 * cin0 * C1 + C1 * C2 + 9 * C2 * C2
                              + C4 * C2 + C1 + 3 * C2 + 2 * C4))

    out_t = pl.pallas_call(
        kernel,
        out_shape=jax.ShapeDtypeStruct((N, C4, L), x_nchw.dtype),
        grid_spec=pltpu.PrefetchScalarGridSpec(
            num_scalar_prefetch=0,
            grid=(N,),
            in_specs=[
                pl.BlockSpec((1, L, 9 * cin0), lambda n: (n, 0, 0)),
                pl.BlockSpec((L, 1), lambda n: (0, 0)),
                pl.BlockSpec((1, L), lambda n: (0, 0)),
                pl.BlockSpec((9 * cin0, C1), lambda n: (0, 0)),
                pl.BlockSpec((1, C1), lambda n: (0, 0)),
                pl.BlockSpec((C1, C2), lambda n: (0, 0)),
                pl.BlockSpec((1, C2), lambda n: (0, 0)),
                pl.BlockSpec((3, 3 * C2, C2), lambda n: (0, 0, 0)),
                pl.BlockSpec((1, C2), lambda n: (0, 0)),
                pl.BlockSpec((C4, C2), lambda n: (0, 0)),
                pl.BlockSpec((C4, 1), lambda n: (0, 0)),
                pl.BlockSpec((C4, 1), lambda n: (0, 0)),
            ],
            out_specs=pl.BlockSpec((1, C4, L), lambda n: (n, 0, 0)),
            scratch_shapes=[pltpu.VMEM((P_ext, 3 * C2), jnp.float32)],
        ),
        compiler_params=pltpu.CompilerParams(
            dimension_semantics=("parallel",),
            vmem_limit_bytes=32 * 1024 * 1024),
        cost_estimate=pl.CostEstimate(flops=flops,
                                      transcendentals=transcendentals,
                                      bytes_accessed=bytes_accessed),
    )(patches, mcol, mrow, w1, b1, w2, b2, w3, b3, w4, gamma, beta)

    # kernel already emits channel-major output: only a reshape + column slice
    return out_t.reshape(N, C4, H, W_pad)[:, :, :, :W]


# -----------------------------------------------------------------------------
# Params (mirrors PyTorch Conv2d / InstanceNorm2d(affine=True) defaults)
# -----------------------------------------------------------------------------
def init_eem_params(key, out_plane):
    layers = [
        (3, out_plane // 4, 3),
        (out_plane // 4, out_plane // 2, 1),
        (out_plane // 2, out_plane // 2, 3),
        (out_plane // 2, out_plane, 1),
    ]
    params = {}
    for idx, (cin, cout, k) in enumerate(layers, start=1):
        key, kw, kb = jax.random.split(key, 3)
        bound = 1.0 / math.sqrt(cin * k * k)
        params[f"w{idx}"] = jax.random.uniform(
            kw, (cout, cin, k, k), jnp.float32, -bound, bound)
        params[f"b{idx}"] = jax.random.uniform(
            kb, (cout,), jnp.float32, -bound, bound)
    params["gamma"] = jnp.ones((out_plane,), jnp.float32)
    params["beta"] = jnp.zeros((out_plane,), jnp.float32)
    return params


# -----------------------------------------------------------------------------
# Pure-JAX reference (for a correctness sanity check; note it DOES use b4 —
# the kernel drops b4 because InstanceNorm cancels it exactly)
# -----------------------------------------------------------------------------
def _eem_reference(x_nchw, params):
    def conv(x, w, b, pad):
        y = jax.lax.conv_general_dilated(
            x, w, window_strides=(1, 1), padding=((pad, pad), (pad, pad)),
            dimension_numbers=("NCHW", "OIHW", "NCHW"))
        return y + b.reshape(1, -1, 1, 1)

    h = _gelu(conv(x_nchw, params["w1"], params["b1"], 1))
    h = _gelu(conv(h, params["w2"], params["b2"], 0))
    h = _gelu(conv(h, params["w3"], params["b3"], 1))
    h = conv(h, params["w4"], params["b4"], 0)
    mean = h.mean(axis=(2, 3), keepdims=True)
    var = ((h - mean) ** 2).mean(axis=(2, 3), keepdims=True)
    h = (h - mean) * jax.lax.rsqrt(var + _IN_EPS)
    return h * params["gamma"].reshape(1, -1, 1, 1) + params["beta"].reshape(1, -1, 1, 1)


if __name__ == "__main__":
    key = jax.random.PRNGKey(0)
    kx, kp = jax.random.split(key)
    out_plane = 32
    x = jax.random.normal(kx, (2, 3, 16, 16), jnp.float32)   # NCHW like PyTorch
    params = init_eem_params(kp, out_plane)

    y = eem_forward(x, params)
    jax.block_until_ready(y)
    assert y.shape == (2, out_plane, 16, 16), y.shape
    assert bool(jnp.all(jnp.isfinite(y)))

    y_ref = _eem_reference(x, params)
    err = float(jnp.max(jnp.abs(y - y_ref)))
    assert err < 1e-2, f"max abs error vs reference: {err}"
    print("KERNEL_OK")
</pallas_src>

<mosaic_0001>
module attributes {stable_mosaic.version = 11 : i64} {
  func.func @_eem_fused_kernel(%arg0: i32, %arg1: memref<1x384x27xf32, #tpu.memory_space<vmem>>, %arg2: memref<384x1xf32, #tpu.memory_space<vmem>>, %arg3: memref<1x384xf32, #tpu.memory_space<vmem>>, %arg4: memref<27x8xf32, #tpu.memory_space<vmem>>, %arg5: memref<1x8xf32, #tpu.memory_space<vmem>>, %arg6: memref<8x16xf32, #tpu.memory_space<vmem>>, %arg7: memref<1x16xf32, #tpu.memory_space<vmem>>, %arg8: memref<3x48x16xf32, #tpu.memory_space<vmem>>, %arg9: memref<1x16xf32, #tpu.memory_space<vmem>>, %arg10: memref<32x16xf32, #tpu.memory_space<vmem>>, %arg11: memref<32x1xf32, #tpu.memory_space<vmem>>, %arg12: memref<32x1xf32, #tpu.memory_space<vmem>>, %arg13: memref<1x32x384xf32, #tpu.memory_space<vmem>>, %arg14: memref<448x48xf32, #tpu.memory_space<vmem>>) attributes {dimension_semantics = [#tpu.dimension_semantics<parallel>], iteration_bounds = array<i64: 2>, scalar_prefetch = 0 : i64, scratch_operands = 1 : i64, tpu.core_type = #tpu.core_type<tc>, window_params = [{transform_indices = @transform_0, window_bounds = array<i64: 1, 384, 27>}, {pipeline_mode = #tpu.pipeline_mode<synchronous>, transform_indices = @transform_1, window_bounds = array<i64: 384, 1>}, {pipeline_mode = #tpu.pipeline_mode<synchronous>, transform_indices = @transform_2, window_bounds = array<i64: 1, 384>}, {pipeline_mode = #tpu.pipeline_mode<synchronous>, transform_indices = @transform_3, window_bounds = array<i64: 27, 8>}, {pipeline_mode = #tpu.pipeline_mode<synchronous>, transform_indices = @transform_4, window_bounds = array<i64: 1, 8>}, {pipeline_mode = #tpu.pipeline_mode<synchronous>, transform_indices = @transform_5, window_bounds = array<i64: 8, 16>}, {pipeline_mode = #tpu.pipeline_mode<synchronous>, transform_indices = @transform_6, window_bounds = array<i64: 1, 16>}, {pipeline_mode = #tpu.pipeline_mode<synchronous>, transform_indices = @transform_7, window_bounds = array<i64: 3, 48, 16>}, {pipeline_mode = #tpu.pipeline_mode<synchronous>, transform_indices = @transform_8, window_bounds = array<i64: 1, 16>}, {pipeline_mode = #tpu.pipeline_mode<synchronous>, transform_indices = @transform_9, window_bounds = array<i64: 32, 16>}, {pipeline_mode = #tpu.pipeline_mode<synchronous>, transform_indices = @transform_10, window_bounds = array<i64: 32, 1>}, {pipeline_mode = #tpu.pipeline_mode<synchronous>, transform_indices = @transform_11, window_bounds = array<i64: 32, 1>}, {transform_indices = @transform_12, window_bounds = array<i64: 1, 32, 384>}]} {
    %c0 = arith.constant 0 : index
    %c0_0 = arith.constant 0 : index
    %c0_1 = arith.constant 0 : index
    %0 = vector.load %arg1[%c0, %c0_0, %c0_1] : memref<1x384x27xf32, #tpu.memory_space<vmem>>, vector<1x384x27xf32>
    %1 = vector.shape_cast %0 : vector<1x384x27xf32> to vector<384x27xf32>
    %c0_2 = arith.constant 0 : index
    %c0_3 = arith.constant 0 : index
    %2 = vector.load %arg4[%c0_2, %c0_3] : memref<27x8xf32, #tpu.memory_space<vmem>>, vector<27x8xf32>
    %cst = arith.constant dense<0.000000e+00> : vector<384x8xf32>
    %3 = tpu.matmul %1, %2, %cst {dimension_numbers = #tpu.dot_dimension_numbers<[1], [0], [0], [1], [0, 0, 1, 1], [], []>} : vector<384x27xf32>, vector<27x8xf32>, vector<384x8xf32> -> vector<384x8xf32>
    %c0_4 = arith.constant 0 : index
    %c0_5 = arith.constant 0 : index
    %4 = vector.load %arg5[%c0_4, %c0_5] : memref<1x8xf32, #tpu.memory_space<vmem>>, vector<1x8xf32>
    %5 = vector.broadcast %4 : vector<1x8xf32> to vector<384x8xf32>
    %6 = arith.addf %3, %5 : vector<384x8xf32>
    %cst_6 = arith.constant 5.000000e-01 : f32
    %7 = vector.broadcast %cst_6 : f32 to vector<384x8xf32>
    %8 = arith.mulf %7, %6 : vector<384x8xf32>
    %cst_7 = arith.constant 0.707106769 : f32
    %9 = vector.broadcast %cst_7 : f32 to vector<384x8xf32>
    %10 = arith.mulf %6, %9 : vector<384x8xf32>
    %11 = math.erf %10 : vector<384x8xf32>
    %cst_8 = arith.constant 1.000000e+00 : f32
    %12 = vector.broadcast %cst_8 : f32 to vector<384x8xf32>
    %13 = arith.addf %12, %11 : vector<384x8xf32>
    %14 = arith.mulf %8, %13 : vector<384x8xf32>
    %c0_9 = arith.constant 0 : index
    %c0_10 = arith.constant 0 : index
    %15 = vector.load %arg6[%c0_9, %c0_10] : memref<8x16xf32, #tpu.memory_space<vmem>>, vector<8x16xf32>
    %cst_11 = arith.constant dense<0.000000e+00> : vector<384x16xf32>
    %16 = tpu.matmul %14, %15, %cst_11 {dimension_numbers = #tpu.dot_dimension_numbers<[1], [0], [0], [1], [0, 0, 1, 1], [], []>} : vector<384x8xf32>, vector<8x16xf32>, vector<384x16xf32> -> vector<384x16xf32>
    %c0_12 = arith.constant 0 : index
    %c0_13 = arith.constant 0 : index
    %17 = vector.load %arg7[%c0_12, %c0_13] : memref<1x16xf32, #tpu.memory_space<vmem>>, vector<1x16xf32>
    %18 = vector.broadcast %17 : vector<1x16xf32> to vector<384x16xf32>
    %19 = arith.addf %16, %18 : vector<384x16xf32>
    %cst_14 = arith.constant 5.000000e-01 : f32
    %20 = vector.broadcast %cst_14 : f32 to vector<384x16xf32>
    %21 = arith.mulf %20, %19 : vector<384x16xf32>
    %cst_15 = arith.constant 0.707106769 : f32
    %22 = vector.broadcast %cst_15 : f32 to vector<384x16xf32>
    %23 = arith.mulf %19, %22 : vector<384x16xf32>
    %24 = math.erf %23 : vector<384x16xf32>
    %cst_16 = arith.constant 1.000000e+00 : f32
    %25 = vector.broadcast %cst_16 : f32 to vector<384x16xf32>
    %26 = arith.addf %25, %24 : vector<384x16xf32>
    %27 = arith.mulf %21, %26 : vector<384x16xf32>
    %c0_17 = arith.constant 0 : index
    %c0_18 = arith.constant 0 : index
    %28 = vector.load %arg2[%c0_17, %c0_18] : memref<384x1xf32, #tpu.memory_space<vmem>>, vector<384x1xf32>
    %29 = vector.broadcast %28 : vector<384x1xf32> to vector<384x16xf32>
    %30 = arith.mulf %27, %29 : vector<384x16xf32>
    %cst_19 = arith.constant 0.000000e+00 : f32
    %31 = vector.broadcast %cst_19 : f32 to vector<56x48xf32>
    %c0_20 = arith.constant 0 : index
    %c0_21 = arith.constant 0 : index
    %32 = vector.load %arg14[%c0_20, %c0_21] : memref<448x48xf32, #tpu.memory_space<vmem>>, vector<56x48xf32>
    tpu.vector_store %arg14[%c0_20, %c0_21], %31 {strides = array<i32>} : memref<448x48xf32, #tpu.memory_space<vmem>>, vector<56x48xf32>,
    %cst_22 = arith.constant 0.000000e+00 : f32
    %33 = vector.broadcast %cst_22 : f32 to vector<56x48xf32>
    %c392 = arith.constant 392 : index
    %c0_23 = arith.constant 0 : index
    %34 = vector.load %arg14[%c392, %c0_23] : memref<448x48xf32, #tpu.memory_space<vmem>>, vector<56x48xf32>
    tpu.vector_store %arg14[%c392, %c0_23], %33 {strides = array<i32>} : memref<448x48xf32, #tpu.memory_space<vmem>>, vector<56x48xf32>,
    %c56 = arith.constant 56 : index
    %c0_24 = arith.constant 0 : index
    %35 = vector.load %arg14[%c56, %c0_24] : memref<448x48xf32, #tpu.memory_space<vmem>>, vector<384x16xf32>
    tpu.vector_store %arg14[%c56, %c0_24], %30 {strides = array<i32>} : memref<448x48xf32, #tpu.memory_space<vmem>>, vector<384x16xf32>,
    %c32 = arith.constant 32 : index
    %c16 = arith.constant 16 : index
    %36 = vector.load %arg14[%c32, %c16] : memref<448x48xf32, #tpu.memory_space<vmem>>, vector<384x16xf32>
    tpu.vector_store %arg14[%c32, %c16], %30 {strides = array<i32>} : memref<448x48xf32, #tpu.memory_space<vmem>>, vector<384x16xf32>,
    %c8 = arith.constant 8 : index
    %c32_25 = arith.constant 32 : index
    %37 = vector.load %arg14[%c8, %c32_25] : memref<448x48xf32, #tpu.memory_space<vmem>>, vector<384x16xf32>
    tpu.vector_store %arg14[%c8, %c32_25], %30 {strides = array<i32>} : memref<448x48xf32, #tpu.memory_space<vmem>>, vector<384x16xf32>,
    %c31 = arith.constant 31 : index
    %c0_26 = arith.constant 0 : index
    %38 = vector.load %arg14[%c31, %c0_26] : memref<448x48xf32, #tpu.memory_space<vmem>>, vector<384x48xf32>
    %c32_27 = arith.constant 32 : index
    %c0_28 = arith.constant 0 : index
    %39 = vector.load %arg14[%c32_27, %c0_28] : memref<448x48xf32, #tpu.memory_space<vmem>>, vector<384x48xf32>
    %c33 = arith.constant 33 : index
    %c0_29 = arith.constant 0 : index
    %40 = vector.load %arg14[%c33, %c0_29] : memref<448x48xf32, #tpu.memory_space<vmem>>, vector<384x48xf32>
    %c0_30 = arith.constant 0 : index
    %c0_31 = arith.constant 0 : index
    %c0_32 = arith.constant 0 : index
    %41 = vector.load %arg8[%c0_30, %c0_31, %c0_32] : memref<3x48x16xf32, #tpu.memory_space<vmem>>, vector<1x48x16xf32>
    %42 = vector.shape_cast %41 : vector<1x48x16xf32> to vector<48x16xf32>
    %cst_33 = arith.constant dense<0.000000e+00> : vector<384x16xf32>
    %43 = tpu.matmul %38, %42, %cst_33 {dimension_numbers = #tpu.dot_dimension_numbers<[1], [0], [0], [1], [0, 0, 1, 1], [], []>} : vector<384x48xf32>, vector<48x16xf32>, vector<384x16xf32> -> vector<384x16xf32>
    %c1 = arith.constant 1 : index
    %c0_34 = arith.constant 0 : index
    %c0_35 = arith.constant 0 : index
    %44 = vector.load %arg8[%c1, %c0_34, %c0_35] : memref<3x48x16xf32, #tpu.memory_space<vmem>>, vector<1x48x16xf32>
    %45 = vector.shape_cast %44 : vector<1x48x16xf32> to vector<48x16xf32>
    %cst_36 = arith.constant dense<0.000000e+00> : vector<384x16xf32>
    %46 = tpu.matmul %39, %45, %cst_36 {dimension_numbers = #tpu.dot_dimension_numbers<[1], [0], [0], [1], [0, 0, 1, 1], [], []>} : vector<384x48xf32>, vector<48x16xf32>, vector<384x16xf32> -> vector<384x16xf32>
    %47 = arith.addf %43, %46 : vector<384x16xf32>
    %c2 = arith.constant 2 : index
    %c0_37 = arith.constant 0 : index
    %c0_38 = arith.constant 0 : index
    %48 = vector.load %arg8[%c2, %c0_37, %c0_38] : memref<3x48x16xf32, #tpu.memory_space<vmem>>, vector<1x48x16xf32>
    %49 = vector.shape_cast %48 : vector<1x48x16xf32> to vector<48x16xf32>
    %cst_39 = arith.constant dense<0.000000e+00> : vector<384x16xf32>
    %50 = tpu.matmul %40, %49, %cst_39 {dimension_numbers = #tpu.dot_dimension_numbers<[1], [0], [0], [1], [0, 0, 1, 1], [], []>} : vector<384x48xf32>, vector<48x16xf32>, vector<384x16xf32> -> vector<384x16xf32>
    %51 = arith.addf %47, %50 : vector<384x16xf32>
    %c0_40 = arith.constant 0 : index
    %c0_41 = arith.constant 0 : index
    %52 = vector.load %arg9[%c0_40, %c0_41] : memref<1x16xf32, #tpu.memory_space<vmem>>, vector<1x16xf32>
    %53 = vector.broadcast %52 : vector<1x16xf32> to vector<384x16xf32>
    %54 = arith.addf %51, %53 : vector<384x16xf32>
    %cst_42 = arith.constant 5.000000e-01 : f32
    %55 = vector.broadcast %cst_42 : f32 to vector<384x16xf32>
    %56 = arith.mulf %55, %54 : vector<384x16xf32>
    %cst_43 = arith.constant 0.707106769 : f32
    %57 = vector.broadcast %cst_43 : f32 to vector<384x16xf32>
    %58 = arith.mulf %54, %57 : vector<384x16xf32>
    %59 = math.erf %58 : vector<384x16xf32>
    %cst_44 = arith.constant 1.000000e+00 : f32
    %60 = vector.broadcast %cst_44 : f32 to vector<384x16xf32>
    %61 = arith.addf %60, %59 : vector<384x16xf32>
    %62 = arith.mulf %56, %61 : vector<384x16xf32>
    %c0_45 = arith.constant 0 : index
    %c0_46 = arith.constant 0 : index
    %63 = vector.load %arg10[%c0_45, %c0_46] : memref<32x16xf32, #tpu.memory_space<vmem>>, vector<32x16xf32>
    "tpu.trace_start"() <{level = 10 : i32, message = "oc,lc->ol"}> : () -> ()
    %cst_47 = arith.constant dense<0.000000e+00> : vector<32x384xf32>
    %64 = tpu.matmul %63, %62, %cst_47 {dimension_numbers = #tpu.dot_dimension_numbers<[1], [1], [0], [0], [0, 0, 1, 0], [], []>} : vector<32x16xf32>, vector<384x16xf32>, vector<32x384xf32> -> vector<32x384xf32>
    "tpu.trace_stop"() : () -> ()
    %c0_48 = arith.constant 0 : index
    %c0_49 = arith.constant 0 : index
    %65 = vector.load %arg3[%c0_48, %c0_49] : memref<1x384xf32, #tpu.memory_space<vmem>>, vector<1x384xf32>
    %66 = vector.broadcast %65 : vector<1x384xf32> to vector<32x384xf32>
    %67 = arith.mulf %64, %66 : vector<32x384xf32>
    %cst_50 = arith.constant dense<0.000000e+00> : vector<32xf32>
    %68 = vector.multi_reduction <add>, %67, %cst_50 [1] : vector<32x384xf32> to vector<32xf32>
    %69 = vector.shape_cast %68 : vector<32xf32> to vector<32x1xf32>
    %cst_51 = arith.constant 3.906250e-03 : f32
    %70 = vector.broadcast %cst_51 : f32 to vector<32x1xf32>
    %71 = arith.mulf %69, %70 : vector<32x1xf32>
    %72 = vector.broadcast %71 : vector<32x1xf32> to vector<32x384xf32>
    %73 = arith.subf %64, %72 : vector<32x384xf32>
    %74 = vector.broadcast %65 : vector<1x384xf32> to vector<32x384xf32>
    %75 = arith.mulf %73, %74 : vector<32x384xf32>
    %76 = arith.mulf %75, %75 : vector<32x384xf32>
    %cst_52 = arith.constant dense<0.000000e+00> : vector<32xf32>
    %77 = vector.multi_reduction <add>, %76, %cst_52 [1] : vector<32x384xf32> to vector<32xf32>
    %78 = vector.shape_cast %77 : vector<32xf32> to vector<32x1xf32>
    %cst_53 = arith.constant 3.906250e-03 : f32
    %79 = vector.broadcast %cst_53 : f32 to vector<32x1xf32>
    %80 = arith.mulf %78, %79 : vector<32x1xf32>
    %cst_54 = arith.constant 9.99999974E-6 : f32
    %81 = vector.broadcast %cst_54 : f32 to vector<32x1xf32>
    %82 = arith.addf %80, %81 : vector<32x1xf32>
    %83 = math.rsqrt %82 : vector<32x1xf32>
    %84 = vector.broadcast %71 : vector<32x1xf32> to vector<32x384xf32>
    %85 = arith.subf %64, %84 : vector<32x384xf32>
    %86 = vector.broadcast %83 : vector<32x1xf32> to vector<32x384xf32>
    %87 = arith.mulf %85, %86 : vector<32x384xf32>
    %c0_55 = arith.constant 0 : index
    %c0_56 = arith.constant 0 : index
    %88 = vector.load %arg11[%c0_55, %c0_56] : memref<32x1xf32, #tpu.memory_space<vmem>>, vector<32x1xf32>
    %89 = vector.broadcast %88 : vector<32x1xf32> to vector<32x384xf32>
    %90 = arith.mulf %87, %89 : vector<32x384xf32>
    %c0_57 = arith.constant 0 : index
    %c0_58 = arith.constant 0 : index
    %91 = vector.load %arg12[%c0_57, %c0_58] : memref<32x1xf32, #tpu.memory_space<vmem>>, vector<32x1xf32>
    %92 = vector.broadcast %91 : vector<32x1xf32> to vector<32x384xf32>
    %93 = arith.addf %90, %92 : vector<32x384xf32>
    %c0_59 = arith.constant 0 : index
    %c0_60 = arith.constant 0 : index
    %c0_61 = arith.constant 0 : index
    %94 = vector.load %arg13[%c0_59, %c0_60, %c0_61] : memref<1x32x384xf32, #tpu.memory_space<vmem>>, vector<1x32x384xf32>
    %95 = vector.shape_cast %94 : vector<1x32x384xf32> to vector<32x384xf32>
    %96 = vector.shape_cast %93 : vector<32x384xf32> to vector<1x32x384xf32>
    tpu.vector_store %arg13[%c0_59, %c0_60, %c0_61], %96 {strides = array<i32>} : memref<1x32x384xf32, #tpu.memory_space<vmem>>, vector<1x32x384xf32>,
    return
  }
  func.func @transform_0(%arg0: i32) -> (i32, i32, i32) {
    %c0_i32 = arith.constant 0 : i32
    %c0_i32_0 = arith.constant 0 : i32
    %c0_i32_1 = arith.constant 0 : i32
    return %arg0, %c0_i32, %c0_i32_0 : i32, i32, i32
  }
  func.func @transform_1(%arg0: i32) -> (i32, i32) {
    %c0_i32 = arith.constant 0 : i32
    %c0_i32_0 = arith.constant 0 : i32
    %c0_i32_1 = arith.constant 0 : i32
    return %c0_i32, %c0_i32_0 : i32, i32
  }
  func.func @transform_2(%arg0: i32) -> (i32, i32) {
    %c0_i32 = arith.constant 0 : i32
    %c0_i32_0 = arith.constant 0 : i32
    %c0_i32_1 = arith.constant 0 : i32
    return %c0_i32, %c0_i32_0 : i32, i32
  }
  func.func @transform_3(%arg0: i32) -> (i32, i32) {
    %c0_i32 = arith.constant 0 : i32
    %c0_i32_0 = arith.constant 0 : i32
    %c0_i32_1 = arith.constant 0 : i32
    return %c0_i32, %c0_i32_0 : i32, i32
  }
  func.func @transform_4(%arg0: i32) -> (i32, i32) {
    %c0_i32 = arith.constant 0 : i32
    %c0_i32_0 = arith.constant 0 : i32
    %c0_i32_1 = arith.constant 0 : i32
    return %c0_i32, %c0_i32_0 : i32, i32
  }
  func.func @transform_5(%arg0: i32) -> (i32, i32) {
    %c0_i32 = arith.constant 0 : i32
    %c0_i32_0 = arith.constant 0 : i32
    %c0_i32_1 = arith.constant 0 : i32
    return %c0_i32, %c0_i32_0 : i32, i32
  }
  func.func @transform_6(%arg0: i32) -> (i32, i32) {
    %c0_i32 = arith.constant 0 : i32
    %c0_i32_0 = arith.constant 0 : i32
    %c0_i32_1 = arith.constant 0 : i32
    return %c0_i32, %c0_i32_0 : i32, i32
  }
  func.func @transform_7(%arg0: i32) -> (i32, i32, i32) {
    %c0_i32 = arith.constant 0 : i32
    %c0_i32_0 = arith.constant 0 : i32
    %c0_i32_1 = arith.constant 0 : i32
    %c0_i32_2 = arith.constant 0 : i32
    return %c0_i32, %c0_i32_0, %c0_i32_1 : i32, i32, i32
  }
  func.func @transform_8(%arg0: i32) -> (i32, i32) {
    %c0_i32 = arith.constant 0 : i32
    %c0_i32_0 = arith.constant 0 : i32
    %c0_i32_1 = arith.constant 0 : i32
    return %c0_i32, %c0_i32_0 : i32, i32
  }
  func.func @transform_9(%arg0: i32) -> (i32, i32) {
    %c0_i32 = arith.constant 0 : i32
    %c0_i32_0 = arith.constant 0 : i32
    %c0_i32_1 = arith.constant 0 : i32
    return %c0_i32, %c0_i32_0 : i32, i32
  }
  func.func @transform_10(%arg0: i32) -> (i32, i32) {
    %c0_i32 = arith.constant 0 : i32
    %c0_i32_0 = arith.constant 0 : i32
    %c0_i32_1 = arith.constant 0 : i32
    return %c0_i32, %c0_i32_0 : i32, i32
  }
  func.func @transform_11(%arg0: i32) -> (i32, i32) {
    %c0_i32 = arith.constant 0 : i32
    %c0_i32_0 = arith.constant 0 : i32
    %c0_i32_1 = arith.constant 0 : i32
    return %c0_i32, %c0_i32_0 : i32, i32
  }
  func.func @transform_12(%arg0: i32) -> (i32, i32, i32) {
    %c0_i32 = arith.constant 0 : i32
    %c0_i32_0 = arith.constant 0 : i32
    %c0_i32_1 = arith.constant 0 : i32
    return %arg0, %c0_i32, %c0_i32_0 : i32, i32, i32
  }
}

</mosaic_0001>

<bundles_post_ra>
// kernel: eem_forward.1
= control target key start
LH: loop header
LB: loop body
LE: loop exit
PB: predicated region body
PF: predicated region fallthrough
CT: control target
= control target key end

     0   :  { %s6869_s21 = smov 0   ;;  %s8948_s0 = inlined_call_operand.vmem [shape: f32[2,384,27], index: 0, kind: input, shape index: {}]   ;;  %s8949_s1 = inlined_call_operand.vmem [shape: f32[384,1], index: 1, kind: input, shape index: {}]   ;;  %s8950_s2 = inlined_call_operand.vmem [shape: f32[1,384], index: 2, kind: input, shape index: {}]   ;;  %s8951_s3 = inlined_call_operand.vmem [shape: f32[27,8], index: 3, kind: input, shape index: {}]   ;;  %s8952_s4 = inlined_call_operand.vmem [shape: f32[1,8], index: 4, kind: input, shape index: {}]   ;;  %s8953_s5 = inlined_call_operand.vmem [shape: f32[8,16], index: 5, kind: input, shape index: {}]   ;;  %s8954_s6 = inlined_call_operand.vmem [shape: f32[1,16], index: 6, kind: input, shape index: {}]   ;;  %s8955_s7 = inlined_call_operand.vmem [shape: f32[3,48,16], index: 7, kind: input, shape index: {}]   ;;  %s8956_s8 = inlined_call_operand.vmem [shape: f32[1,16], index: 8, kind: input, shape index: {}]   ;;  %s8957_s9 = inlined_call_operand.vmem [shape: f32[32,16], index: 9, kind: input, shape index: {}]   ;;  %s8958_s10 = inlined_call_operand.vmem [shape: f32[32,1], index: 10, kind: input, shape index: {}]   ;;  %s8959_s11 = inlined_call_operand.vmem [shape: f32[32,1], index: 11, kind: input, shape index: {}]   ;;  %s8960_s12 = inlined_call_operand.vmem [shape: f32[2,32,384], index: 12, kind: output, shape index: {}]  }
   0x1 LB: > { %s5151_s22 = sadd.s32 4294967295, %s6797_s21   ;;  %p5155_p0 = scmp.ge.s32.totalorder %s6797_s21, 1  ;;  %s6797_s21 = sphi %s6869_s21, %s22_s21  }
   0x2   : > { %p362_p1 = scmp.lt.s32.totalorder %s6797_s21, 3 }
   0x4   : > { %p363_p2 = pnand %p5155_p0, %p362_p1 }
   0x6   : > { %366 = sbr.rel (%p363_p2) target bundleno = 1809 (0x711), region = 68 }
   0xd   : > { %v462_v0 = vld [vmem:[%s8951_s3] sm:$0xff]  ;;  %v463_v1 = vld [vmem:[%s8951_s3 + $0x8] sm:$0xff]  ;;  %v464_v2 = vld [vmem:[%s8951_s3 + $0x10] sm:$0xff]  ;;  %vm618_vm0 = vcmask 1042432   ;;  %p404_p3 = scmp.lt.s32.totalorder %s5151_s22, 1  ;;  %vm6799_vm1 = vmmov 1  }
   0xe   : > { %v6239_v3 = vpack.c.bf16 %v463_v1, %v462_v0  ;;  %v465_v4 = vld [vmem:[%s8951_s3 + $0x18] sm:$0x7]  ;;  %vm6244_vm2 = vmpackc.low %vm618_vm0, %vm6799_vm1  ;;  %vm473_vm3 = vcmask 220160   ;;  %v6800_v54 = vmov 0   ;;  %v1867_v55 = vld [vmem:[%s8949_s1 + $0x10] sm:$0xff]  ;;  %vm1175_vm4 = vcmask 64512  }
   0xf   : > { %v6243_v5 = vpack.c.bf16 %v465_v4, %v464_v2  ;;  %s8984_s22 = smov (!%p404_p3, %s5151_s22), 1  ;;  %6493 = vset.pattern.permute.xlu1 %v6800_v54  ;;  %6492 = vset.pattern.permute.xlu0 %v6800_v54  ;;  %v1868_v56 = vld [vmem:[%s8949_s1 + $0x18] sm:$0xff]  ;;  %v1167_v57 = vld [vmem:[%s8953_s5] sm:$0xff]  ;;  %v1870_v58 = vld [vmem:[%s8949_s1 + $0x28] sm:$0xff]  ;;  %vm2201_vm5 = vcmask 392192   ;;  %vm2216_vm6 = vcmask 130048  }
  0x10   : > { %6240 = vmatprep.subr.bf16.mxu0 %v6239_v3  ;;  %s6477_s13 = smul.u32 384, %s8984_s22  ;;  %1925 = vperm.xlu1 %6493, %v1867_v55   ;;  %v1872_v59 = vld [vmem:[%s8949_s1 + $0x38] sm:$0xff]  ;;  %v1874_v60 = vld [vmem:[%s8949_s1 + $0x48] sm:$0xff]  ;;  %v1865_v2 = vld [vmem:[%s8949_s1] sm:$0xff]  ;;  %s6802_s15 = smov 16   ;;  %vm2457_vm7 = vcmask 261248  }
  0x11   : > { %6242 = vmatpush3.bf16.msra.mxu0 %v6239_v3  ;;  %5875 = vmatprep.subr.mxu1 %v1167_v57  ;;  %v1876_v61 = vld [vmem:[%s8949_s1 + $0x58] sm:$0xff]  ;;  %v1878_v62 = vld [vmem:[%s8949_s1 + $0x68] sm:$0xff]  ;;  %s6803_s26 = smov 32   ;;  %vm2650_vm8 = vcmask 392448   ;;  %vm8526_vm9 = vmpackc.low %vm2216_vm6, %vm2216_vm6 }
  0x12   : > { %6245 = vmatprep.subr.msk.bf16.mxu0 %vm6244_vm2, %v6243_v5  ;;  %s6895_s16 = scalar_lea.vmem %s8948_s0, %s6477_s13  ;;  %5876 = vmatpush3.msra.mxu1 %v1167_v57  ;;  %v1880_v63 = vld [vmem:[%s8949_s1 + $0x78] sm:$0xff]  ;;  %v1882_v0 = vld [vmem:[%s8949_s1 + $0x88] sm:$0xff] }
  0x13   : > { %v414_v6 = vld [vmem:[%s6895_s16] sm:$0xff]  ;;  %v415_v7 = vld [vmem:[%s6895_s16 + $0x8] sm:$0xff]  ;;  %v416_v8 = vld [vmem:[%s6895_s16 + $0x10] sm:$0xff]  ;;  %1915 = vperm.xlu0 %6492, %v1865_v2  }
  0x14   : > { %5803 = vmatprep.mubr.msk.f32.mxu0 %vm473_vm3, %v414_v6  ;;  %v417_v9 = vld [vmem:[%s6895_s16 + $0x18] sm:$0xff]  ;;  %v418_v10 = vld [vmem:[%s6895_s16 + $0x20] sm:$0xff]  ;;  %v419_v11 = vld [vmem:[%s6895_s16 + $0x28] sm:$0xff]  ;;  %1930 = vperm.xlu1 %6493, %v1868_v56  }
  0x15   : > { %6248 = vmatpush3.bf16.msk.msra.mxu0 %vm6244_vm2, %v6243_v5  ;;  %v420_v12 = vld [vmem:[%s6895_s16 + $0x30] sm:$0xff]  ;;  %v421_v13 = vld [vmem:[%s6895_s16 + $0x38] sm:$0xff]  ;;  %v422_v14 = vld [vmem:[%s6895_s16 + $0x40] sm:$0xff] }
  0x16   : > { %v423_v15 = vld [vmem:[%s6895_s16 + $0x48] sm:$0xff]  ;;  %v424_v16 = vld [vmem:[%s6895_s16 + $0x50] sm:$0xff]  ;;  %v425_v17 = vld [vmem:[%s6895_s16 + $0x58] sm:$0xff] }
  0x17   : > { %v426_v18 = vld [vmem:[%s6895_s16 + $0x60] sm:$0xff]  ;;  %v427_v19 = vld [vmem:[%s6895_s16 + $0x68] sm:$0xff]  ;;  %v428_v20 = vld [vmem:[%s6895_s16 + $0x70] sm:$0xff] }
  0x18   : > { %5804 = vmatmul.mubr.msk.f32.vlgmr.msra.gmra.mrb[0].mxu0 %vm473_vm3, %v415_v7  ;;  %v429_v21 = vld [vmem:[%s6895_s16 + $0x78] sm:$0xff]  ;;  %v430_v22 = vld [vmem:[%s6895_s16 + $0x80] sm:$0xff]  ;;  %v431_v23 = vld [vmem:[%s6895_s16 + $0x88] sm:$0xff]  ;;  %1940 = vperm.xlu1 %6493, %v1870_v58  }
  0x19   : > { %5806 = vmatprep.mubr.msk.f32.mxu0 %vm473_vm3, %v416_v8  ;;  %v432_v24 = vld [vmem:[%s6895_s16 + $0x90] sm:$0xff]  ;;  %v433_v25 = vld [vmem:[%s6895_s16 + $0x98] sm:$0xff]  ;;  %v434_v26 = vld [vmem:[%s6895_s16 + $0xa0] sm:$0xff] }
  0x1a   : > { %v435_v27 = vld [vmem:[%s6895_s16 + $0xa8] sm:$0xff]  ;;  %v436_v28 = vld [vmem:[%s6895_s16 + $0xb0] sm:$0xff]  ;;  %v437_v29 = vld [vmem:[%s6895_s16 + $0xb8] sm:$0xff] }
  0x1b   : > { %v438_v30 = vld [vmem:[%s6895_s16 + $0xc0] sm:$0xff]  ;;  %v439_v31 = vld [vmem:[%s6895_s16 + $0xc8] sm:$0xff]  ;;  %v440_v32 = vld [vmem:[%s6895_s16 + $0xd0] sm:$0xff] }
  0x1c   : > { %5807 = vmatmul.mubr.msk.f32.gmra.mrb[2].mxu0 %vm473_vm3, %v417_v9  ;;  %v441_v33 = vld [vmem:[%s6895_s16 + $0xd8] sm:$0xff]  ;;  %v442_v34 = vld [vmem:[%s6895_s16 + $0xe0] sm:$0xff]  ;;  %v443_v35 = vld [vmem:[%s6895_s16 + $0xe8] sm:$0xff]  ;;  %1950 = vperm.xlu1 %6493, %v1872_v59  }
  0x1d   : > { %5809 = vmatprep.mubr.msk.f32.mxu0 %vm473_vm3, %v418_v10  ;;  %v444_v36 = vld [vmem:[%s6895_s16 + $0xf0] sm:$0xff]  ;;  %v445_v37 = vld [vmem:[%s6895_s16 + $0xf8] sm:$0xff]  ;;  %v446_v38 = vld [vmem:[%s6895_s16 + $0x100] sm:$0xff] }
  0x1e   : > { %v447_v39 = vld [vmem:[%s6895_s16 + $0x108] sm:$0xff]  ;;  %v448_v40 = vld [vmem:[%s6895_s16 + $0x110] sm:$0xff]  ;;  %v449_v41 = vld [vmem:[%s6895_s16 + $0x118] sm:$0xff] }
  0x1f   : > { %v450_v42 = vld [vmem:[%s6895_s16 + $0x120] sm:$0xff]  ;;  %v451_v43 = vld [vmem:[%s6895_s16 + $0x128] sm:$0xff]  ;;  %v452_v44 = vld [vmem:[%s6895_s16 + $0x130] sm:$0xff] }
  0x20   : > { %5810 = vmatmul.mubr.msk.f32.gmra.mrb[4].mxu0 %vm473_vm3, %v419_v11  ;;  %v453_v45 = vld [vmem:[%s6895_s16 + $0x138] sm:$0xff]  ;;  %v454_v46 = vld [vmem:[%s6895_s16 + $0x140] sm:$0xff]  ;;  %v455_v47 = vld [vmem:[%s6895_s16 + $0x148] sm:$0xff]  ;;  %1960 = vperm.xlu1 %6493, %v1874_v60  }
  0x21   : > { %5812 = vmatprep.mubr.msk.f32.mxu0 %vm473_vm3, %v420_v12  ;;  %v456_v48 = vld [vmem:[%s6895_s16 + $0x150] sm:$0xff]  ;;  %v457_v49 = vld [vmem:[%s6895_s16 + $0x158] sm:$0xff]  ;;  %v458_v50 = vld [vmem:[%s6895_s16 + $0x160] sm:$0xff] }
  0x22   : > { %v459_v51 = vld [vmem:[%s6895_s16 + $0x168] sm:$0xff]  ;;  %v460_v52 = vld [vmem:[%s6895_s16 + $0x170] sm:$0xff]  ;;  %v461_v53 = vld [vmem:[%s6895_s16 + $0x178] sm:$0xff] }
  0x23   : > { %v1884_v1 = vld [vmem:[%s8949_s1 + $0x98] sm:$0xff]  ;;  %v1886_v3 = vld [vmem:[%s8949_s1 + $0xa8] sm:$0xff]  ;;  %v1869_v6 = vld [vmem:[%s8949_s1 + $0x20] sm:$0xff] }
  0x24   : > { %5813 = vmatmul.mubr.msk.f32.gmra.mrb[6].mxu0 %vm473_vm3, %v421_v13  ;;  %1970 = vperm.xlu1 %6493, %v1876_v61   ;;  %v1866_v4 = vld [vmem:[%s8949_s1 + $0x8] sm:$0xff]  ;;  %v1888_v5 = vld [vmem:[%s8949_s1 + $0xb8] sm:$0xff]  ;;  %v1871_v8 = vld [vmem:[%s8949_s1 + $0x30] sm:$0xff] }
  0x25   : > { %5815 = vmatprep.mubr.msk.f32.mxu0 %vm473_vm3, %v422_v14  ;;  %1920 = vperm.xlu0 %6492, %v1866_v4   ;;  %v1890_v7 = vld [vmem:[%s8949_s1 + $0xc8] sm:$0xff]  ;;  %v1892_v9 = vld [vmem:[%s8949_s1 + $0xd8] sm:$0xff]  ;;  %v1873_v10 = vld [vmem:[%s8949_s1 + $0x40] sm:$0xff] }
  0x26   : > { %v1894_v11 = vld [vmem:[%s8949_s1 + $0xe8] sm:$0xff]  ;;  %v1875_v12 = vld [vmem:[%s8949_s1 + $0x50] sm:$0xff]  ;;  %v1896_v13 = vld [vmem:[%s8949_s1 + $0xf8] sm:$0xff] }
  0x27   : > { %v1877_v14 = vld [vmem:[%s8949_s1 + $0x60] sm:$0xff] }
  0x28   : > { %5816 = vmatmul.mubr.msk.f32.gmra.mrb[8].mxu0 %vm473_vm3, %v423_v15  ;;  %1980 = vperm.xlu1 %6493, %v1878_v62   ;;  %v1898_v15 = vld [vmem:[%s8949_s1 + $0x108] sm:$0xff] }
  0x29   : > { %5818 = vmatprep.mubr.msk.f32.mxu0 %vm473_vm3, %v424_v16  ;;  %1935 = vperm.xlu0 %6492, %v1869_v6   ;;  %v1879_v16 = vld [vmem:[%s8949_s1 + $0x70] sm:$0xff] }
  0x2c   : > { %5819 = vmatmul.mubr.msk.f32.gmra.mrb[10].mxu0 %vm473_vm3, %v425_v17  ;;  %1990 = vperm.xlu1 %6493, %v1880_v63   ;;  %v1900_v17 = vld [vmem:[%s8949_s1 + $0x118] sm:$0xff] }
  0x2d   : > { %5821 = vmatprep.mubr.msk.f32.mxu0 %vm473_vm3, %v426_v18  ;;  %1945 = vperm.xlu0 %6492, %v1871_v8   ;;  %v1881_v18 = vld [vmem:[%s8949_s1 + $0x80] sm:$0xff] }
  0x30   : > { %5822 = vmatmul.mubr.msk.f32.gmra.mrb[12].mxu0 %vm473_vm3, %v427_v19  ;;  %2000 = vperm.xlu1 %6493, %v1882_v0   ;;  %v1902_v19 = vld [vmem:[%s8949_s1 + $0x128] sm:$0xff] }
  0x31   : > { %5824 = vmatprep.mubr.msk.f32.mxu0 %vm473_vm3, %v428_v20  ;;  %1955 = vperm.xlu0 %6492, %v1873_v10   ;;  %v1883_v20 = vld [vmem:[%s8949_s1 + $0x90] sm:$0xff] }
  0x34   : > { %5825 = vmatmul.mubr.msk.f32.gmra.mrb[14].mxu0 %vm473_vm3, %v429_v21  ;;  %2010 = vperm.xlu1 %6493, %v1884_v1   ;;  %v1903_v21 = vld [vmem:[%s8949_s1 + $0x130] sm:$0xff] }
  0x35   : > { %5827 = vmatprep.mubr.msk.f32.mxu0 %vm473_vm3, %v430_v22  ;;  %1965 = vperm.xlu0 %6492, %v1875_v12   ;;  %v1885_v22 = vld [vmem:[%s8949_s1 + $0xa0] sm:$0xff] }
  0x38   : > { %5828 = vmatmul.mubr.msk.f32.gmra.mrb[16].mxu0 %vm473_vm3, %v431_v23  ;;  %2020 = vperm.xlu1 %6493, %v1886_v3   ;;  %v1904_v23 = vld [vmem:[%s8949_s1 + $0x138] sm:$0xff] }
  0x39   : > { %5830 = vmatprep.mubr.msk.f32.mxu0 %vm473_vm3, %v432_v24  ;;  %1975 = vperm.xlu0 %6492, %v1877_v14   ;;  %v1887_v24 = vld [vmem:[%s8949_s1 + $0xb0] sm:$0xff] }
  0x3c   : > { %5831 = vmatmul.mubr.msk.f32.gmra.mrb[18].mxu0 %vm473_vm3, %v433_v25  ;;  %2030 = vperm.xlu1 %6493, %v1888_v5   ;;  %v1905_v25 = vld [vmem:[%s8949_s1 + $0x140] sm:$0xff] }
  0x3d   : > { %5833 = vmatprep.mubr.msk.f32.mxu0 %vm473_vm3, %v434_v26  ;;  %1985 = vperm.xlu0 %6492, %v1879_v16   ;;  %v1889_v26 = vld [vmem:[%s8949_s1 + $0xc0] sm:$0xff] }
  0x40   : > { %5834 = vmatmul.mubr.msk.f32.gmra.mrb[20].mxu0 %vm473_vm3, %v435_v27  ;;  %2040 = vperm.xlu1 %6493, %v1890_v7   ;;  %v1906_v27 = vld [vmem:[%s8949_s1 + $0x148] sm:$0xff] }
  0x41   : > { %5836 = vmatprep.mubr.msk.f32.mxu0 %vm473_vm3, %v436_v28  ;;  %1995 = vperm.xlu0 %6492, %v1881_v18   ;;  %v1891_v28 = vld [vmem:[%s8949_s1 + $0xd0] sm:$0xff] }
  0x44   : > { %5837 = vmatmul.mubr.msk.f32.gmra.mrb[22].mxu0 %vm473_vm3, %v437_v29  ;;  %2050 = vperm.xlu1 %6493, %v1892_v9   ;;  %v1907_v29 = vld [vmem:[%s8949_s1 + $0x150] sm:$0xff] }
  0x45   : > { %5839 = vmatprep.mubr.msk.f32.mxu0 %vm473_vm3, %v438_v30  ;;  %2005 = vperm.xlu0 %6492, %v1883_v20   ;;  %v1893_v30 = vld [vmem:[%s8949_s1 + $0xe0] sm:$0xff] }
  0x48   : > { %5840 = vmatmul.mubr.msk.f32.gmra.mrb[24].mxu0 %vm473_vm3, %v439_v31  ;;  %2060 = vperm.xlu1 %6493, %v1894_v11   ;;  %v1908_v31 = vld [vmem:[%s8949_s1 + $0x158] sm:$0xff] }
  0x49   : > { %5842 = vmatprep.mubr.msk.f32.mxu0 %vm473_vm3, %v440_v32  ;;  %2015 = vperm.xlu0 %6492, %v1885_v22   ;;  %v1895_v32 = vld [vmem:[%s8949_s1 + $0xf0] sm:$0xff] }
  0x4c   : > { %5843 = vmatmul.mubr.msk.f32.gmra.mrb[26].mxu0 %vm473_vm3, %v441_v33  ;;  %2070 = vperm.xlu1 %6493, %v1896_v13   ;;  %v1909_v33 = vld [vmem:[%s8949_s1 + $0x160] sm:$0xff] }
  0x4d   : > { %5845 = vmatprep.mubr.msk.f32.mxu0 %vm473_vm3, %v442_v34  ;;  %2025 = vperm.xlu0 %6492, %v1887_v24   ;;  %v1897_v34 = vld [vmem:[%s8949_s1 + $0x100] sm:$0xff] }
  0x50   : > { %5846 = vmatmul.mubr.msk.f32.gmra.mrb[28].mxu0 %vm473_vm3, %v443_v35  ;;  %2080 = vperm.xlu1 %6493, %v1898_v15   ;;  %v1910_v35 = vld [vmem:[%s8949_s1 + $0x168] sm:$0xff] }
  0x51   : > { %5848 = vmatprep.mubr.msk.f32.mxu0 %vm473_vm3, %v444_v36  ;;  %2035 = vperm.xlu0 %6492, %v1889_v26   ;;  %v1899_v36 = vld [vmem:[%s8949_s1 + $0x110] sm:$0xff] }
  0x54   : > { %5849 = vmatmul.mubr.msk.f32.gmra.mrb[30].mxu0 %vm473_vm3, %v445_v37  ;;  %2090 = vperm.xlu1 %6493, %v1900_v17   ;;  %v1911_v37 = vld [vmem:[%s8949_s1 + $0x170] sm:$0xff] }
  0x55   : > { %5851 = vmatprep.mubr.msk.f32.mxu0 %vm473_vm3, %v446_v38  ;;  %2045 = vperm.xlu0 %6492, %v1891_v28   ;;  %v1901_v38 = vld [vmem:[%s8949_s1 + $0x120] sm:$0xff] }
  0x58   : > { %5852 = vmatmul.mubr.msk.f32.gmra.mrb[32].mxu0 %vm473_vm3, %v447_v39  ;;  %2100 = vperm.xlu1 %6493, %v1902_v19   ;;  %v1912_v39 = vld [vmem:[%s8949_s1 + $0x178] sm:$0xff] }
  0x59   : > { %5854 = vmatprep.mubr.msk.f32.mxu0 %vm473_vm3, %v448_v40  ;;  %2055 = vperm.xlu0 %6492, %v1893_v30   ;;  %v7143_v40 = vld [vmem:[%s8952_s4] ss:$0 sm:$0xff] }
  0x5c   : > { %5855 = vmatmul.mubr.msk.f32.gmra.mrb[34].mxu0 %vm473_vm3, %v449_v41  ;;  %2105 = vperm.xlu1 %6493, %v1903_v21  }
  0x5d   : > { %5857 = vmatprep.mubr.msk.f32.mxu0 %vm473_vm3, %v450_v42  ;;  %2065 = vperm.xlu0 %6492, %v1895_v32  }
  0x60   : > { %5858 = vmatmul.mubr.msk.f32.gmra.mrb[36].mxu0 %vm473_vm3, %v451_v43  ;;  %2110 = vperm.xlu1 %6493, %v1904_v23  }
  0x61   : > { %5860 = vmatprep.mubr.msk.f32.mxu0 %vm473_vm3, %v452_v44  ;;  %2075 = vperm.xlu0 %6492, %v1897_v34  }
  0x64   : > { %5861 = vmatmul.mubr.msk.f32.gmra.mrb[38].mxu0 %vm473_vm3, %v453_v45  ;;  %2115 = vperm.xlu1 %6493, %v1905_v25  }
  0x65   : > { %5863 = vmatprep.mubr.msk.f32.mxu0 %vm473_vm3, %v454_v46  ;;  %2085 = vperm.xlu0 %6492, %v1899_v36  }
  0x68   : > { %5864 = vmatmul.mubr.msk.f32.gmra.mrb[40].mxu0 %vm473_vm3, %v455_v47  ;;  %2120 = vperm.xlu1 %6493, %v1906_v27  }
  0x69   : > { %5866 = vmatprep.mubr.msk.f32.mxu0 %vm473_vm3, %v456_v48  ;;  %2095 = vperm.xlu0 %6492, %v1901_v38  }
  0x6c   : > { %5867 = vmatmul.mubr.msk.f32.gmra.mrb[42].mxu0 %vm473_vm3, %v457_v49  ;;  %2125 = vperm.xlu1 %6493, %v1907_v29  }
  0x6d   : > { %5869 = vmatprep.mubr.msk.f32.mxu0 %vm473_vm3, %v458_v50 }
  0x70   : > { %5870 = vmatmul.mubr.msk.f32.gmra.mrb[44].mxu0 %vm473_vm3, %v459_v51  ;;  %2130 = vperm.xlu1 %6493, %v1908_v31  }
  0x71   : > { %5872 = vmatprep.mubr.msk.f32.mxu0 %vm473_vm3, %v460_v52 }
  0x74   : > { %5873 = vmatmul.mubr.msk.f32.gmra.mrb[46].mxu0 %vm473_vm3, %v461_v53  ;;  %2135 = vperm.xlu1 %6493, %v1909_v33  }
  0x78   : > { %2140 = vperm.xlu1 %6493, %v1910_v35  }
  0x7c   : > { %2145 = vperm.xlu1 %6493, %v1911_v37  }
  0x80   : > { %2150 = vperm.xlu1 %6493, %v1912_v39  }
  0xeb   : > { %v5805_v41 = vpop.f32.mrb[0].mxu0 }
  0xec   : > { %v694_v42 = vadd.f32 %v5805_v41, %v7143_v40  ;;  %v688_v43 = vpop.f32.mrb[1].mxu0 }
  0xed   : > { %v689_v44 = vadd.f32 %v7143_v40, %v688_v43 }
  0xee   : > { %v976_v45 = vmul.f32 0.70710677, %v694_v42  ;;  %v928_v9 = vmul.f32 0.5, %v694_v42 }
  0xef   : > { %v975_v46 = vmul.f32 0.70710677, %v689_v44  ;;  %v5808_v47 = vpop.f32.mrb[2].mxu0  ;;  %v927_v5 = vmul.f32 0.5, %v689_v44 }
  0xf0   : > { %6494 = verf.f32 %v976_v45  ;;  %v704_v48 = vadd.f32 %v5808_v47, %v7143_v40  ;;  %v698_v49 = vpop.f32.mrb[3].mxu0 }
  0xf1   : > { %6496 = verf.f32 %v975_v46  ;;  %v699_v50 = vadd.f32 %v7143_v40, %v698_v49 }
  0xf2   : > { %v978_v51 = vmul.f32 0.70710677, %v704_v48  ;;  %v930_v23 = vmul.f32 0.5, %v704_v48 }
  0xf3   : > { %v977_v52 = vmul.f32 0.70710677, %v699_v50  ;;  %v5811_v53 = vpop.f32.mrb[4].mxu0  ;;  %v929_v19 = vmul.f32 0.5, %v699_v50 }
  0xf4   : > { %6498 = verf.f32 %v978_v51  ;;  %v714_v54 = vadd.f32 %v5811_v53, %v7143_v40  ;;  %v708_v55 = vpop.f32.mrb[5].mxu0 }
  0xf5   : > { %6500 = verf.f32 %v977_v52  ;;  %v709_v56 = vadd.f32 %v7143_v40, %v708_v55 }
  0xf6   : > { %v980_v57 = vmul.f32 0.70710677, %v714_v54  ;;  %v932_v37 = vmul.f32 0.5, %v714_v54 }
  0xf7   : > { %v979_v58 = vmul.f32 0.70710677, %v709_v56  ;;  %v5814_v59 = vpop.f32.mrb[6].mxu0  ;;  %v931_v33 = vmul.f32 0.5, %v709_v56 }
  0xf8   : > { %6502 = verf.f32 %v980_v57  ;;  %v724_v60 = vadd.f32 %v5814_v59, %v7143_v40  ;;  %v718_v61 = vpop.f32.mrb[7].mxu0 }
  0xf9   : > { %6504 = verf.f32 %v979_v58  ;;  %v719_v62 = vadd.f32 %v7143_v40, %v718_v61 }
  0xfa   : > { %v6495_v63 = vpop.eup %6494  ;;  %v982_v0 = vmul.f32 0.70710677, %v724_v60  ;;  %v934_v45 = vmul.f32 0.5, %v724_v60 }
  0xfb   : > { %v6497_v1 = vpop.eup %6496  ;;  %v1072_v2 = vadd.f32 1.0, %v6495_v63  ;;  %v981_v3 = vmul.f32 0.70710677, %v719_v62  ;;  %v5817_v4 = vpop.f32.mrb[8].mxu0  ;;  %v933_v49 = vmul.f32 0.5, %v719_v62 }
  0xfc   : > { %6506 = verf.f32 %v982_v0  ;;  %v734_v6 = vadd.f32 %v5817_v4, %v7143_v40  ;;  %v728_v7 = vpop.f32.mrb[9].mxu0  ;;  %v1071_v8 = vadd.f32 1.0, %v6497_v1 }
  0xfd   : > { %6508 = verf.f32 %v981_v3  ;;  %v729_v10 = vadd.f32 %v7143_v40, %v728_v7  ;;  %v1120_v15 = vmul.f32 %v1072_v2, %v928_v9 }
  0xfe   : > { %v6499_v11 = vpop.eup %6498  ;;  %v984_v12 = vmul.f32 0.70710677, %v734_v6  ;;  %v1119_v13 = vmul.f32 %v1071_v8, %v927_v5  ;;  %v936_v53 = vmul.f32 0.5, %v734_v6 }
  0xff   : > { %v6501_v14 = vpop.eup %6500  ;;  %v1074_v16 = vadd.f32 1.0, %v6499_v11  ;;  %v983_v17 = vmul.f32 0.70710677, %v729_v10  ;;  %v5820_v18 = vpop.f32.mrb[10].mxu0  ;;  %v935_v57 = vmul.f32 0.5, %v729_v10 }
 0x100   : > { %v1073_v20 = vadd.f32 1.0, %v6501_v14  ;;  %6510 = verf.f32 %v984_v12  ;;  %v744_v21 = vadd.f32 %v5820_v18, %v7143_v40  ;;  %v738_v22 = vpop.f32.mrb[11].mxu0  ;;  %5877 = vmatprep.mubr.msk.f32.mxu1 %vm1175_vm4, %v1119_v13 }
 0x101   : > { %6512 = verf.f32 %v983_v17  ;;  %v739_v24 = vadd.f32 %v7143_v40, %v738_v22  ;;  %5878 = vmatmul.mubr.msk.f32.vlgmr.msra.gmra.mrb[0].mxu1 %vm1175_vm4, %v1120_v15  ;;  %v1122_v29 = vmul.f32 %v1074_v16, %v930_v23 }
 0x102   : > { %v6503_v25 = vpop.eup %6502  ;;  %v1121_v26 = vmul.f32 %v1073_v20, %v929_v19  ;;  %v986_v27 = vmul.f32 0.70710677, %v744_v21  ;;  %v938_v4 = vmul.f32 0.5, %v744_v21 }
 0x103   : > { %v6505_v28 = vpop.eup %6504  ;;  %v1076_v30 = vadd.f32 1.0, %v6503_v25  ;;  %v985_v31 = vmul.f32 0.70710677, %v739_v24  ;;  %v5823_v32 = vpop.f32.mrb[12].mxu0  ;;  %v937_v8 = vmul.f32 0.5, %v739_v24 }
 0x104   : > { %v1075_v34 = vadd.f32 1.0, %v6505_v28  ;;  %6514 = verf.f32 %v986_v27  ;;  %v754_v35 = vadd.f32 %v5823_v32, %v7143_v40  ;;  %v748_v36 = vpop.f32.mrb[13].mxu0  ;;  %5880 = vmatprep.mubr.msk.f32.mxu1 %vm1175_vm4, %v1121_v26 }
 0x105   : > { %6516 = verf.f32 %v985_v31  ;;  %v749_v38 = vadd.f32 %v7143_v40, %v748_v36  ;;  %5881 = vmatmul.mubr.msk.f32.gmra.mrb[2].mxu1 %vm1175_vm4, %v1122_v29  ;;  %v1124_v44 = vmul.f32 %v1076_v30, %v932_v37 }
 0x106   : > { %v6507_v39 = vpop.eup %6506  ;;  %v1123_v41 = vmul.f32 %v1075_v34, %v931_v33  ;;  %v988_v42 = vmul.f32 0.70710677, %v754_v35  ;;  %v940_v18 = vmul.f32 0.5, %v754_v35 }
 0x107   : > { %v6509_v43 = vpop.eup %6508  ;;  %v1078_v46 = vadd.f32 1.0, %v6507_v39  ;;  %v987_v47 = vmul.f32 0.70710677, %v749_v38  ;;  %v5826_v48 = vpop.f32.mrb[14].mxu0  ;;  %v939_v22 = vmul.f32 0.5, %v749_v38 }
 0x108   : > { %v1077_v50 = vadd.f32 1.0, %v6509_v43  ;;  %6518 = verf.f32 %v988_v42  ;;  %v764_v51 = vadd.f32 %v5826_v48, %v7143_v40  ;;  %v758_v52 = vpop.f32.mrb[15].mxu0  ;;  %5883 = vmatprep.mubr.msk.f32.mxu1 %vm1175_vm4, %v1123_v41 }
 0x109   : > { %6520 = verf.f32 %v987_v47  ;;  %v759_v54 = vadd.f32 %v7143_v40, %v758_v52  ;;  %5884 = vmatmul.mubr.msk.f32.gmra.mrb[4].mxu1 %vm1175_vm4, %v1124_v44  ;;  %v1126_v60 = vmul.f32 %v1078_v46, %v934_v45 }
 0x10a   : > { %v6511_v55 = vpop.eup %6510  ;;  %v1125_v56 = vmul.f32 %v1077_v50, %v933_v49  ;;  %v990_v58 = vmul.f32 0.70710677, %v764_v51  ;;  %v942_v32 = vmul.f32 0.5, %v764_v51 }
 0x10b   : > { %v6513_v59 = vpop.eup %6512  ;;  %v1080_v61 = vadd.f32 1.0, %v6511_v55  ;;  %v989_v62 = vmul.f32 0.70710677, %v759_v54  ;;  %v5829_v63 = vpop.f32.mrb[16].mxu0  ;;  %v941_v36 = vmul.f32 0.5, %v759_v54 }
 0x10c   : > { %v1079_v0 = vadd.f32 1.0, %v6513_v59  ;;  %6522 = verf.f32 %v990_v58  ;;  %v774_v1 = vadd.f32 %v5829_v63, %v7143_v40  ;;  %v768_v2 = vpop.f32.mrb[17].mxu0  ;;  %5886 = vmatprep.mubr.msk.f32.mxu1 %vm1175_vm4, %v1125_v56 }
 0x10d   : > { %v1128_v3 = vmul.f32 %v1080_v61, %v936_v53  ;;  %6524 = verf.f32 %v989_v62  ;;  %v769_v5 = vadd.f32 %v7143_v40, %v768_v2  ;;  %5887 = vmatmul.mubr.msk.f32.gmra.mrb[6].mxu1 %vm1175_vm4, %v1126_v60 }
 0x10e   : > { %v6515_v6 = vpop.eup %6514  ;;  %v1127_v7 = vmul.f32 %v1079_v0, %v935_v57  ;;  %v992_v9 = vmul.f32 0.70710677, %v774_v1  ;;  %v944_v47 = vmul.f32 0.5, %v774_v1 }
 0x10f   : > { %v6517_v10 = vpop.eup %6516  ;;  %v1082_v11 = vadd.f32 1.0, %v6515_v6  ;;  %v991_v12 = vmul.f32 0.70710677, %v769_v5  ;;  %v5832_v13 = vpop.f32.mrb[18].mxu0  ;;  %v943_v51 = vmul.f32 0.5, %v769_v5 }
 0x110   : > { %v1081_v14 = vadd.f32 1.0, %v6517_v10  ;;  %6526 = verf.f32 %v992_v9  ;;  %v784_v15 = vadd.f32 %v5832_v13, %v7143_v40  ;;  %v778_v16 = vpop.f32.mrb[19].mxu0  ;;  %5889 = vmatprep.mubr.msk.f32.mxu1 %vm1175_vm4, %v1127_v7 }
 0x111   : > { %v1130_v17 = vmul.f32 %v1082_v11, %v938_v4  ;;  %6528 = verf.f32 %v991_v12  ;;  %v779_v19 = vadd.f32 %v7143_v40, %v778_v16  ;;  %5890 = vmatmul.mubr.msk.f32.gmra.mrb[8].mxu1 %vm1175_vm4, %v1128_v3 }
 0x112   : > { %v6519_v20 = vpop.eup %6518  ;;  %v1129_v21 = vmul.f32 %v1081_v14, %v937_v8  ;;  %v994_v23 = vmul.f32 0.70710677, %v784_v15  ;;  %v946_v61 = vmul.f32 0.5, %v784_v15 }
 0x113   : > { %v6521_v24 = vpop.eup %6520  ;;  %v1084_v25 = vadd.f32 1.0, %v6519_v20  ;;  %v993_v26 = vmul.f32 0.70710677, %v779_v19  ;;  %v5835_v27 = vpop.f32.mrb[20].mxu0  ;;  %v945_v1 = vmul.f32 0.5, %v779_v19 }
 0x114   : > { %v1083_v28 = vadd.f32 1.0, %v6521_v24  ;;  %6530 = verf.f32 %v994_v23  ;;  %v794_v29 = vadd.f32 %v5835_v27, %v7143_v40  ;;  %v788_v30 = vpop.f32.mrb[21].mxu0  ;;  %5892 = vmatprep.mubr.msk.f32.mxu1 %vm1175_vm4, %v1129_v21 }
 0x115   : > { %v1132_v31 = vmul.f32 %v1084_v25, %v940_v18  ;;  %6532 = verf.f32 %v993_v26  ;;  %v789_v33 = vadd.f32 %v7143_v40, %v788_v30  ;;  %5893 = vmatmul.mubr.msk.f32.gmra.mrb[10].mxu1 %vm1175_vm4, %v1130_v17 }
 0x116   : > { %v6523_v34 = vpop.eup %6522  ;;  %v1131_v35 = vmul.f32 %v1083_v28, %v939_v22  ;;  %v996_v37 = vmul.f32 0.70710677, %v794_v29  ;;  %v948_v11 = vmul.f32 0.5, %v794_v29 }
 0x117   : > { %v6525_v38 = vpop.eup %6524  ;;  %v1086_v39 = vadd.f32 1.0, %v6523_v34  ;;  %v995_v41 = vmul.f32 0.70710677, %v789_v33  ;;  %v5838_v42 = vpop.f32.mrb[22].mxu0  ;;  %v947_v15 = vmul.f32 0.5, %v789_v33 }
 0x118   : > { %v1085_v43 = vadd.f32 1.0, %v6525_v38  ;;  %6534 = verf.f32 %v996_v37  ;;  %v804_v44 = vadd.f32 %v5838_v42, %v7143_v40  ;;  %v798_v45 = vpop.f32.mrb[23].mxu0  ;;  %5895 = vmatprep.mubr.msk.f32.mxu1 %vm1175_vm4, %v1131_v35 }
 0x119   : > { %v1134_v46 = vmul.f32 %v1086_v39, %v942_v32  ;;  %6536 = verf.f32 %v995_v41  ;;  %v799_v48 = vadd.f32 %v7143_v40, %v798_v45  ;;  %5896 = vmatmul.mubr.msk.f32.gmra.mrb[12].mxu1 %vm1175_vm4, %v1132_v31 }
 0x11a   : > { %v6527_v49 = vpop.eup %6526  ;;  %v1133_v50 = vmul.f32 %v1085_v43, %v941_v36  ;;  %v998_v52 = vmul.f32 0.70710677, %v804_v44  ;;  %v950_v25 = vmul.f32 0.5, %v804_v44 }
 0x11b   : > { %v6529_v53 = vpop.eup %6528  ;;  %v1088_v54 = vadd.f32 1.0, %v6527_v49  ;;  %v997_v55 = vmul.f32 0.70710677, %v799_v48  ;;  %v5841_v56 = vpop.f32.mrb[24].mxu0  ;;  %v949_v29 = vmul.f32 0.5, %v799_v48 }
 0x11c   : > { %v1087_v57 = vadd.f32 1.0, %v6529_v53  ;;  %6538 = verf.f32 %v998_v52  ;;  %v814_v58 = vadd.f32 %v5841_v56, %v7143_v40  ;;  %v808_v59 = vpop.f32.mrb[25].mxu0  ;;  %5898 = vmatprep.mubr.msk.f32.mxu1 %vm1175_vm4, %v1133_v50 }
 0x11d   : > { %v1136_v60 = vmul.f32 %v1088_v54, %v944_v47  ;;  %6540 = verf.f32 %v997_v55  ;;  %v809_v62 = vadd.f32 %v7143_v40, %v808_v59  ;;  %5899 = vmatmul.mubr.msk.f32.gmra.mrb[14].mxu1 %vm1175_vm4, %v1134_v46 }
 0x11e   : > { %v6531_v63 = vpop.eup %6530  ;;  %v1135_v0 = vmul.f32 %v1087_v57, %v943_v51  ;;  %v1000_v2 = vmul.f32 0.70710677, %v814_v58  ;;  %v952_v39 = vmul.f32 0.5, %v814_v58 }
 0x11f   : > { %v6533_v3 = vpop.eup %6532  ;;  %v1090_v4 = vadd.f32 1.0, %v6531_v63  ;;  %v999_v5 = vmul.f32 0.70710677, %v809_v62  ;;  %v5844_v6 = vpop.f32.mrb[26].mxu0  ;;  %v951_v44 = vmul.f32 0.5, %v809_v62 }
 0x120   : > { %v1089_v7 = vadd.f32 1.0, %v6533_v3  ;;  %6542 = verf.f32 %v1000_v2  ;;  %v824_v8 = vadd.f32 %v5844_v6, %v7143_v40  ;;  %v818_v9 = vpop.f32.mrb[27].mxu0  ;;  %5901 = vmatprep.mubr.msk.f32.mxu1 %vm1175_vm4, %v1135_v0 }
 0x121   : > { %v1138_v10 = vmul.f32 %v1090_v4, %v946_v61  ;;  %6544 = verf.f32 %v999_v5  ;;  %v819_v12 = vadd.f32 %v7143_v40, %v818_v9  ;;  %5902 = vmatmul.mubr.msk.f32.gmra.mrb[16].mxu1 %vm1175_vm4, %v1136_v60 }
 0x122   : > { %v6535_v13 = vpop.eup %6534  ;;  %v1137_v14 = vmul.f32 %v1089_v7, %v945_v1  ;;  %v1002_v16 = vmul.f32 0.70710677, %v824_v8  ;;  %v954_v54 = vmul.f32 0.5, %v824_v8 }
 0x123   : > { %v6537_v17 = vpop.eup %6536  ;;  %v1092_v18 = vadd.f32 1.0, %v6535_v13  ;;  %v1001_v19 = vmul.f32 0.70710677, %v819_v12  ;;  %v5847_v20 = vpop.f32.mrb[28].mxu0  ;;  %v953_v58 = vmul.f32 0.5, %v819_v12 }
 0x124   : > { %v1091_v21 = vadd.f32 1.0, %v6537_v17  ;;  %6546 = verf.f32 %v1002_v16  ;;  %v834_v22 = vadd.f32 %v5847_v20, %v7143_v40  ;;  %v828_v23 = vpop.f32.mrb[29].mxu0  ;;  %5904 = vmatprep.mubr.msk.f32.mxu1 %vm1175_vm4, %v1137_v14 }
 0x125   : > { %v1140_v24 = vmul.f32 %v1092_v18, %v948_v11  ;;  %6548 = verf.f32 %v1001_v19  ;;  %v829_v26 = vadd.f32 %v7143_v40, %v828_v23  ;;  %5905 = vmatmul.mubr.msk.f32.gmra.mrb[18].mxu1 %vm1175_vm4, %v1138_v10 }
 0x126   : > { %v6539_v27 = vpop.eup %6538  ;;  %v1139_v28 = vmul.f32 %v1091_v21, %v947_v15  ;;  %v1004_v30 = vmul.f32 0.70710677, %v834_v22  ;;  %v956_v4 = vmul.f32 0.5, %v834_v22 }
 0x127   : > { %v6541_v31 = vpop.eup %6540  ;;  %v1094_v32 = vadd.f32 1.0, %v6539_v27  ;;  %v1003_v33 = vmul.f32 0.70710677, %v829_v26  ;;  %v5850_v34 = vpop.f32.mrb[30].mxu0  ;;  %v955_v8 = vmul.f32 0.5, %v829_v26 }
 0x128   : > { %v1093_v35 = vadd.f32 1.0, %v6541_v31  ;;  %6550 = verf.f32 %v1004_v30  ;;  %v844_v36 = vadd.f32 %v5850_v34, %v7143_v40  ;;  %v838_v37 = vpop.f32.mrb[31].mxu0  ;;  %5907 = vmatprep.mubr.msk.f32.mxu1 %vm1175_vm4, %v1139_v28 }
 0x129   : > { %v1142_v38 = vmul.f32 %v1094_v32, %v950_v25  ;;  %6552 = verf.f32 %v1003_v33  ;;  %v839_v41 = vadd.f32 %v7143_v40, %v838_v37  ;;  %5908 = vmatmul.mubr.msk.f32.gmra.mrb[20].mxu1 %vm1175_vm4, %v1140_v24 }
 0x12a   : > { %v6543_v42 = vpop.eup %6542  ;;  %v1141_v43 = vmul.f32 %v1093_v35, %v949_v29  ;;  %v1006_v45 = vmul.f32 0.70710677, %v844_v36  ;;  %v958_v18 = vmul.f32 0.5, %v844_v36 }
 0x12b   : > { %v6545_v46 = vpop.eup %6544  ;;  %v1096_v47 = vadd.f32 1.0, %v6543_v42  ;;  %v1005_v48 = vmul.f32 0.70710677, %v839_v41  ;;  %v5853_v49 = vpop.f32.mrb[32].mxu0  ;;  %v957_v22 = vmul.f32 0.5, %v839_v41 }
 0x12c   : > { %v1095_v50 = vadd.f32 1.0, %v6545_v46  ;;  %6554 = verf.f32 %v1006_v45  ;;  %v854_v51 = vadd.f32 %v5853_v49, %v7143_v40  ;;  %v848_v52 = vpop.f32.mrb[33].mxu0  ;;  %5910 = vmatprep.mubr.msk.f32.mxu1 %vm1175_vm4, %v1141_v43 }
 0x12d   : > { %v1144_v53 = vmul.f32 %v1096_v47, %v952_v39  ;;  %6556 = verf.f32 %v1005_v48  ;;  %v849_v55 = vadd.f32 %v7143_v40, %v848_v52  ;;  %5911 = vmatmul.mubr.msk.f32.gmra.mrb[22].mxu1 %vm1175_vm4, %v1142_v38 }
 0x12e   : > { %v6547_v56 = vpop.eup %6546  ;;  %v1143_v57 = vmul.f32 %v1095_v50, %v951_v44  ;;  %v1008_v59 = vmul.f32 0.70710677, %v854_v51  ;;  %v960_v32 = vmul.f32 0.5, %v854_v51 }
 0x12f   : > { %v6549_v60 = vpop.eup %6548  ;;  %v1098_v61 = vadd.f32 1.0, %v6547_v56  ;;  %v1007_v62 = vmul.f32 0.70710677, %v849_v55  ;;  %v5856_v63 = vpop.f32.mrb[34].mxu0  ;;  %v959_v36 = vmul.f32 0.5, %v849_v55 }
 0x130   : > { %v1097_v0 = vadd.f32 1.0, %v6549_v60  ;;  %6558 = verf.f32 %v1008_v59  ;;  %v864_v1 = vadd.f32 %v5856_v63, %v7143_v40  ;;  %v858_v2 = vpop.f32.mrb[35].mxu0  ;;  %5913 = vmatprep.mubr.msk.f32.mxu1 %vm1175_vm4, %v1143_v57 }
 0x131   : > { %v1146_v3 = vmul.f32 %v1098_v61, %v954_v54  ;;  %6560 = verf.f32 %v1007_v62  ;;  %v859_v5 = vadd.f32 %v7143_v40, %v858_v2  ;;  %5914 = vmatmul.mubr.msk.f32.gmra.mrb[24].mxu1 %vm1175_vm4, %v1144_v53 }
 0x132   : > { %v6551_v6 = vpop.eup %6550  ;;  %v1145_v7 = vmul.f32 %v1097_v0, %v953_v58  ;;  %v1010_v9 = vmul.f32 0.70710677, %v864_v1  ;;  %v962_v47 = vmul.f32 0.5, %v864_v1 }
 0x133   : > { %v6553_v10 = vpop.eup %6552  ;;  %v1100_v11 = vadd.f32 1.0, %v6551_v6  ;;  %v1009_v12 = vmul.f32 0.70710677, %v859_v5  ;;  %v5859_v13 = vpop.f32.mrb[36].mxu0  ;;  %v961_v51 = vmul.f32 0.5, %v859_v5 }
 0x134   : > { %v1099_v14 = vadd.f32 1.0, %v6553_v10  ;;  %6562 = verf.f32 %v1010_v9  ;;  %v874_v15 = vadd.f32 %v5859_v13, %v7143_v40  ;;  %v868_v16 = vpop.f32.mrb[37].mxu0  ;;  %5916 = vmatprep.mubr.msk.f32.mxu1 %vm1175_vm4, %v1145_v7 }
 0x135   : > { %v1148_v17 = vmul.f32 %v1100_v11, %v956_v4  ;;  %6564 = verf.f32 %v1009_v12  ;;  %v869_v19 = vadd.f32 %v7143_v40, %v868_v16  ;;  %5917 = vmatmul.mubr.msk.f32.gmra.mrb[26].mxu1 %vm1175_vm4, %v1146_v3 }
 0x136   : > { %v6555_v20 = vpop.eup %6554  ;;  %v1147_v21 = vmul.f32 %v1099_v14, %v955_v8  ;;  %v1012_v23 = vmul.f32 0.70710677, %v874_v15  ;;  %v964_v61 = vmul.f32 0.5, %v874_v15 }
 0x137   : > { %v6557_v24 = vpop.eup %6556  ;;  %v1102_v25 = vadd.f32 1.0, %v6555_v20  ;;  %v1011_v26 = vmul.f32 0.70710677, %v869_v19  ;;  %v5862_v27 = vpop.f32.mrb[38].mxu0  ;;  %v963_v1 = vmul.f32 0.5, %v869_v19 }
 0x138   : > { %v1101_v28 = vadd.f32 1.0, %v6557_v24  ;;  %6566 = verf.f32 %v1012_v23  ;;  %v884_v29 = vadd.f32 %v5862_v27, %v7143_v40  ;;  %v878_v30 = vpop.f32.mrb[39].mxu0  ;;  %5919 = vmatprep.mubr.msk.f32.mxu1 %vm1175_vm4, %v1147_v21 }
 0x139   : > { %v1150_v31 = vmul.f32 %v1102_v25, %v958_v18  ;;  %6568 = verf.f32 %v1011_v26  ;;  %v879_v33 = vadd.f32 %v7143_v40, %v878_v30  ;;  %5920 = vmatmul.mubr.msk.f32.gmra.mrb[28].mxu1 %vm1175_vm4, %v1148_v17 }
 0x13a   : > { %v6559_v34 = vpop.eup %6558  ;;  %v1149_v35 = vmul.f32 %v1101_v28, %v957_v22  ;;  %v1014_v37 = vmul.f32 0.70710677, %v884_v29  ;;  %v966_v11 = vmul.f32 0.5, %v884_v29 }
 0x13b   : > { %v6561_v38 = vpop.eup %6560  ;;  %v1104_v39 = vadd.f32 1.0, %v6559_v34  ;;  %v1013_v41 = vmul.f32 0.70710677, %v879_v33  ;;  %v5865_v42 = vpop.f32.mrb[40].mxu0  ;;  %v965_v15 = vmul.f32 0.5, %v879_v33 }
 0x13c   : > { %v1103_v43 = vadd.f32 1.0, %v6561_v38  ;;  %6570 = verf.f32 %v1014_v37  ;;  %v894_v44 = vadd.f32 %v5865_v42, %v7143_v40  ;;  %v888_v45 = vpop.f32.mrb[41].mxu0  ;;  %5922 = vmatprep.mubr.msk.f32.mxu1 %vm1175_vm4, %v1149_v35 }
 0x13d   : > { %v1152_v46 = vmul.f32 %v1104_v39, %v960_v32  ;;  %6572 = verf.f32 %v1013_v41  ;;  %v889_v48 = vadd.f32 %v7143_v40, %v888_v45  ;;  %5923 = vmatmul.mubr.msk.f32.gmra.mrb[30].mxu1 %vm1175_vm4, %v1150_v31 }
 0x13e   : > { %v6563_v49 = vpop.eup %6562  ;;  %v1151_v50 = vmul.f32 %v1103_v43, %v959_v36  ;;  %v1016_v52 = vmul.f32 0.70710677, %v894_v44  ;;  %v968_v25 = vmul.f32 0.5, %v894_v44 }
 0x13f   : > { %v6565_v53 = vpop.eup %6564  ;;  %v1106_v54 = vadd.f32 1.0, %v6563_v49  ;;  %v1015_v55 = vmul.f32 0.70710677, %v889_v48  ;;  %v5868_v56 = vpop.f32.mrb[42].mxu0  ;;  %v967_v29 = vmul.f32 0.5, %v889_v48 }
 0x140   : > { %v1105_v57 = vadd.f32 1.0, %v6565_v53  ;;  %6574 = verf.f32 %v1016_v52  ;;  %v904_v58 = vadd.f32 %v5868_v56, %v7143_v40  ;;  %v898_v59 = vpop.f32.mrb[43].mxu0  ;;  %5925 = vmatprep.mubr.msk.f32.mxu1 %vm1175_vm4, %v1151_v50 }
 0x141   : > { %v1154_v60 = vmul.f32 %v1106_v54, %v962_v47  ;;  %6576 = verf.f32 %v1015_v55  ;;  %v899_v62 = vadd.f32 %v7143_v40, %v898_v59  ;;  %5926 = vmatmul.mubr.msk.f32.gmra.mrb[32].mxu1 %vm1175_vm4, %v1152_v46 }
 0x142   : > { %v6567_v63 = vpop.eup %6566  ;;  %v1153_v0 = vmul.f32 %v1105_v57, %v961_v51  ;;  %v1018_v2 = vmul.f32 0.70710677, %v904_v58  ;;  %v970_v36 = vmul.f32 0.5, %v904_v58 }
 0x143   : > { %v6569_v3 = vpop.eup %6568  ;;  %v1108_v4 = vadd.f32 1.0, %v6567_v63  ;;  %v1017_v5 = vmul.f32 0.70710677, %v899_v62  ;;  %v5871_v6 = vpop.f32.mrb[44].mxu0  ;;  %v969_v38 = vmul.f32 0.5, %v899_v62 }
 0x144   : > { %v1107_v7 = vadd.f32 1.0, %v6569_v3  ;;  %6578 = verf.f32 %v1018_v2  ;;  %v914_v8 = vadd.f32 %v5871_v6, %v7143_v40  ;;  %v908_v9 = vpop.f32.mrb[45].mxu0  ;;  %5928 = vmatprep.mubr.msk.f32.mxu1 %vm1175_vm4, %v1153_v0  ;;  %v6801_v3 = vmov 0.0  }
 0x145   : > { %v1156_v10 = vmul.f32 %v1108_v4, %v964_v61  ;;  %6580 = verf.f32 %v1017_v5  ;;  %v909_v12 = vadd.f32 %v7143_v40, %v908_v9  ;;  %5929 = vmatmul.mubr.msk.f32.gmra.mrb[34].mxu1 %vm1175_vm4, %v1154_v60  ;;  %v7241_v61 = vpop.permute.xlu1 %1925  ;;  %2212 = vst.msk [vmem:[#allocation2 + $0x1a0] sm:$0xff] %vm2201_vm5, %v6801_v3  ;;  %2205 = vst.msk [vmem:[#allocation2 + $0x18] sm:$0xff] %vm2201_vm5, %v6801_v3  ;;  %v7263_v5 = vpop.permute.xlu0 %1915 }
 0x146   : > { %v6571_v13 = vpop.eup %6570  ;;  %v1155_v14 = vmul.f32 %v1107_v7, %v963_v1  ;;  %v1020_v16 = vmul.f32 0.70710677, %v914_v8  ;;  %v972_v44 = vmul.f32 0.5, %v914_v8  ;;  %2206 = vst.msk [vmem:[#allocation2 + $0x20] sm:$0xff] %vm2201_vm5, %v6801_v3  ;;  %2207 = vst.msk [vmem:[#allocation2 + $0x28] sm:$0xff] %vm2201_vm5, %v6801_v3 }
 0x147   : > { %v6573_v17 = vpop.eup %6572  ;;  %v1110_v18 = vadd.f32 1.0, %v6571_v13  ;;  %v1019_v19 = vmul.f32 0.70710677, %v909_v12  ;;  %v5874_v20 = vpop.f32.mrb[46].mxu0  ;;  %v971_v47 = vmul.f32 0.5, %v909_v12  ;;  %2208 = vst.msk [vmem:[#allocation2 + $0x30] sm:$0xff] %vm2201_vm5, %v6801_v3 }
 0x148   : > { %v1109_v21 = vadd.f32 1.0, %v6573_v17  ;;  %6582 = verf.f32 %v1020_v16  ;;  %v924_v22 = vadd.f32 %v5874_v20, %v7143_v40  ;;  %v918_v23 = vpop.f32.mrb[47].mxu0  ;;  %5931 = vmatprep.mubr.msk.f32.mxu1 %vm1175_vm4, %v1155_v14  ;;  %2209 = vst.msk [vmem:[#allocation2 + $0x188] sm:$0xff] %vm2201_vm5, %v6801_v3  ;;  %2210 = vst.msk [vmem:[#allocation2 + $0x190] sm:$0xff] %vm2201_vm5, %v6801_v3 }
 0x149   : > { %v1158_v24 = vmul.f32 %v1110_v18, %v966_v11  ;;  %6584 = verf.f32 %v1019_v19  ;;  %v919_v26 = vadd.f32 %v7143_v40, %v918_v23  ;;  %5932 = vmatmul.mubr.msk.f32.gmra.mrb[36].mxu1 %vm1175_vm4, %v1156_v10  ;;  %v7243_v62 = vpop.permute.xlu1 %1930  ;;  %2211 = vst.msk [vmem:[#allocation2 + $0x198] sm:$0xff] %vm2201_vm5, %v6801_v3  ;;  %v7267_v7 = vpop.permute.xlu0 %1920  ;;  %v7278_v11 = vld [vmem:[%s8954_s6] ss:$0 sm:$0xff]  ;;  %v2844_v3 = vld [vmem:[%s8955_s7 + $0x8] sm:$0xff] }
 0x14a   : > { %v6575_v27 = vpop.eup %6574  ;;  %v1157_v28 = vmul.f32 %v1109_v21, %v965_v15  ;;  %v1022_v30 = vmul.f32 0.70710677, %v924_v22  ;;  %v974_v52 = vmul.f32 0.5, %v924_v22 }
 0x14b   : > { %v6577_v31 = vpop.eup %6576  ;;  %v1112_v32 = vadd.f32 1.0, %v6575_v27  ;;  %v1021_v33 = vmul.f32 0.70710677, %v919_v26  ;;  %v973_v55 = vmul.f32 0.5, %v919_v26 }
 0x14c   : > { %v1111_v34 = vadd.f32 1.0, %v6577_v31  ;;  %6586 = verf.f32 %v1022_v30  ;;  %5934 = vmatprep.mubr.msk.f32.mxu1 %vm1175_vm4, %v1157_v28 }
 0x14d   : > { %v1160_v35 = vmul.f32 %v1112_v32, %v968_v25  ;;  %6588 = verf.f32 %v1021_v33  ;;  %5935 = vmatmul.mubr.msk.f32.gmra.mrb[38].mxu1 %vm1175_vm4, %v1158_v24  ;;  %v7245_v63 = vpop.permute.xlu1 %1940  ;;  %v7271_v9 = vpop.permute.xlu0 %1935 }
 0x14e   : > { %v6579_v37 = vpop.eup %6578  ;;  %v1159_v40 = vmul.f32 %v1111_v34, %v967_v29 }
 0x14f   : > { %v6581_v39 = vpop.eup %6580  ;;  %v1114_v41 = vadd.f32 1.0, %v6579_v37 }
 0x150   : > { %v1113_v42 = vadd.f32 1.0, %v6581_v39  ;;  %5937 = vmatprep.mubr.msk.f32.mxu1 %vm1175_vm4, %v1159_v40 }
 0x151   : > { %v1162_v43 = vmul.f32 %v1114_v41, %v970_v36  ;;  %5938 = vmatmul.mubr.msk.f32.gmra.mrb[40].mxu1 %vm1175_vm4, %v1160_v35  ;;  %v7247_v0 = vpop.permute.xlu1 %1950  ;;  %v7281_v15 = vpop.permute.xlu0 %1945 }
 0x152   : > { %v6583_v45 = vpop.eup %6582  ;;  %v1161_v46 = vmul.f32 %v1113_v42, %v969_v38 }
 0x153   : > { %v6585_v48 = vpop.eup %6584  ;;  %v1116_v49 = vadd.f32 1.0, %v6583_v45 }
 0x154   : > { %v1115_v50 = vadd.f32 1.0, %v6585_v48  ;;  %5940 = vmatprep.mubr.msk.f32.mxu1 %vm1175_vm4, %v1161_v46 }
 0x155   : > { %v1164_v51 = vmul.f32 %v1116_v49, %v972_v44  ;;  %5941 = vmatmul.mubr.msk.f32.gmra.mrb[42].mxu1 %vm1175_vm4, %v1162_v43  ;;  %v7249_v1 = vpop.permute.xlu1 %1960  ;;  %v7288_v25 = vpop.permute.xlu0 %1955 }
 0x156   : > { %v6587_v53 = vpop.eup %6586  ;;  %v1163_v54 = vmul.f32 %v1115_v50, %v971_v47 }
 0x157   : > { %v6589_v56 = vpop.eup %6588  ;;  %v1118_v57 = vadd.f32 1.0, %v6587_v53  ;;  %v5257_v53 = vld [vmem:[%s8955_s7 + $0x30] sm:$0xff] }
 0x158   : > { %v1117_v58 = vadd.f32 1.0, %v6589_v56  ;;  %5943 = vmatprep.mubr.msk.f32.mxu1 %vm1175_vm4, %v1163_v54  ;;  %v5258_v54 = vld [vmem:[%s8955_s7 + $0x38] sm:$0xff] }
 0x159   : > { %v1166_v59 = vmul.f32 %v1118_v57, %v974_v52  ;;  %5944 = vmatmul.mubr.msk.f32.gmra.mrb[44].mxu1 %vm1175_vm4, %v1164_v51  ;;  %v7251_v2 = vpop.permute.xlu1 %1970  ;;  %v7303_v37 = vpop.permute.xlu0 %1965 }
 0x15a   : > { %v1165_v60 = vmul.f32 %v1117_v58, %v973_v55 }
 0x15c   : > { %5946 = vmatprep.mubr.msk.f32.mxu1 %vm1175_vm4, %v1165_v60  ;;  %v2843_v60 = vld [vmem:[%s8955_s7] sm:$0xff] }
 0x15d   : > { %5947 = vmatmul.mubr.msk.f32.gmra.mrb[46].mxu1 %vm1175_vm4, %v1166_v59  ;;  %v7261_v4 = vpop.permute.xlu1 %1980  ;;  %v6249_v59 = vpack.c.bf16 %v5258_v54, %v5257_v53 }
 0x15f   : > { %6250 = vmatprep.subr.bf16.mxu0 %v6249_v59 }
 0x160   : > { %6252 = vmatpush3.bf16.msra.mxu0 %v6249_v59 }
 0x161   : > { %v7265_v6 = vpop.permute.xlu1 %1990 }
 0x165   : > { %v7269_v8 = vpop.permute.xlu1 %2000 }
 0x169   : > { %v7273_v10 = vpop.permute.xlu1 %2010 }
 0x16d   : > { %v7284_v17 = vpop.permute.xlu1 %2020 }
 0x171   : > { %v7290_v28 = vpop.permute.xlu1 %2030 }
 0x175   : > { %v7308_v39 = vpop.permute.xlu1 %2040 }
 0x1d4   : > { %v5879_v12 = vpop.f32.mrb[0].mxu1 }
 0x1d5   : > { %v1392_v13 = vadd.f32 %v5879_v12, %v7278_v11  ;;  %v1386_v14 = vpop.f32.mrb[1].mxu1 }
 0x1d6   : > { %v1387_v16 = vadd.f32 %v7278_v11, %v1386_v14 }
 0x1d7   : > { %v1674_v18 = vmul.f32 0.70710677, %v1392_v13  ;;  %v1626_v43 = vmul.f32 0.5, %v1392_v13  ;;  %v7331_v13 = vpop.permute.xlu0 %1975 }
 0x1d8   : > { %v1673_v19 = vmul.f32 0.70710677, %v1387_v16  ;;  %v5882_v20 = vpop.f32.mrb[2].mxu1  ;;  %v1625_v47 = vmul.f32 0.5, %v1387_v16 }
 0x1d9   : > { %6590 = verf.f32 %v1674_v18  ;;  %v1402_v21 = vadd.f32 %v5882_v20, %v7278_v11  ;;  %v1396_v22 = vpop.f32.mrb[3].mxu1 }
 0x1da   : > { %6592 = verf.f32 %v1673_v19  ;;  %v1397_v23 = vadd.f32 %v7278_v11, %v1396_v22 }
 0x1db   : > { %v1676_v24 = vmul.f32 0.70710677, %v1402_v21  ;;  %v1628_v57 = vmul.f32 0.5, %v1402_v21  ;;  %v7337_v21 = vpop.permute.xlu1 %2050 }
 0x1dc   : > { %v1675_v26 = vmul.f32 0.70710677, %v1397_v23  ;;  %v5885_v27 = vpop.f32.mrb[4].mxu1  ;;  %v1627_v16 = vmul.f32 0.5, %v1397_v23 }
 0x1dd   : > { %6594 = verf.f32 %v1676_v24  ;;  %v7293_v29 = vadd.f32 %v5885_v27, %v7278_v11  ;;  %v1406_v30 = vpop.f32.mrb[5].mxu1 }
 0x1de   : > { %6596 = verf.f32 %v1675_v26  ;;  %v7296_v31 = vadd.f32 %v7278_v11, %v1406_v30 }
 0x1df   : > { %v1678_v32 = vmul.f32 0.70710677, %v7293_v29  ;;  %v7390_v59 = vpop.permute.xlu1 %2060 }
 0x1e0   : > { %v1677_v33 = vmul.f32 0.70710677, %v7296_v31  ;;  %v5888_v34 = vpop.f32.mrb[6].mxu1 }
 0x1e1   : > { %6598 = verf.f32 %v1678_v32  ;;  %v7301_v35 = vadd.f32 %v5888_v34, %v7278_v11  ;;  %v1416_v36 = vpop.f32.mrb[7].mxu1  ;;  %v5260_v32 = vld [vmem:[%s8955_s7 + $0x48] sm:$0xff] }
 0x1e2   : > { %6600 = verf.f32 %v1677_v33  ;;  %v7306_v40 = vadd.f32 %v7278_v11, %v1416_v36  ;;  %v1630_v36 = vmul.f32 0.5, %v7293_v29  ;;  %v1629_v29 = vmul.f32 0.5, %v7296_v31 }
 0x1e3   : > { %v6591_v38 = vpop.eup %6590  ;;  %v1680_v41 = vmul.f32 0.70710677, %v7301_v35 }
 0x1e4   : > { %v6593_v42 = vpop.eup %6592  ;;  %v1770_v44 = vadd.f32 1.0, %v6591_v38  ;;  %v1679_v45 = vmul.f32 0.70710677, %v7306_v40  ;;  %v5891_v46 = vpop.f32.mrb[8].mxu1 }
 0x1e5   : > { %v1769_v48 = vadd.f32 1.0, %v6593_v42  ;;  %6602 = verf.f32 %v1680_v41  ;;  %v7313_v49 = vadd.f32 %v5891_v46, %v7278_v11  ;;  %v1426_v50 = vpop.f32.mrb[9].mxu1  ;;  %v2845_v42 = vld [vmem:[%s8955_s7 + $0x10] sm:$0xff] }
 0x1e6   : > { %v1818_v51 = vmul.f32 %v1770_v44, %v1626_v43  ;;  %6604 = verf.f32 %v1679_v45  ;;  %v7316_v52 = vadd.f32 %v7278_v11, %v1426_v50  ;;  %v2846_v43 = vld [vmem:[%s8955_s7 + $0x18] sm:$0xff] }
 0x1e7   : > { %v6595_v55 = vpop.eup %6594  ;;  %v1817_v56 = vmul.f32 %v1769_v48, %v1625_v47  ;;  %v1682_v58 = vmul.f32 0.70710677, %v7313_v49 }
 0x1e8   : > { %v6597_v12 = vpop.eup %6596  ;;  %v1772_v14 = vadd.f32 1.0, %v6595_v55  ;;  %v1681_v18 = vmul.f32 0.70710677, %v7316_v52  ;;  %v5894_v19 = vpop.f32.mrb[10].mxu1  ;;  %v7335_v20 = vmul.f32 %v7267_v7, %v1818_v51  ;;  %v6261_v7 = vpack.c.bf16 %v2844_v3, %v2843_v60 }
 0x1e9   : > { %v1771_v22 = vadd.f32 1.0, %v6597_v12  ;;  %6606 = verf.f32 %v1682_v58  ;;  %v7340_v24 = vadd.f32 %v5894_v19, %v7278_v11  ;;  %v1436_v26 = vpop.f32.mrb[11].mxu1  ;;  %v7343_v27 = vmul.f32 %v7263_v5, %v1817_v56  ;;  %v5259_v5 = vld [vmem:[%s8955_s7 + $0x40] sm:$0xff]  ;;  %v7377_v55 = vpop.permute.xlu0 %1985 }
 0x1ea   : > { %8965 = vst [vmem:[#allocation3_spill] sm:$0xff] %v7335_v20  ;;  %v1820_v30 = vmul.f32 %v1772_v14, %v1628_v57  ;;  %6608 = verf.f32 %v1681_v18  ;;  %v7346_v23 = vadd.f32 %v7278_v11, %v1436_v26  ;;  %2315 = vrot.lane.b32.xlu0 %v7335_v20, %s6802_s15  ;;  %2218 = vst.msk [vmem:[#allocation2 + $0x40] sm:$0xff] %vm2216_vm6, %v7335_v20  ;;  %6262 = vmatprep.subr.bf16.mxu1 %v6261_v7  ;;  %v5262_v57 = vld [vmem:[%s8955_s7 + $0x58] sm:$0xff]  ;;  %v2848_v18 = vld [vmem:[%s8955_s7 + $0x28] sm:$0xff] }
 0x1eb   : > { %8966 = vst [vmem:[#allocation4_spill] sm:$0xff] %v7343_v27  ;;  %v6599_v33 = vpop.eup %6598  ;;  %v1819_v34 = vmul.f32 %v1771_v22, %v1627_v16  ;;  %v1684_v38 = vmul.f32 0.70710677, %v7340_v24  ;;  %2313 = vrot.lane.b32.xlu1 %v7343_v27, %s6802_s15  ;;  %2217 = vst.msk [vmem:[#allocation2 + $0x38] sm:$0xff] %vm2216_vm6, %v7343_v27  ;;  %v6253_v41 = vpack.c.bf16 %v5260_v32, %v5259_v5  ;;  %6264 = vmatpush3.bf16.msra.mxu1 %v6261_v7  ;;  %v2847_v16 = vld [vmem:[%s8955_s7 + $0x20] sm:$0xff] }
 0x1ec   : > { %v6601_v44 = vpop.eup %6600  ;;  %v1774_v45 = vadd.f32 1.0, %v6599_v33  ;;  %v1683_v46 = vmul.f32 0.70710677, %v7346_v23  ;;  %v5897_v47 = vpop.f32.mrb[12].mxu1  ;;  %v2156_v48 = vmul.f32 %v7243_v62, %v1820_v30  ;;  %v6265_v62 = vpack.c.bf16 %v2846_v43, %v2845_v42 }
 0x1ed   : > { %v1773_v50 = vadd.f32 1.0, %v6601_v44  ;;  %6610 = verf.f32 %v1684_v38  ;;  %v7374_v51 = vadd.f32 %v5897_v47, %v7278_v11  ;;  %v1446_v53 = vpop.f32.mrb[13].mxu1  ;;  %v2155_v54 = vmul.f32 %v7241_v61, %v1819_v34  ;;  %6254 = vmatprep.subr.bf16.mxu0 %v6253_v41  ;;  %v5261_v61 = vld [vmem:[%s8955_s7 + $0x50] sm:$0xff]  ;;  %v7421_v44 = vpop.permute.xlu0 %1995 }
 0x1ee   : > { %v1822_v56 = vmul.f32 %v1774_v45, %v1630_v36  ;;  %6612 = verf.f32 %v1683_v46  ;;  %v7380_v31 = vadd.f32 %v7278_v11, %v1446_v53  ;;  %2512 = vrot.lane.b32.xlu0 %v2156_v48, %s6803_s26  ;;  %2220 = vst.msk [vmem:[#allocation2 + $0x50] sm:$0xff] %vm2216_vm6, %v2156_v48  ;;  %6256 = vmatpush3.bf16.msra.mxu0 %v6253_v41  ;;  %v1632_v3 = vmul.f32 0.5, %v7301_v35 }
 0x1ef   : > { %v6603_v58 = vpop.eup %6602  ;;  %v1821_v60 = vmul.f32 %v1773_v50, %v1629_v29  ;;  %v1686_v12 = vmul.f32 0.70710677, %v7374_v51  ;;  %2319 = vrot.lane.b32.xlu1 %v2156_v48, %s6802_s15  ;;  %2219 = vst.msk [vmem:[#allocation2 + $0x48] sm:$0xff] %vm2216_vm6, %v2155_v54  ;;  %v6257_v14 = vpack.c.bf16 %v5262_v57, %v5261_v61  ;;  %v1631_v26 = vmul.f32 0.5, %v7306_v40  ;;  %6266 = vmatprep.subr.bf16.mxu1 %v6265_v62 }
 0x1f0   : > { %v6605_v19 = vpop.eup %6604  ;;  %v1776_v22 = vadd.f32 1.0, %v6603_v58  ;;  %v1685_v35 = vmul.f32 0.70710677, %v7380_v31  ;;  %v5900_v30 = vpop.f32.mrb[14].mxu1  ;;  %v2158_v7 = vmul.f32 %v7245_v63, %v1822_v56  ;;  %6268 = vmatpush3.bf16.msra.mxu1 %v6265_v62  ;;  %v6269_v63 = vpack.c.bf16 %v2848_v18, %v2847_v16 }
 0x1f1   : > { %v1775_v5 = vadd.f32 1.0, %v6605_v19  ;;  %6614 = verf.f32 %v1686_v12  ;;  %v7406_v32 = vadd.f32 %v5900_v30, %v7278_v11  ;;  %v1456_v33 = vpop.f32.mrb[15].mxu1  ;;  %v7409_v34 = vmul.f32 %v7271_v9, %v1821_v60  ;;  %6258 = vmatprep.subr.bf16.mxu0 %v6257_v14 }
 0x1f2   : > { %v1824_v36 = vmul.f32 %v1776_v22, %v1632_v3  ;;  %6616 = verf.f32 %v1685_v35  ;;  %v7412_v40 = vadd.f32 %v7278_v11, %v1456_v33  ;;  %2317 = vrot.lane.b32.xlu0 %v2155_v54, %s6802_s15  ;;  %2222 = vst.msk [vmem:[#allocation2 + $0x60] sm:$0xff] %vm2216_vm6, %v2158_v7  ;;  %6260 = vmatpush3.bf16.msra.mxu0 %v6257_v14  ;;  %v1634_v42 = vmul.f32 0.5, %v7313_v49  ;;  %v7428_v49 = vpop.permute.xlu1 %2070  ;;  %v7458_v22 = vpop.permute.xlu0 %2005 }
 0x1f3   : > { %v6607_v38 = vpop.eup %6606  ;;  %v1823_v41 = vmul.f32 %v1775_v5, %v1631_v26  ;;  %v1688_v9 = vmul.f32 0.70710677, %v7406_v32  ;;  %2510 = vrot.lane.b32.xlu1 %v2155_v54, %s6803_s26  ;;  %2221 = vst.msk [vmem:[#allocation2 + $0x58] sm:$0xff] %vm2216_vm6, %v7409_v34  ;;  %v1633_v29 = vmul.f32 0.5, %v7316_v52  ;;  %6270 = vmatprep.subr.bf16.mxu1 %v6269_v63  ;;  %v1636_v62 = vmul.f32 0.5, %v7340_v24 }
 0x1f4   : > { %v6609_v43 = vpop.eup %6608  ;;  %v1778_v45 = vadd.f32 1.0, %v6607_v38  ;;  %v1687_v46 = vmul.f32 0.70710677, %v7412_v40  ;;  %v5903_v47 = vpop.f32.mrb[16].mxu1  ;;  %v7426_v48 = vmul.f32 %v7247_v0, %v1824_v36  ;;  %6272 = vmatpush3.bf16.msra.mxu1 %v6269_v63  ;;  %v1635_v58 = vmul.f32 0.5, %v7346_v23 }
 0x1f5   : > { %v1777_v50 = vadd.f32 1.0, %v6609_v43  ;;  %6618 = verf.f32 %v1688_v9  ;;  %v7431_v53 = vadd.f32 %v5903_v47, %v7278_v11  ;;  %v1466_v54 = vpop.f32.mrb[17].mxu1  ;;  %v7434_v56 = vmul.f32 %v7281_v15, %v1823_v41 }
 0x1f6   : > { %v1826_v52 = vmul.f32 %v1778_v45, %v1634_v42  ;;  %6620 = verf.f32 %v1687_v46  ;;  %v7438_v0 = vadd.f32 %v7278_v11, %v1466_v54  ;;  %2516 = vrot.lane.b32.xlu0 %v2158_v7, %s6803_s26  ;;  %2224 = vst.msk [vmem:[#allocation2 + $0x70] sm:$0xff] %vm2216_vm6, %v7426_v48  ;;  %v1638_v35 = vmul.f32 0.5, %v7374_v51  ;;  %v7500_v54 = vpop.permute.xlu0 %2015 }
 0x1f7   : > { %v6611_v61 = vpop.eup %6610  ;;  %v1825_v57 = vmul.f32 %v1777_v50, %v1633_v29  ;;  %v1690_v15 = vmul.f32 0.70710677, %v7431_v53  ;;  %2323 = vrot.lane.b32.xlu1 %v2158_v7, %s6802_s15  ;;  %2223 = vst.msk [vmem:[#allocation2 + $0x68] sm:$0xff] %vm2216_vm6, %v7434_v56  ;;  %v7468_v7 = vpop.permute.xlu1 %2080  ;;  %v1637_v5 = vmul.f32 0.5, %v7380_v31  ;;  %v1640_v29 = vmul.f32 0.5, %v7406_v32 }
 0x1f8   : > { %v6613_v24 = vpop.eup %6612  ;;  %v1780_v60 = vadd.f32 1.0, %v6611_v61  ;;  %v1689_v3 = vmul.f32 0.70710677, %v7438_v0  ;;  %v5906_v12 = vpop.f32.mrb[18].mxu1  ;;  %v7450_v14 = vmul.f32 %v7249_v1, %v1826_v52  ;;  %v1639_v50 = vmul.f32 0.5, %v7412_v40 }
 0x1f9   : > { %v1779_v16 = vadd.f32 1.0, %v6613_v24  ;;  %6622 = verf.f32 %v1690_v15  ;;  %v7453_v18 = vadd.f32 %v5906_v12, %v7278_v11  ;;  %v1476_v23 = vpop.f32.mrb[19].mxu1  ;;  %v7456_v19 = vmul.f32 %v7288_v25, %v1825_v57 }
 0x1fa   : > { %v1828_v26 = vmul.f32 %v1780_v60, %v1636_v62  ;;  %6624 = verf.f32 %v1689_v3  ;;  %v7462_v30 = vadd.f32 %v7278_v11, %v1476_v23  ;;  %2514 = vrot.lane.b32.xlu0 %v7409_v34, %s6803_s26  ;;  %2226 = vst.msk [vmem:[#allocation2 + $0x80] sm:$0xff] %vm2216_vm6, %v7450_v14  ;;  %v1642_v3 = vmul.f32 0.5, %v7431_v53 }
 0x1fb   : > { %v6615_v1 = vpop.eup %6614  ;;  %v1827_v25 = vmul.f32 %v1779_v16, %v1635_v58  ;;  %v1692_v33 = vmul.f32 0.70710677, %v7453_v18  ;;  %2327 = vrot.lane.b32.xlu1 %v7426_v48, %s6802_s15  ;;  %2225 = vst.msk [vmem:[#allocation2 + $0x78] sm:$0xff] %vm2216_vm6, %v7456_v19  ;;  %v7506_v57 = vpop.permute.xlu1 %2090  ;;  %v1641_v23 = vmul.f32 0.5, %v7438_v0 }
 0x1fc   : > { %v6617_v51 = vpop.eup %6616  ;;  %v1782_v36 = vadd.f32 1.0, %v6615_v1  ;;  %v1691_v63 = vmul.f32 0.70710677, %v7462_v30  ;;  %v5909_v38 = vpop.f32.mrb[20].mxu1  ;;  %v7478_v41 = vmul.f32 %v7251_v2, %v1828_v26 }
 0x1fd   : > { %v1781_v42 = vadd.f32 1.0, %v6617_v51  ;;  %6626 = verf.f32 %v1692_v33  ;;  %v7481_v31 = vadd.f32 %v5909_v38, %v7278_v11  ;;  %v1486_v9 = vpop.f32.mrb[21].mxu1  ;;  %v7484_v43 = vmul.f32 %v7303_v37, %v1827_v25  ;;  %v7538_v51 = vpop.permute.xlu0 %2025 }
 0x1fe   : > { %v1830_v45 = vmul.f32 %v1782_v36, %v1638_v35  ;;  %6628 = verf.f32 %v1691_v63  ;;  %v7488_v46 = vadd.f32 %v7278_v11, %v1486_v9  ;;  %2321 = vrot.lane.b32.xlu0 %v7409_v34, %s6802_s15  ;;  %2228 = vst.msk [vmem:[#allocation2 + $0x90] sm:$0xff] %vm2216_vm6, %v7478_v41  ;;  %v1644_v63 = vmul.f32 0.5, %v7453_v18 }
 0x1ff   : > { %v6619_v2 = vpop.eup %6618  ;;  %v1829_v47 = vmul.f32 %v1781_v42, %v1637_v5  ;;  %v1694_v37 = vmul.f32 0.70710677, %v7481_v31  ;;  %2331 = vrot.lane.b32.xlu1 %v7450_v14, %s6802_s15  ;;  %2227 = vst.msk [vmem:[#allocation2 + $0x88] sm:$0xff] %vm2216_vm6, %v7484_v43  ;;  %v7548_v42 = vpop.permute.xlu1 %2100  ;;  %v1643_v9 = vmul.f32 0.5, %v7462_v30 }
 0x200   : > { %v6621_v32 = vpop.eup %6620  ;;  %v1784_v52 = vadd.f32 1.0, %v6619_v2  ;;  %v1693_v34 = vmul.f32 0.70710677, %v7488_v46  ;;  %v5912_v62 = vpop.f32.mrb[22].mxu1  ;;  %v7504_v61 = vmul.f32 %v7261_v4, %v1830_v45 }
 0x201   : > { %v1783_v40 = vadd.f32 1.0, %v6621_v32  ;;  %6630 = verf.f32 %v1694_v37  ;;  %v7509_v58 = vadd.f32 %v5912_v62, %v7278_v11  ;;  %v1496_v15 = vpop.f32.mrb[23].mxu1  ;;  %v7512_v24 = vmul.f32 %v7331_v13, %v1829_v47 }
 0x202   : > { %v1832_v60 = vmul.f32 %v1784_v52, %v1640_v29  ;;  %6632 = verf.f32 %v1693_v34  ;;  %v7516_v12 = vadd.f32 %v7278_v11, %v1496_v15  ;;  %2520 = vrot.lane.b32.xlu0 %v7426_v48, %s6803_s26  ;;  %2230 = vst.msk [vmem:[#allocation2 + $0xa0] sm:$0xff] %vm2216_vm6, %v7504_v61  ;;  %v1646_v62 = vmul.f32 0.5, %v7481_v31 }
 0x203   : > { %v6623_v4 = vpop.eup %6622  ;;  %v1831_v16 = vmul.f32 %v1783_v40, %v1639_v50  ;;  %v1696_v13 = vmul.f32 0.70710677, %v7509_v58  ;;  %2335 = vrot.lane.b32.xlu1 %v7478_v41, %s6802_s15  ;;  %2229 = vst.msk [vmem:[#allocation2 + $0x98] sm:$0xff] %vm2216_vm6, %v7512_v24 }
 0x204   : > { %v6625_v53 = vpop.eup %6624  ;;  %v1786_v26 = vadd.f32 1.0, %v6623_v4  ;;  %v1695_v35 = vmul.f32 0.70710677, %v7516_v12  ;;  %v5915_v48 = vpop.f32.mrb[24].mxu1  ;;  %v7530_v1 = vmul.f32 %v7265_v6, %v1832_v60  ;;  %v1645_v60 = vmul.f32 0.5, %v7488_v46 }
 0x205   : > { %v1785_v25 = vadd.f32 1.0, %v6625_v53  ;;  %6634 = verf.f32 %v1696_v13  ;;  %v7533_v0 = vadd.f32 %v5915_v48, %v7278_v11  ;;  %v1506_v5 = vpop.f32.mrb[25].mxu1  ;;  %v7536_v33 = vmul.f32 %v7377_v55, %v1831_v16  ;;  %v7586_v13 = vpop.permute.xlu1 %2105 }
 0x206   : > { %v1834_v36 = vmul.f32 %v1786_v26, %v1642_v3  ;;  %6636 = verf.f32 %v1695_v35  ;;  %v7542_v38 = vadd.f32 %v7278_v11, %v1506_v5  ;;  %2518 = vrot.lane.b32.xlu0 %v7434_v56, %s6803_s26  ;;  %2232 = vst.msk [vmem:[#allocation2 + $0xb0] sm:$0xff] %vm2216_vm6, %v7530_v1  ;;  %v7580_v3 = vpop.permute.xlu0 %2035 }
 0x207   : > { %v6627_v6 = vpop.eup %6626  ;;  %v1833_v55 = vmul.f32 %v1785_v25, %v1641_v23  ;;  %v1698_v45 = vmul.f32 0.70710677, %v7533_v0  ;;  %2337 = vrot.lane.b32.xlu1 %v7512_v24, %s6802_s15  ;;  %2231 = vst.msk [vmem:[#allocation2 + $0xa8] sm:$0xff] %vm2216_vm6, %v7536_v33  ;;  %v1648_v25 = vmul.f32 0.5, %v7509_v58 }
 0x208   : > { %v6629_v18 = vpop.eup %6628  ;;  %v1788_v29 = vadd.f32 1.0, %v6627_v6  ;;  %v1697_v2 = vmul.f32 0.70710677, %v7542_v38  ;;  %v5918_v47 = vpop.f32.mrb[26].mxu1  ;;  %v7558_v50 = vmul.f32 %v7269_v8, %v1834_v36 }
 0x209   : > { %v1787_v37 = vadd.f32 1.0, %v6629_v18  ;;  %6638 = verf.f32 %v1698_v45  ;;  %v7561_v30 = vadd.f32 %v5918_v47, %v7278_v11  ;;  %v1516_v32 = vpop.f32.mrb[27].mxu1  ;;  %v7564_v52 = vmul.f32 %v7421_v44, %v1833_v55 }
 0x20a   : > { %v1836_v34 = vmul.f32 %v1788_v29, %v1644_v63  ;;  %6640 = verf.f32 %v1697_v2  ;;  %v7568_v40 = vadd.f32 %v7278_v11, %v1516_v32  ;;  %2325 = vrot.lane.b32.xlu0 %v7434_v56, %s6802_s15  ;;  %2234 = vst.msk [vmem:[#allocation2 + $0xc0] sm:$0xff] %vm2216_vm6, %v7558_v50  ;;  %v1647_v63 = vmul.f32 0.5, %v7516_v12  ;;  %v7618_v2 = vpop.permute.xlu0 %2045 }
 0x20b   : > { %v6631_v8 = vpop.eup %6630  ;;  %v1835_v15 = vmul.f32 %v1787_v37, %v1643_v9  ;;  %v1700_v44 = vmul.f32 0.70710677, %v7561_v30  ;;  %2536 = vrot.lane.b32.xlu1 %v7530_v1, %s6803_s26  ;;  %2233 = vst.msk [vmem:[#allocation2 + $0xb8] sm:$0xff] %vm2216_vm6, %v7564_v52  ;;  %v1650_v37 = vmul.f32 0.5, %v7533_v0 }
 0x20c   : > { %v6633_v31 = vpop.eup %6632  ;;  %v1790_v4 = vadd.f32 1.0, %v6631_v8  ;;  %v1699_v56 = vmul.f32 0.70710677, %v7568_v40  ;;  %v5921_v16 = vpop.f32.mrb[28].mxu1  ;;  %v7584_v23 = vmul.f32 %v7273_v10, %v1836_v34 }
 0x20d   : > { %v1789_v46 = vadd.f32 1.0, %v6633_v31  ;;  %6642 = verf.f32 %v1700_v44  ;;  %v7589_v53 = vadd.f32 %v5921_v16, %v7278_v11  ;;  %v1526_v26 = vpop.f32.mrb[29].mxu1  ;;  %v7592_v35 = vmul.f32 %v7458_v22, %v1835_v15  ;;  %v7628_v34 = vpop.permute.xlu1 %2110 }
 0x20e   : > { %v1838_v48 = vmul.f32 %v1790_v4, %v1646_v62  ;;  %6644 = verf.f32 %v1699_v56  ;;  %v7596_v5 = vadd.f32 %v7278_v11, %v1526_v26  ;;  %2524 = vrot.lane.b32.xlu0 %v7450_v14, %s6803_s26  ;;  %2236 = vst.msk [vmem:[#allocation2 + $0xd0] sm:$0xff] %vm2216_vm6, %v7584_v23  ;;  %v1649_v62 = vmul.f32 0.5, %v7542_v38 }
 0x20f   : > { %v6635_v10 = vpop.eup %6634  ;;  %v1837_v36 = vmul.f32 %v1789_v46, %v1645_v60  ;;  %v1702_v22 = vmul.f32 0.70710677, %v7589_v53  ;;  %2341 = vrot.lane.b32.xlu1 %v7536_v33, %s6802_s15  ;;  %2235 = vst.msk [vmem:[#allocation2 + $0xc8] sm:$0xff] %vm2216_vm6, %v7592_v35  ;;  %v1652_v26 = vmul.f32 0.5, %v7561_v30 }
 0x210   : > { %v6637_v58 = vpop.eup %6636  ;;  %v1792_v6 = vadd.f32 1.0, %v6635_v10  ;;  %v1701_v55 = vmul.f32 0.70710677, %v7596_v5  ;;  %v5924_v14 = vpop.f32.mrb[30].mxu1  ;;  %v7610_v9 = vmul.f32 %v7284_v17, %v1838_v48  ;;  %v1651_v10 = vmul.f32 0.5, %v7568_v40 }
 0x211   : > { %v1791_v45 = vadd.f32 1.0, %v6637_v58  ;;  %6646 = verf.f32 %v1702_v22  ;;  %v7613_v12 = vadd.f32 %v5924_v14, %v7278_v11  ;;  %v1536_v18 = vpop.f32.mrb[31].mxu1  ;;  %v7616_v29 = vmul.f32 %v7500_v54, %v1837_v36  ;;  %v2056_v36 = vpop.permute.xlu0 %2055 }
 0x212   : > { %v1840_v47 = vmul.f32 %v1792_v6, %v1648_v25  ;;  %6648 = verf.f32 %v1701_v55  ;;  %v7622_v32 = vadd.f32 %v7278_v11, %v1536_v18  ;;  %2522 = vrot.lane.b32.xlu0 %v7456_v19, %s6803_s26  ;;  %2238 = vst.msk [vmem:[#allocation2 + $0xe0] sm:$0xff] %vm2216_vm6, %v7610_v9  ;;  %v7664_v6 = vpop.permute.xlu1 %2115 }
 0x213   : > { %v6639_v17 = vpop.eup %6638  ;;  %v1839_v54 = vmul.f32 %v1791_v45, %v1647_v63  ;;  %v1704_v8 = vmul.f32 0.70710677, %v7613_v12  ;;  %2540 = vrot.lane.b32.xlu1 %v7558_v50, %s6803_s26  ;;  %2237 = vst.msk [vmem:[#allocation2 + $0xd8] sm:$0xff] %vm2216_vm6, %v7616_v29 }
 0x214   : > { %v6641_v0 = vpop.eup %6640  ;;  %v1794_v15 = vadd.f32 1.0, %v6639_v17  ;;  %v1703_v60 = vmul.f32 0.70710677, %v7622_v32  ;;  %v5927_v44 = vpop.f32.mrb[32].mxu1  ;;  %v7638_v31 = vmul.f32 %v7290_v28, %v1840_v47  ;;  %v1654_v47 = vmul.f32 0.5, %v7589_v53 }
 0x215   : > { %v1793_v4 = vadd.f32 1.0, %v6641_v0  ;;  %6650 = verf.f32 %v1704_v8  ;;  %v7641_v38 = vadd.f32 %v5927_v44, %v7278_v11  ;;  %v1546_v56 = vpop.f32.mrb[33].mxu1  ;;  %v7644_v16 = vmul.f32 %v7538_v51, %v1839_v54 }
 0x216   : > { %v1842_v46 = vmul.f32 %v1794_v15, %v1650_v37  ;;  %6652 = verf.f32 %v1703_v60  ;;  %v7648_v48 = vadd.f32 %v7278_v11, %v1546_v56  ;;  %2329 = vrot.lane.b32.xlu0 %v7456_v19, %s6802_s15  ;;  %2240 = vst.msk [vmem:[#allocation2 + $0xf0] sm:$0xff] %vm2216_vm6, %v7638_v31  ;;  %v1653_v54 = vmul.f32 0.5, %v7596_v5 }
 0x217   : > { %v6643_v28 = vpop.eup %6642  ;;  %v1841_v25 = vmul.f32 %v1793_v4, %v1649_v62  ;;  %v1706_v51 = vmul.f32 0.70710677, %v7641_v38  ;;  %2345 = vrot.lane.b32.xlu1 %v7564_v52, %s6802_s15  ;;  %2239 = vst.msk [vmem:[#allocation2 + $0xe8] sm:$0xff] %vm2216_vm6, %v7644_v16  ;;  %v2066_v4 = vpop.permute.xlu0 %2065 }
 0x218   : > { %v6645_v30 = vpop.eup %6644  ;;  %v1796_v63 = vadd.f32 1.0, %v6643_v28  ;;  %v1705_v19 = vmul.f32 0.70710677, %v7648_v48  ;;  %v5930_v22 = vpop.f32.mrb[34].mxu1  ;;  %v7662_v58 = vmul.f32 %v7308_v39, %v1842_v46  ;;  %v1656_v46 = vmul.f32 0.5, %v7613_v12 }
 0x219   : > { %v1795_v40 = vadd.f32 1.0, %v6645_v30  ;;  %6654 = verf.f32 %v1706_v51  ;;  %v7667_v55 = vadd.f32 %v5930_v22, %v7278_v11  ;;  %v1556_v14 = vpop.f32.mrb[35].mxu1  ;;  %v7670_v45 = vmul.f32 %v7580_v3, %v1841_v25 }
 0x21a   : > { %v1844_v18 = vmul.f32 %v1796_v63, %v1652_v26  ;;  %6656 = verf.f32 %v1705_v19  ;;  %v7674_v37 = vadd.f32 %v7278_v11, %v1556_v14  ;;  %2528 = vrot.lane.b32.xlu0 %v7478_v41, %s6803_s26  ;;  %2242 = vst.msk [vmem:[#allocation2 + $0x100] sm:$0xff] %vm2216_vm6, %v7662_v58  ;;  %v7704_v26 = vpop.permute.xlu1 %2120  ;;  %v1655_v25 = vmul.f32 0.5, %v7622_v32 }
 0x21b   : > { %v6647_v39 = vpop.eup %6646  ;;  %v1843_v17 = vmul.f32 %v1795_v40, %v1651_v10  ;;  %v1708_v3 = vmul.f32 0.70710677, %v7667_v55  ;;  %2544 = vrot.lane.b32.xlu1 %v7584_v23, %s6803_s26  ;;  %2241 = vst.msk [vmem:[#allocation2 + $0xf8] sm:$0xff] %vm2216_vm6, %v7670_v45 }
 0x21c   : > { %v6649_v53 = vpop.eup %6648  ;;  %v7687_v62 = vmul.f32 %v7337_v21, %v1844_v18  ;;  %v1798_v41 = vadd.f32 1.0, %v6647_v39  ;;  %v1707_v8 = vmul.f32 0.70710677, %v7674_v37  ;;  %v5933_v0 = vpop.f32.mrb[36].mxu1 }
 0x21d   : > { %v7691_v15 = vmul.f32 %v7618_v2, %v1843_v17  ;;  %v1797_v5 = vadd.f32 1.0, %v6649_v53  ;;  %6658 = verf.f32 %v1708_v3  ;;  %v7694_v60 = vadd.f32 %v5933_v0, %v7278_v11  ;;  %v1566_v44 = vpop.f32.mrb[37].mxu1  ;;  %v2076_v3 = vpop.permute.xlu0 %2075 }
 0x21e   : > { %v1846_v56 = vmul.f32 %v1798_v41, %v1654_v47  ;;  %6660 = verf.f32 %v1707_v8  ;;  %v7698_v21 = vadd.f32 %v7278_v11, %v1566_v44  ;;  %2526 = vrot.lane.b32.xlu0 %v7484_v43, %s6803_s26  ;;  %2244 = vst.msk [vmem:[#allocation2 + $0x110] sm:$0xff] %vm2216_vm6, %v7687_v62  ;;  %v1658_v47 = vmul.f32 0.5, %v7641_v38  ;;  %v7739_v0 = vpop.permute.xlu1 %2125 }
 0x21f   : > { %v6651_v2 = vpop.eup %6650  ;;  %v1845_v28 = vmul.f32 %v1797_v5, %v1653_v54  ;;  %v1710_v10 = vmul.f32 0.70710677, %v7694_v60  ;;  %2349 = vrot.lane.b32.xlu1 %v7592_v35, %s6802_s15  ;;  %2243 = vst.msk [vmem:[#allocation2 + $0x108] sm:$0xff] %vm2216_vm6, %v7691_v15  ;;  %v1657_v17 = vmul.f32 0.5, %v7648_v48 }
 0x220   : > { %v6653_v12 = vpop.eup %6652  ;;  %v7713_v51 = vmul.f32 %v7390_v59, %v1846_v56  ;;  %v1800_v30 = vadd.f32 1.0, %v6651_v2  ;;  %v1709_v63 = vmul.f32 0.70710677, %v7698_v21  ;;  %v5936_v19 = vpop.f32.mrb[38].mxu1  ;;  %v1660_v2 = vmul.f32 0.5, %v7667_v55 }
 0x221   : > { %v7716_v22 = vmul.f32 %v2056_v36, %v1845_v28  ;;  %v1799_v40 = vadd.f32 1.0, %v6653_v12  ;;  %6662 = verf.f32 %v1710_v10  ;;  %v7719_v32 = vadd.f32 %v5936_v19, %v7278_v11  ;;  %v1576_v14 = vpop.f32.mrb[39].mxu1 }
 0x222   : > { %v1848_v18 = vmul.f32 %v1800_v30, %v1656_v46  ;;  %6664 = verf.f32 %v1709_v63  ;;  %v7723_v39 = vadd.f32 %v7278_v11, %v1576_v14  ;;  %2333 = vrot.lane.b32.xlu0 %v7484_v43, %s6802_s15  ;;  %2246 = vst.msk [vmem:[#allocation2 + $0x120] sm:$0xff] %vm2216_vm6, %v7713_v51 }
 0x223   : > { %v6655_v59 = vpop.eup %6654  ;;  %v1847_v36 = vmul.f32 %v1799_v40, %v1655_v25  ;;  %v1712_v54 = vmul.f32 0.70710677, %v7719_v32  ;;  %2548 = vrot.lane.b32.xlu1 %v7610_v9, %s6803_s26  ;;  %2245 = vst.msk [vmem:[#allocation2 + $0x118] sm:$0xff] %vm2216_vm6, %v7716_v22  ;;  %v1659_v25 = vmul.f32 0.5, %v7674_v37 }
 0x224   : > { %v6657_v38 = vpop.eup %6656  ;;  %v7736_v53 = vmul.f32 %v7428_v49, %v1848_v18  ;;  %v1802_v43 = vadd.f32 1.0, %v6655_v59  ;;  %v1711_v41 = vmul.f32 0.70710677, %v7723_v39  ;;  %v5939_v8 = vpop.f32.mrb[40].mxu1 }
 0x225   : > { %v7741_v48 = vmul.f32 %v2066_v4, %v1847_v36  ;;  %v1801_v5 = vadd.f32 1.0, %v6657_v38  ;;  %6666 = verf.f32 %v1712_v54  ;;  %v7744_v44 = vadd.f32 %v5939_v8, %v7278_v11  ;;  %v1586_v56 = vpop.f32.mrb[41].mxu1  ;;  %v7777_v54 = vpop.permute.xlu1 %2130 }
 0x226   : > { %v1850_v46 = vmul.f32 %v1802_v43, %v1658_v47  ;;  %6668 = verf.f32 %v1711_v41  ;;  %v7748_v49 = vadd.f32 %v7278_v11, %v1586_v56  ;;  %2532 = vrot.lane.b32.xlu0 %v7504_v61, %s6803_s26  ;;  %2248 = vst.msk [vmem:[#allocation2 + $0x130] sm:$0xff] %vm2216_vm6, %v7736_v53  ;;  %v2086_v47 = vpop.permute.xlu0 %2085  ;;  %v1662_v36 = vmul.f32 0.5, %v7694_v60 }
 0x227   : > { %v6659_v4 = vpop.eup %6658  ;;  %v1849_v28 = vmul.f32 %v1801_v5, %v1657_v17  ;;  %v1714_v10 = vmul.f32 0.70710677, %v7744_v44  ;;  %2353 = vrot.lane.b32.xlu1 %v7616_v29, %s6802_s15  ;;  %2247 = vst.msk [vmem:[#allocation2 + $0x128] sm:$0xff] %vm2216_vm6, %v7741_v48 }
 0x228   : > { %v6661_v55 = vpop.eup %6660  ;;  %v7761_v12 = vmul.f32 %v7468_v7, %v1850_v46  ;;  %v1804_v30 = vadd.f32 1.0, %v6659_v4  ;;  %v1713_v63 = vmul.f32 0.70710677, %v7748_v49  ;;  %v5942_v19 = vpop.f32.mrb[42].mxu1 }
 0x229   : > { %v7764_v40 = vmul.f32 %v2076_v3, %v1849_v28  ;;  %v1803_v14 = vadd.f32 1.0, %v6661_v55  ;;  %6670 = verf.f32 %v1714_v10  ;;  %v7767_v37 = vadd.f32 %v5942_v19, %v7278_v11  ;;  %v1596_v18 = vpop.f32.mrb[43].mxu1 }
 0x22a   : > { %v1852_v59 = vmul.f32 %v1804_v30, %v1660_v2  ;;  %6672 = verf.f32 %v1713_v63  ;;  %v7771_v7 = vadd.f32 %v7278_v11, %v1596_v18  ;;  %2339 = vrot.lane.b32.xlu0 %v7504_v61, %s6802_s15  ;;  %2250 = vst.msk [vmem:[#allocation2 + $0x140] sm:$0xff] %vm2216_vm6, %v7761_v12  ;;  %v1661_v3 = vmul.f32 0.5, %v7698_v21  ;;  %v2096_v63 = vpop.permute.xlu0 %2095  ;;  %v7812_v18 = vpop.permute.xlu1 %2135 }
 0x22b   : > { %v6663_v17 = vpop.eup %6662  ;;  %v1851_v38 = vmul.f32 %v1803_v14, %v1659_v25  ;;  %v1716_v43 = vmul.f32 0.70710677, %v7767_v37  ;;  %2552 = vrot.lane.b32.xlu1 %v7638_v31, %s6803_s26  ;;  %2249 = vst.msk [vmem:[#allocation2 + $0x138] sm:$0xff] %vm2216_vm6, %v7764_v40  ;;  %v1664_v28 = vmul.f32 0.5, %v7719_v32  ;;  %v1663_v55 = vmul.f32 0.5, %v7723_v39 }
 0x22c   : > { %v6665_v60 = vpop.eup %6664  ;;  %v7786_v61 = vmul.f32 %v7506_v57, %v1852_v59  ;;  %v1806_v41 = vadd.f32 1.0, %v6663_v17  ;;  %v1715_v8 = vmul.f32 0.70710677, %v7771_v7  ;;  %v5945_v5 = vpop.f32.mrb[44].mxu1  ;;  %v6790_v59 = vld [vmem:[%s8954_s6] ss:$0 sm:$0xff] }
 0x22d   : > { %v7789_v56 = vmul.f32 %v2086_v47, %v1851_v38  ;;  %v1805_v46 = vadd.f32 1.0, %v6665_v60  ;;  %6674 = verf.f32 %v1716_v43  ;;  %v7792_v21 = vadd.f32 %v5945_v5, %v7278_v11  ;;  %v1606_v2 = vpop.f32.mrb[45].mxu1 }
 0x22e   : > { %v1854_v4 = vmul.f32 %v1806_v41, %v1662_v36  ;;  %6676 = verf.f32 %v1715_v8  ;;  %2252 = vst.msk [vmem:[#allocation2 + $0x150] sm:$0xff] %vm2216_vm6, %v7786_v61  ;;  %v7798_v57 = vadd.f32 %v7278_v11, %v1606_v2  ;;  %2530 = vrot.lane.b32.xlu0 %v7512_v24, %s6803_s26  ;;  %v1665_v41 = vmul.f32 0.5, %v7748_v49 }
 0x22f   : > { %v6667_v25 = vpop.eup %6666  ;;  %v1853_v10 = vmul.f32 %v1805_v46, %v1661_v3  ;;  %v1718_v30 = vmul.f32 0.70710677, %v7792_v21  ;;  %2251 = vst.msk [vmem:[#allocation2 + $0x148] sm:$0xff] %vm2216_vm6, %v7789_v56  ;;  %2357 = vrot.lane.b32.xlu1 %v7644_v16, %s6802_s15  ;;  %v1668_v49 = vmul.f32 0.5, %v7767_v37 }
 0x230   : > { %v6669_v32 = vpop.eup %6668  ;;  %v7809_v11 = vmul.f32 %v7548_v42, %v1854_v4  ;;  %v1808_v19 = vadd.f32 1.0, %v6667_v25  ;;  %v1717_v24 = vmul.f32 0.70710677, %v7798_v57  ;;  %v5948_v14 = vpop.f32.mrb[46].mxu1  ;;  %v1666_v42 = vmul.f32 0.5, %v7744_v44 }
 0x231   : > { %v7814_v39 = vmul.f32 %v2096_v63, %v1853_v10  ;;  %v1807_v47 = vadd.f32 1.0, %v6669_v32  ;;  %6678 = verf.f32 %v1718_v30  ;;  %v1622_v36 = vadd.f32 %v6790_v59, %v5948_v14  ;;  %v1616_v17 = vpop.f32.mrb[47].mxu1 }
 0x232   : > { %v1856_v38 = vmul.f32 %v1808_v19, %v1664_v28  ;;  %2254 = vst.msk [vmem:[#allocation2 + $0x160] sm:$0xff] %vm2216_vm6, %v7809_v11  ;;  %6680 = verf.f32 %v1717_v24  ;;  %v1617_v3 = vadd.f32 %v6790_v59, %v1616_v17  ;;  %2343 = vrot.lane.b32.xlu0 %v7530_v1, %s6802_s15  ;;  %v1670_v19 = vmul.f32 0.5, %v7792_v21 }
 0x233   : > { %v6671_v43 = vpop.eup %6670  ;;  %v1855_v60 = vmul.f32 %v1807_v47, %v1663_v55  ;;  %2253 = vst.msk [vmem:[#allocation2 + $0x158] sm:$0xff] %vm2216_vm6, %v7814_v39  ;;  %v1720_v8 = vmul.f32 0.70710677, %v1622_v36  ;;  %2556 = vrot.lane.b32.xlu1 %v7662_v58, %s6803_s26  ;;  %v1667_v55 = vmul.f32 0.5, %v7771_v7 }
 0x234   : > { %v6673_v44 = vpop.eup %6672  ;;  %v7830_v5 = vmul.f32 %v7628_v34, %v1856_v38  ;;  %v1810_v46 = vadd.f32 1.0, %v6671_v43  ;;  %v1719_v2 = vmul.f32 0.70710677, %v1617_v3  ;;  %v2141_v34 = vpop.permute.xlu1 %2140  ;;  %v1672_v38 = vmul.f32 0.5, %v1622_v36 }
 0x235   : > { %v7833_v4 = vmul.f32 %v7586_v13, %v1855_v60  ;;  %v1809_v1 = vadd.f32 1.0, %v6673_v44  ;;  %6682 = verf.f32 %v1720_v8 }
 0x236   : > { %v1858_v28 = vmul.f32 %v1810_v46, %v1666_v42  ;;  %2256 = vst.msk [vmem:[#allocation2 + $0x170] sm:$0xff] %vm2216_vm6, %v7830_v5  ;;  %6684 = verf.f32 %v1719_v2  ;;  %2534 = vrot.lane.b32.xlu0 %v7536_v33, %s6803_s26 }
 0x237   : > { %v6675_v25 = vpop.eup %6674  ;;  %v1857_v10 = vmul.f32 %v1809_v1, %v1665_v41  ;;  %2255 = vst.msk [vmem:[#allocation2 + $0x168] sm:$0xff] %vm2216_vm6, %v7833_v4  ;;  %2361 = vrot.lane.b32.xlu1 %v7670_v45, %s6802_s15 }
 0x238   : > { %v6677_v13 = vpop.eup %6676  ;;  %v7846_v37 = vmul.f32 %v7704_v26, %v1858_v28  ;;  %v1812_v30 = vadd.f32 1.0, %v6675_v25  ;;  %v1669_v26 = vmul.f32 0.5, %v7798_v57  ;;  %v2146_v47 = vpop.permute.xlu1 %2145 }
 0x239   : > { %v7849_v32 = vmul.f32 %v7664_v6, %v1857_v10  ;;  %v1811_v33 = vadd.f32 1.0, %v6677_v13 }
 0x23a   : > { %v1860_v63 = vmul.f32 %v1812_v30, %v1668_v49  ;;  %2258 = vst.msk [vmem:[#allocation2 + $0x180] sm:$0xff] %vm2216_vm6, %v7846_v37  ;;  %2347 = vrot.lane.b32.xlu0 %v7558_v50, %s6802_s15 }
 0x23b   : > { %v6679_v7 = vpop.eup %6678  ;;  %v1859_v24 = vmul.f32 %v1811_v33, %v1667_v55  ;;  %2257 = vst.msk [vmem:[#allocation2 + $0x178] sm:$0xff] %vm2216_vm6, %v7849_v32  ;;  %2560 = vrot.lane.b32.xlu1 %v7687_v62, %s6803_s26  ;;  %v5359_v55 = vld [vmem:[%s8955_s7 + $0x60] sm:$0xff] }
 0x23c   : > { %v6681_v6 = vpop.eup %6680  ;;  %v7862_v14 = vmul.f32 %v7777_v54, %v1860_v63  ;;  %v1814_v21 = vadd.f32 1.0, %v6679_v7  ;;  %v1671_v54 = vmul.f32 0.5, %v1617_v3  ;;  %v2151_v8 = vpop.permute.xlu1 %2150 }
 0x23d   : > { %v7865_v59 = vmul.f32 %v7739_v0, %v1859_v24  ;;  %v1813_v50 = vadd.f32 1.0, %v6681_v6 }
 0x23e   : > { %v1862_v17 = vmul.f32 %v1814_v21, %v1670_v19  ;;  %2260 = vst.msk [vmem:[#allocation2 + $0x190] sm:$0xff] %vm2216_vm6, %v7862_v14  ;;  %2538 = vrot.lane.b32.xlu0 %v7564_v52, %s6803_s26 }
 0x23f   : > { %v6683_v57 = vpop.eup %6682  ;;  %v1861_v42 = vmul.f32 %v1813_v50, %v1669_v26  ;;  %2259 = vst.msk [vmem:[#allocation2 + $0x188] sm:$0xff] %vm2216_vm6, %v7865_v59  ;;  %2365 = vrot.lane.b32.xlu1 %v7691_v15, %s6802_s15 }
 0x240   : > { %v6685_v0 = vpop.eup %6684  ;;  %v7875_v43 = vmul.f32 %v2141_v34, %v1862_v17  ;;  %v1816_v60 = vadd.f32 1.0, %v6683_v57 }
 0x241   : > { %v7878_v41 = vmul.f32 %v7812_v18, %v1861_v42  ;;  %v1815_v36 = vadd.f32 1.0, %v6685_v0 }
 0x242   : > { %2262 = vst.msk [vmem:[#allocation2 + $0x1a0] sm:$0xff] %vm2216_vm6, %v7875_v43  ;;  %v1864_v52 = vmul.f32 %v1816_v60, %v1672_v38  ;;  %2351 = vrot.lane.b32.xlu0 %v7584_v23, %s6802_s15  ;;  %v5362_v60 = vld [vmem:[%s8955_s7 + $0x78] sm:$0xff] }
 0x243   : > { %2261 = vst.msk [vmem:[#allocation2 + $0x198] sm:$0xff] %vm2216_vm6, %v7878_v41  ;;  %v1863_v3 = vmul.f32 %v1815_v36, %v1671_v54  ;;  %2564 = vrot.lane.b32.xlu1 %v7713_v51, %s6803_s26 }
 0x244   : > { %v7888_v44 = vmul.f32 %v2151_v8, %v1864_v52 }
 0x245   : > { %v7890_v18 = vmul.f32 %v2146_v47, %v1863_v3 }
 0x246   : > { %2542 = vrot.lane.b32.xlu0 %v7592_v35, %s6803_s26 }
 0x247   : > { %2369 = vrot.lane.b32.xlu1 %v7716_v22, %s6802_s15 }
 0x24a   : > { %2355 = vrot.lane.b32.xlu0 %v7610_v9, %s6802_s15 }
 0x24b   : > { %2568 = vrot.lane.b32.xlu1 %v7736_v53, %s6803_s26 }
 0x24e   : > { %2546 = vrot.lane.b32.xlu0 %v7616_v29, %s6803_s26 }
 0x24f   : > { %2373 = vrot.lane.b32.xlu1 %v7741_v48, %s6802_s15 }
 0x252   : > { %2359 = vrot.lane.b32.xlu0 %v7638_v31, %s6802_s15 }
 0x253   : > { %2572 = vrot.lane.b32.xlu1 %v7761_v12, %s6803_s26 }
 0x256   : > { %2550 = vrot.lane.b32.xlu0 %v7644_v16, %s6803_s26 }
 0x257   : > { %2377 = vrot.lane.b32.xlu1 %v7764_v40, %s6802_s15 }
 0x25a   : > { %2363 = vrot.lane.b32.xlu0 %v7662_v58, %s6802_s15 }
 0x25b   : > { %2576 = vrot.lane.b32.xlu1 %v7786_v61, %s6803_s26 }
 0x25c   : > { %v2316_v23 = vpop.permute.xlu0 %2315 }
 0x25d   : > { %2459 = vst.msk [vmem:[#allocation2 + $0x28] sm:$0xff] %vm2457_vm7, %v2316_v23  ;;  %v2314_v35 = vpop.permute.xlu1 %2313 }
 0x25e   : > { %2458 = vst.msk [vmem:[#allocation2 + $0x20] sm:$0xff] %vm2457_vm7, %v2314_v35  ;;  %2554 = vrot.lane.b32.xlu0 %v7670_v45, %s6803_s26 }
 0x25f   : > { %2381 = vrot.lane.b32.xlu1 %v7789_v56, %s6802_s15 }
 0x260   : > { %v2513_v9 = vpop.permute.xlu0 %2512 }
 0x261   : > { %2654 = vst.msk [vmem:[#allocation2 + $0x20] sm:$0xff] %vm2650_vm8, %v2513_v9  ;;  %v2320_v29 = vpop.permute.xlu1 %2319 }
 0x262   : > { %2461 = vst.msk [vmem:[#allocation2 + $0x38] sm:$0xff] %vm2457_vm7, %v2320_v29  ;;  %2367 = vrot.lane.b32.xlu0 %v7687_v62, %s6802_s15 }
 0x263   : > { %2580 = vrot.lane.b32.xlu1 %v7809_v11, %s6803_s26 }
 0x264   : > { %v2318_v31 = vpop.permute.xlu0 %2317 }
 0x265   : > { %2460 = vst.msk [vmem:[#allocation2 + $0x30] sm:$0xff] %vm2457_vm7, %v2318_v31  ;;  %v2511_v16 = vpop.permute.xlu1 %2510 }
 0x266   : > { %2653 = vst.msk [vmem:[#allocation2 + $0x18] sm:$0xff] %vm2650_vm8, %v2511_v16  ;;  %2558 = vrot.lane.b32.xlu0 %v7691_v15, %s6803_s26 }
 0x267   : > { %2385 = vrot.lane.b32.xlu1 %v7814_v39, %s6802_s15 }
 0x268   : > { %v2517_v58 = vpop.permute.xlu0 %2516  ;;  %v2747_v45 = vld [vmem:[#allocation2 + $0x20] sm:$0xff] }
 0x269   : > { %2656 = vst.msk [vmem:[#allocation2 + $0x30] sm:$0xff] %vm2650_vm8, %v2517_v58  ;;  %5961 = vmatprep.mubr.msk.f32.mxu0 %vm2201_vm5, %v2747_v45  ;;  %v2324_v62 = vpop.permute.xlu1 %2323 }
 0x26a   : > { %2463 = vst.msk [vmem:[#allocation2 + $0x48] sm:$0xff] %vm2457_vm7, %v2324_v62  ;;  %2371 = vrot.lane.b32.xlu0 %v7713_v51, %s6802_s15 }
 0x26b   : > { %2584 = vrot.lane.b32.xlu1 %v7830_v5, %s6803_s26 }
 0x26c   : > { %v2515_v46 = vpop.permute.xlu0 %2514 }
 0x26d   : > { %2655 = vst.msk [vmem:[#allocation2 + $0x28] sm:$0xff] %vm2650_vm8, %v2515_v46  ;;  %v2328_v15 = vpop.permute.xlu1 %2327  ;;  %v2699_v2 = vld [vmem:[#allocation2 + $0x1f] sm:$0xff] }
 0x26e   : > { %2465 = vst.msk [vmem:[#allocation2 + $0x58] sm:$0xff] %vm2457_vm7, %v2328_v15  ;;  %2562 = vrot.lane.b32.xlu0 %v7716_v22, %s6803_s26  ;;  %6045 = vmatprep.mubr.msk.f32.mxu1 %vm2201_vm5, %v2699_v2 }
 0x26f   : > { %2389 = vrot.lane.b32.xlu1 %v7833_v4, %s6802_s15 }
 0x270   : > { %v2322_v1 = vpop.permute.xlu0 %2321  ;;  %v2749_v10 = vld [vmem:[#allocation2 + $0x30] sm:$0xff] }
 0x271   : > { %2462 = vst.msk [vmem:[#allocation2 + $0x40] sm:$0xff] %vm2457_vm7, %v2322_v1  ;;  %v2332_v51 = vpop.permute.xlu1 %2331 }
 0x272   : > { %2467 = vst.msk [vmem:[#allocation2 + $0x68] sm:$0xff] %vm2457_vm7, %v2332_v51  ;;  %2375 = vrot.lane.b32.xlu0 %v7736_v53, %s6802_s15  ;;  %v5360_v53 = vld [vmem:[%s8955_s7 + $0x68] sm:$0xff] }
 0x273   : > { %2588 = vrot.lane.b32.xlu1 %v7846_v37, %s6803_s26  ;;  %v6273_v13 = vpack.c.bf16 %v5360_v53, %v5359_v55 }
 0x274   : > { %v2521_v28 = vpop.permute.xlu0 %2520  ;;  %v2748_v49 = vld [vmem:[#allocation2 + $0x28] sm:$0xff] }
 0x275   : > { %v2700_v22 = vld [vmem:[#allocation2 + $0x27] sm:$0xff]  ;;  %v2701_v25 = vld [vmem:[#allocation2 + $0x2f] sm:$0xff]  ;;  %2658 = vst.msk [vmem:[#allocation2 + $0x40] sm:$0xff] %vm2650_vm8, %v2521_v28  ;;  %5962 = vmatmul.mubr.msk.f32.vlgmr.msra.gmra.mrb[48].mxu0 %vm2201_vm5, %v2748_v49  ;;  %v2336_v34 = vpop.permute.xlu1 %2335  ;;  %6274 = vmatprep.subr.bf16.mxu1 %v6273_v13 }
 0x276   : > { %6046 = vmatmul.mubr.msk.f32.vlgmr.msra.gmra.mrb[48].mxu1 %vm2201_vm5, %v2700_v22  ;;  %2469 = vst.msk [vmem:[#allocation2 + $0x78] sm:$0xff] %vm2457_vm7, %v2336_v34  ;;  %2566 = vrot.lane.b32.xlu0 %v7741_v48, %s6803_s26  ;;  %v5363_v22 = vld [vmem:[%s8955_s7 + $0x80] sm:$0xff] }
 0x277   : > { %5964 = vmatprep.mubr.msk.f32.mxu0 %vm2201_vm5, %v2749_v10  ;;  %6048 = vmatprep.mubr.msk.f32.mxu1 %vm2201_vm5, %v2701_v25  ;;  %v5364_v25 = vld [vmem:[%s8955_s7 + $0x88] sm:$0xff] }
 0x278   : > { %2393 = vrot.lane.b32.xlu1 %v7849_v32, %s6802_s15  ;;  %v2519_v30 = vpop.permute.xlu0 %2518  ;;  %6276 = vmatpush3.bf16.msra.mxu1 %v6273_v13  ;;  %v6281_v34 = vpack.c.bf16 %v5364_v25, %v5363_v22 }
 0x279   : > { %2657 = vst.msk [vmem:[#allocation2 + $0x38] sm:$0xff] %vm2650_vm8, %v2519_v30  ;;  %v2338_v33 = vpop.permute.xlu1 %2337 }
 0x27a   : > { %2470 = vst.msk [vmem:[#allocation2 + $0x80] sm:$0xff] %vm2457_vm7, %v2338_v33  ;;  %2379 = vrot.lane.b32.xlu0 %v7761_v12, %s6802_s15 }
 0x27c   : > { %2592 = vrot.lane.b32.xlu1 %v7862_v14, %s6803_s26  ;;  %v2326_v48 = vpop.permute.xlu0 %2325  ;;  %v2751_v6 = vld [vmem:[#allocation2 + $0x40] sm:$0xff] }
 0x27d   : > { %2464 = vst.msk [vmem:[#allocation2 + $0x50] sm:$0xff] %vm2457_vm7, %v2326_v48  ;;  %v2537_v63 = vpop.permute.xlu1 %2536 }
 0x27e   : > { %2666 = vst.msk [vmem:[#allocation2 + $0x80] sm:$0xff] %vm2650_vm8, %v2537_v63  ;;  %2570 = vrot.lane.b32.xlu0 %v7764_v40, %s6803_s26 }
 0x280   : > { %2397 = vrot.lane.b32.xlu1 %v7865_v59, %s6802_s15  ;;  %v2525_v19 = vpop.permute.xlu0 %2524  ;;  %v2750_v7 = vld [vmem:[#allocation2 + $0x38] sm:$0xff] }
 0x281   : > { %v2702_v24 = vld [vmem:[#allocation2 + $0x37] sm:$0xff]  ;;  %v2703_v26 = vld [vmem:[#allocation2 + $0x3f] sm:$0xff]  ;;  %2660 = vst.msk [vmem:[#allocation2 + $0x50] sm:$0xff] %vm2650_vm8, %v2525_v19  ;;  %v2342_v12 = vpop.permute.xlu1 %2341  ;;  %5965 = vmatmul.mubr.msk.f32.gmra.mrb[50].mxu0 %vm2201_vm5, %v2750_v7 }
 0x282   : > { %6049 = vmatmul.mubr.msk.f32.gmra.mrb[50].mxu1 %vm2201_vm5, %v2702_v24  ;;  %2472 = vst.msk [vmem:[#allocation2 + $0x90] sm:$0xff] %vm2457_vm7, %v2342_v12  ;;  %2383 = vrot.lane.b32.xlu0 %v7786_v61, %s6802_s15 }
 0x283   : > { %5967 = vmatprep.mubr.msk.f32.mxu0 %vm2201_vm5, %v2751_v6  ;;  %6051 = vmatprep.mubr.msk.f32.mxu1 %vm2201_vm5, %v2703_v26 }
 0x284   : > { %2596 = vrot.lane.b32.xlu1 %v7875_v43, %s6803_s26  ;;  %v2523_v40 = vpop.permute.xlu0 %2522 }
 0x285   : > { %2659 = vst.msk [vmem:[#allocation2 + $0x48] sm:$0xff] %vm2650_vm8, %v2523_v40  ;;  %v2541_v21 = vpop.permute.xlu1 %2540  ;;  %v2759_v49 = vld [vmem:[#allocation2 + $0x80] sm:$0xff] }
 0x286   : > { %2668 = vst.msk [vmem:[#allocation2 + $0x90] sm:$0xff] %vm2650_vm8, %v2541_v21  ;;  %2574 = vrot.lane.b32.xlu0 %v7789_v56, %s6803_s26 }
 0x288   : > { %2401 = vrot.lane.b32.xlu1 %v7878_v41, %s6802_s15  ;;  %v2330_v61 = vpop.permute.xlu0 %2329  ;;  %v2753_v42 = vld [vmem:[#allocation2 + $0x50] sm:$0xff] }
 0x289   : > { %2466 = vst.msk [vmem:[#allocation2 + $0x60] sm:$0xff] %vm2457_vm7, %v2330_v61  ;;  %v2346_v47 = vpop.permute.xlu1 %2345 }
 0x28a   : > { %2474 = vst.msk [vmem:[#allocation2 + $0xa0] sm:$0xff] %vm2457_vm7, %v2346_v47  ;;  %2387 = vrot.lane.b32.xlu0 %v7809_v11, %s6802_s15 }
 0x28c   : > { %2403 = vrot.lane.b32.xlu1 %v7875_v43, %s6802_s15  ;;  %v2529_v50 = vpop.permute.xlu0 %2528  ;;  %v2752_v17 = vld [vmem:[#allocation2 + $0x48] sm:$0xff]  ;;  %v5361_v43 = vld [vmem:[%s8955_s7 + $0x70] sm:$0xff] }
 0x28d   : > { %v2704_v38 = vld [vmem:[#allocation2 + $0x47] sm:$0xff]  ;;  %v2705_v57 = vld [vmem:[#allocation2 + $0x4f] sm:$0xff]  ;;  %2662 = vst.msk [vmem:[#allocation2 + $0x60] sm:$0xff] %vm2650_vm8, %v2529_v50  ;;  %v2545_v56 = vpop.permute.xlu1 %2544  ;;  %5968 = vmatmul.mubr.msk.f32.gmra.mrb[52].mxu0 %vm2201_vm5, %v2752_v17  ;;  %v6277_v36 = vpack.c.bf16 %v5362_v60, %v5361_v43 }
 0x28e   : > { %6052 = vmatmul.mubr.msk.f32.gmra.mrb[52].mxu1 %vm2201_vm5, %v2704_v38  ;;  %2670 = vst.msk [vmem:[#allocation2 + $0xa0] sm:$0xff] %vm2650_vm8, %v2545_v56  ;;  %2578 = vrot.lane.b32.xlu0 %v7814_v39, %s6803_s26  ;;  %v2761_v48 = vld [vmem:[#allocation2 + $0x90] sm:$0xff] }
 0x28f   : > { %5970 = vmatprep.mubr.msk.f32.mxu0 %vm2201_vm5, %v2753_v42  ;;  %6054 = vmatprep.mubr.msk.f32.mxu1 %vm2201_vm5, %v2705_v57 }
 0x290   : > { %2407 = vrot.lane.b32.xlu1 %v7888_v44, %s6802_s15  ;;  %v2527_v11 = vpop.permute.xlu0 %2526  ;;  %6278 = vmatprep.subr.bf16.mxu1 %v6277_v36 }
 0x291   : > { %2661 = vst.msk [vmem:[#allocation2 + $0x58] sm:$0xff] %vm2650_vm8, %v2527_v11  ;;  %v2350_v54 = vpop.permute.xlu1 %2349  ;;  %6280 = vmatpush3.bf16.msra.mxu1 %v6277_v36 }
 0x292   : > { %2476 = vst.msk [vmem:[#allocation2 + $0xb0] sm:$0xff] %vm2457_vm7, %v2350_v54  ;;  %2391 = vrot.lane.b32.xlu0 %v7830_v5, %s6802_s15  ;;  %6282 = vmatprep.subr.bf16.mxu1 %v6281_v34 }
 0x294   : > { %v2334_v0 = vpop.permute.xlu0 %2333  ;;  %v2755_v35 = vld [vmem:[#allocation2 + $0x60] sm:$0xff] }
 0x295   : > { %2468 = vst.msk [vmem:[#allocation2 + $0x70] sm:$0xff] %vm2457_vm7, %v2334_v0  ;;  %v2549_v39 = vpop.permute.xlu1 %2548  ;;  %6284 = vmatpush3.bf16.msra.mxu1 %v6281_v34  ;;  %v2763_v6 = vld [vmem:[#allocation2 + $0xa0] sm:$0xff] }
 0x296   : > { %2672 = vst.msk [vmem:[#allocation2 + $0xb0] sm:$0xff] %vm2650_vm8, %v2549_v39  ;;  %2582 = vrot.lane.b32.xlu0 %v7833_v4, %s6803_s26 }
 0x298   : > { %v2533_v52 = vpop.permute.xlu0 %2532  ;;  %v2754_v5 = vld [vmem:[#allocation2 + $0x58] sm:$0xff] }
 0x299   : > { %v2706_v8 = vld [vmem:[#allocation2 + $0x57] sm:$0xff]  ;;  %v2707_v3 = vld [vmem:[#allocation2 + $0x5f] sm:$0xff]  ;;  %2664 = vst.msk [vmem:[#allocation2 + $0x70] sm:$0xff] %vm2650_vm8, %v2533_v52  ;;  %v2354_v23 = vpop.permute.xlu1 %2353  ;;  %5971 = vmatmul.mubr.msk.f32.gmra.mrb[54].mxu0 %vm2201_vm5, %v2754_v5 }
 0x29a   : > { %6055 = vmatmul.mubr.msk.f32.gmra.mrb[54].mxu1 %vm2201_vm5, %v2706_v8  ;;  %2478 = vst.msk [vmem:[#allocation2 + $0xc0] sm:$0xff] %vm2457_vm7, %v2354_v23  ;;  %2395 = vrot.lane.b32.xlu0 %v7846_v37, %s6802_s15 }
 0x29b   : > { %5973 = vmatprep.mubr.msk.f32.mxu0 %vm2201_vm5, %v2755_v35  ;;  %6057 = vmatprep.mubr.msk.f32.mxu1 %vm2201_vm5, %v2707_v3 }
 0x29c   : > { %v2340_v4 = vpop.permute.xlu0 %2339 }
 0x29d   : > { %2471 = vst.msk [vmem:[#allocation2 + $0x88] sm:$0xff] %vm2457_vm7, %v2340_v4  ;;  %v2553_v9 = vpop.permute.xlu1 %2552  ;;  %v2765_v57 = vld [vmem:[#allocation2 + $0xb0] sm:$0xff] }
 0x29e   : > { %2674 = vst.msk [vmem:[#allocation2 + $0xc0] sm:$0xff] %vm2650_vm8, %v2553_v9  ;;  %2586 = vrot.lane.b32.xlu0 %v7849_v32, %s6803_s26 }
 0x2a0   : > { %v2531_v29 = vpop.permute.xlu0 %2530 }
 0x2a1   : > { %2663 = vst.msk [vmem:[#allocation2 + $0x68] sm:$0xff] %vm2650_vm8, %v2531_v29  ;;  %v2358_v31 = vpop.permute.xlu1 %2357 }
 0x2a2   : > { %2480 = vst.msk [vmem:[#allocation2 + $0xd0] sm:$0xff] %vm2457_vm7, %v2358_v31  ;;  %2399 = vrot.lane.b32.xlu0 %v7862_v14, %s6802_s15  ;;  %v2757_v14 = vld [vmem:[#allocation2 + $0x70] sm:$0xff] }
 0x2a4   : > { %v2344_v37 = vpop.permute.xlu0 %2343 }
 0x2a5   : > { %2473 = vst.msk [vmem:[#allocation2 + $0x98] sm:$0xff] %vm2457_vm7, %v2344_v37  ;;  %v2557_v16 = vpop.permute.xlu1 %2556  ;;  %v2767_v60 = vld [vmem:[#allocation2 + $0xc0] sm:$0xff] }
 0x2a6   : > { %2676 = vst.msk [vmem:[#allocation2 + $0xd0] sm:$0xff] %vm2650_vm8, %v2557_v16  ;;  %2590 = vrot.lane.b32.xlu0 %v7865_v59, %s6803_s26 }
 0x2a8   : > { %v2535_v58 = vpop.permute.xlu0 %2534  ;;  %v2756_v32 = vld [vmem:[#allocation2 + $0x68] sm:$0xff] }
 0x2a9   : > { %v2708_v45 = vld [vmem:[#allocation2 + $0x67] sm:$0xff]  ;;  %v2709_v62 = vld [vmem:[#allocation2 + $0x6f] sm:$0xff]  ;;  %2665 = vst.msk [vmem:[#allocation2 + $0x78] sm:$0xff] %vm2650_vm8, %v2535_v58  ;;  %v2362_v46 = vpop.permute.xlu1 %2361  ;;  %5974 = vmatmul.mubr.msk.f32.gmra.mrb[56].mxu0 %vm2201_vm5, %v2756_v32 }
 0x2aa   : > { %6058 = vmatmul.mubr.msk.f32.gmra.mrb[56].mxu1 %vm2201_vm5, %v2708_v45  ;;  %2482 = vst.msk [vmem:[#allocation2 + $0xe0] sm:$0xff] %vm2457_vm7, %v2362_v46  ;;  %2594 = vrot.lane.b32.xlu0 %v7878_v41, %s6803_s26 }
 0x2ab   : > { %5976 = vmatprep.mubr.msk.f32.mxu0 %vm2201_vm5, %v2757_v14  ;;  %6060 = vmatprep.mubr.msk.f32.mxu1 %vm2201_vm5, %v2709_v62 }
 0x2ac   : > { %v2348_v59 = vpop.permute.xlu0 %2347 }
 0x2ad   : > { %2475 = vst.msk [vmem:[#allocation2 + $0xa8] sm:$0xff] %vm2457_vm7, %v2348_v59  ;;  %v2561_v15 = vpop.permute.xlu1 %2560  ;;  %v2769_v4 = vld [vmem:[#allocation2 + $0xd0] sm:$0xff] }
 0x2ae   : > { %2678 = vst.msk [vmem:[#allocation2 + $0xe0] sm:$0xff] %vm2650_vm8, %v2561_v15  ;;  %2598 = vrot.lane.b32.xlu0 %v7890_v18, %s6803_s26 }
 0x2b0   : > { %v2539_v2 = vpop.permute.xlu0 %2538  ;;  %v2758_v1 = vld [vmem:[#allocation2 + $0x78] sm:$0xff] }
 0x2b1   : > { %v2710_v51 = vld [vmem:[#allocation2 + $0x77] sm:$0xff]  ;;  %v2711_v28 = vld [vmem:[#allocation2 + $0x7f] sm:$0xff]  ;;  %2667 = vst.msk [vmem:[#allocation2 + $0x88] sm:$0xff] %vm2650_vm8, %v2539_v2  ;;  %v2366_v41 = vpop.permute.xlu1 %2365  ;;  %5977 = vmatmul.mubr.msk.f32.gmra.mrb[58].mxu0 %vm2201_vm5, %v2758_v1 }
 0x2b2   : > { %6061 = vmatmul.mubr.msk.f32.gmra.mrb[58].mxu1 %vm2201_vm5, %v2710_v51  ;;  %2484 = vst.msk [vmem:[#allocation2 + $0xf0] sm:$0xff] %vm2457_vm7, %v2366_v41  ;;  %2600 = vrot.lane.b32.xlu0 %v7888_v44, %s6803_s26 }
 0x2b3   : > { %5979 = vmatprep.mubr.msk.f32.mxu0 %vm2201_vm5, %v2759_v49  ;;  %6063 = vmatprep.mubr.msk.f32.mxu1 %vm2201_vm5, %v2711_v28 }
 0x2b4   : > { %v2352_v10 = vpop.permute.xlu0 %2351 }
 0x2b5   : > { %2477 = vst.msk [vmem:[#allocation2 + $0xb8] sm:$0xff] %vm2457_vm7, %v2352_v10  ;;  %v2565_v55 = vpop.permute.xlu1 %2564  ;;  %v2771_v45 = vld [vmem:[#allocation2 + $0xe0] sm:$0xff] }
 0x2b6   : > { %2680 = vst.msk [vmem:[#allocation2 + $0xf0] sm:$0xff] %vm2650_vm8, %v2565_v55  ;;  %2405 = vrot.lane.b32.xlu0 %v7890_v18, %s6802_s15 }
 0x2b8   : > { %v2543_v53 = vpop.permute.xlu0 %2542  ;;  %v2760_v13 = vld [vmem:[#allocation2 + $0x88] sm:$0xff] }
 0x2b9   : > { %v2712_v30 = vld [vmem:[#allocation2 + $0x87] sm:$0xff]  ;;  %v2713_v44 = vld [vmem:[#allocation2 + $0x8f] sm:$0xff]  ;;  %2669 = vst.msk [vmem:[#allocation2 + $0x98] sm:$0xff] %vm2650_vm8, %v2543_v53  ;;  %v2370_v33 = vpop.permute.xlu1 %2369  ;;  %5980 = vmatmul.mubr.msk.f32.gmra.mrb[60].mxu0 %vm2201_vm5, %v2760_v13 }
 0x2ba   : > { %6064 = vmatmul.mubr.msk.f32.gmra.mrb[60].mxu1 %vm2201_vm5, %v2712_v30  ;;  %2486 = vst.msk [vmem:[#allocation2 + $0x100] sm:$0xff] %vm2457_vm7, %v2370_v33  ;;  %5982 = vmatprep.mubr.msk.f32.mxu0 %vm2201_vm5, %v2761_v48 }
 0x2bb   : > { %6066 = vmatprep.mubr.msk.f32.mxu1 %vm2201_vm5, %v2713_v44 }
 0x2bc   : > { %v2356_v63 = vpop.permute.xlu0 %2355 }
 0x2bd   : > { %2479 = vst.msk [vmem:[#allocation2 + $0xc8] sm:$0xff] %vm2457_vm7, %v2356_v63  ;;  %v2569_v18 = vpop.permute.xlu1 %2568  ;;  %v2773_v51 = vld [vmem:[#allocation2 + $0xf0] sm:$0xff] }
 0x2be   : > { %2682 = vst.msk [vmem:[#allocation2 + $0x100] sm:$0xff] %vm2650_vm8, %v2569_v18 }
 0x2c0   : > { %v2547_v19 = vpop.permute.xlu0 %2546  ;;  %v2762_v7 = vld [vmem:[#allocation2 + $0x98] sm:$0xff] }
 0x2c1   : > { %v2714_v24 = vld [vmem:[#allocation2 + $0x97] sm:$0xff]  ;;  %v2715_v26 = vld [vmem:[#allocation2 + $0x9f] sm:$0xff]  ;;  %2671 = vst.msk [vmem:[#allocation2 + $0xa8] sm:$0xff] %vm2650_vm8, %v2547_v19  ;;  %v2374_v12 = vpop.permute.xlu1 %2373  ;;  %5983 = vmatmul.mubr.msk.f32.gmra.mrb[62].mxu0 %vm2201_vm5, %v2762_v7 }
 0x2c2   : > { %6067 = vmatmul.mubr.msk.f32.gmra.mrb[62].mxu1 %vm2201_vm5, %v2714_v24  ;;  %2488 = vst.msk [vmem:[#allocation2 + $0x110] sm:$0xff] %vm2457_vm7, %v2374_v12  ;;  %5985 = vmatprep.mubr.msk.f32.mxu0 %vm2201_vm5, %v2763_v6 }
 0x2c3   : > { %6069 = vmatprep.mubr.msk.f32.mxu1 %vm2201_vm5, %v2715_v26 }
 0x2c4   : > { %v2360_v40 = vpop.permute.xlu0 %2359 }
 0x2c5   : > { %2481 = vst.msk [vmem:[#allocation2 + $0xd8] sm:$0xff] %vm2457_vm7, %v2360_v40  ;;  %v2573_v21 = vpop.permute.xlu1 %2572  ;;  %v2775_v55 = vld [vmem:[#allocation2 + $0x100] sm:$0xff] }
 0x2c6   : > { %2684 = vst.msk [vmem:[#allocation2 + $0x110] sm:$0xff] %vm2650_vm8, %v2573_v21 }
 0x2c8   : > { %v2551_v61 = vpop.permute.xlu0 %2550  ;;  %v2764_v47 = vld [vmem:[#allocation2 + $0xa8] sm:$0xff] }
 0x2c9   : > { %v2716_v50 = vld [vmem:[#allocation2 + $0xa7] sm:$0xff]  ;;  %v2717_v17 = vld [vmem:[#allocation2 + $0xaf] sm:$0xff]  ;;  %2673 = vst.msk [vmem:[#allocation2 + $0xb8] sm:$0xff] %vm2650_vm8, %v2551_v61  ;;  %v2378_v38 = vpop.permute.xlu1 %2377  ;;  %5986 = vmatmul.mubr.msk.f32.gmra.mrb[64].mxu0 %vm2201_vm5, %v2764_v47 }
 0x2ca   : > { %6070 = vmatmul.mubr.msk.f32.gmra.mrb[64].mxu1 %vm2201_vm5, %v2716_v50  ;;  %2490 = vst.msk [vmem:[#allocation2 + $0x120] sm:$0xff] %vm2457_vm7, %v2378_v38  ;;  %5988 = vmatprep.mubr.msk.f32.mxu0 %vm2201_vm5, %v2765_v57 }
 0x2cb   : > { %6072 = vmatprep.mubr.msk.f32.mxu1 %vm2201_vm5, %v2717_v17 }
 0x2cc   : > { %v2364_v56 = vpop.permute.xlu0 %2363 }
 0x2cd   : > { %2483 = vst.msk [vmem:[#allocation2 + $0xe8] sm:$0xff] %vm2457_vm7, %v2364_v56  ;;  %v2577_v42 = vpop.permute.xlu1 %2576  ;;  %v2777_v18 = vld [vmem:[#allocation2 + $0x110] sm:$0xff] }
 0x2ce   : > { %2686 = vst.msk [vmem:[#allocation2 + $0x120] sm:$0xff] %vm2650_vm8, %v2577_v42 }
 0x2d0   : > { %v2555_v11 = vpop.permute.xlu0 %2554  ;;  %v2766_v54 = vld [vmem:[#allocation2 + $0xb8] sm:$0xff] }
 0x2d1   : > { %v2718_v0 = vld [vmem:[#allocation2 + $0xb7] sm:$0xff]  ;;  %v2719_v39 = vld [vmem:[#allocation2 + $0xbf] sm:$0xff]  ;;  %2675 = vst.msk [vmem:[#allocation2 + $0xc8] sm:$0xff] %vm2650_vm8, %v2555_v11  ;;  %v2382_v43 = vpop.permute.xlu1 %2381  ;;  %5989 = vmatmul.mubr.msk.f32.gmra.mrb[66].mxu0 %vm2201_vm5, %v2766_v54 }
 0x2d2   : > { %6073 = vmatmul.mubr.msk.f32.gmra.mrb[66].mxu1 %vm2201_vm5, %v2718_v0  ;;  %2492 = vst.msk [vmem:[#allocation2 + $0x130] sm:$0xff] %vm2457_vm7, %v2382_v43  ;;  %5991 = vmatprep.mubr.msk.f32.mxu0 %vm2201_vm5, %v2767_v60 }
 0x2d3   : > { %6075 = vmatprep.mubr.msk.f32.mxu1 %vm2201_vm5, %v2719_v39 }
 0x2d4   : > { %v2368_v36 = vpop.permute.xlu0 %2367 }
 0x2d5   : > { %2485 = vst.msk [vmem:[#allocation2 + $0xf8] sm:$0xff] %vm2457_vm7, %v2368_v36  ;;  %v2581_v52 = vpop.permute.xlu1 %2580  ;;  %v2779_v21 = vld [vmem:[#allocation2 + $0x120] sm:$0xff] }
 0x2d6   : > { %2688 = vst.msk [vmem:[#allocation2 + $0x130] sm:$0xff] %vm2650_vm8, %v2581_v52 }
 0x2d8   : > { %v2559_v5 = vpop.permute.xlu0 %2558  ;;  %v2768_v8 = vld [vmem:[#allocation2 + $0xc8] sm:$0xff] }
 0x2d9   : > { %v2720_v3 = vld [vmem:[#allocation2 + $0xc7] sm:$0xff]  ;;  %v2721_v23 = vld [vmem:[#allocation2 + $0xcf] sm:$0xff]  ;;  %2677 = vst.msk [vmem:[#allocation2 + $0xd8] sm:$0xff] %vm2650_vm8, %v2559_v5  ;;  %v2386_v35 = vpop.permute.xlu1 %2385  ;;  %5992 = vmatmul.mubr.msk.f32.gmra.mrb[68].mxu0 %vm2201_vm5, %v2768_v8 }
 0x2da   : > { %6076 = vmatmul.mubr.msk.f32.gmra.mrb[68].mxu1 %vm2201_vm5, %v2720_v3  ;;  %2494 = vst.msk [vmem:[#allocation2 + $0x140] sm:$0xff] %vm2457_vm7, %v2386_v35  ;;  %5994 = vmatprep.mubr.msk.f32.mxu0 %vm2201_vm5, %v2769_v4 }
 0x2db   : > { %6078 = vmatprep.mubr.msk.f32.mxu1 %vm2201_vm5, %v2721_v23 }
 0x2dc   : > { %v2372_v9 = vpop.permute.xlu0 %2371 }
 0x2dd   : > { %2487 = vst.msk [vmem:[#allocation2 + $0x108] sm:$0xff] %vm2457_vm7, %v2372_v9  ;;  %v2585_v29 = vpop.permute.xlu1 %2584  ;;  %v2781_v57 = vld [vmem:[#allocation2 + $0x130] sm:$0xff] }
 0x2de   : > { %2690 = vst.msk [vmem:[#allocation2 + $0x140] sm:$0xff] %vm2650_vm8, %v2585_v29 }
 0x2e0   : > { %v2563_v31 = vpop.permute.xlu0 %2562  ;;  %v2770_v37 = vld [vmem:[#allocation2 + $0xd8] sm:$0xff] }
 0x2e1   : > { %v2722_v16 = vld [vmem:[#allocation2 + $0xd7] sm:$0xff]  ;;  %v2723_v58 = vld [vmem:[#allocation2 + $0xdf] sm:$0xff]  ;;  %2679 = vst.msk [vmem:[#allocation2 + $0xe8] sm:$0xff] %vm2650_vm8, %v2563_v31  ;;  %v2390_v32 = vpop.permute.xlu1 %2389  ;;  %5995 = vmatmul.mubr.msk.f32.gmra.mrb[70].mxu0 %vm2201_vm5, %v2770_v37 }
 0x2e2   : > { %6079 = vmatmul.mubr.msk.f32.gmra.mrb[70].mxu1 %vm2201_vm5, %v2722_v16  ;;  %2496 = vst.msk [vmem:[#allocation2 + $0x150] sm:$0xff] %vm2457_vm7, %v2390_v32  ;;  %5997 = vmatprep.mubr.msk.f32.mxu0 %vm2201_vm5, %v2771_v45 }
 0x2e3   : > { %6081 = vmatprep.mubr.msk.f32.mxu1 %vm2201_vm5, %v2723_v58 }
 0x2e4   : > { %v2376_v62 = vpop.permute.xlu0 %2375 }
 0x2e5   : > { %2489 = vst.msk [vmem:[#allocation2 + $0x118] sm:$0xff] %vm2457_vm7, %v2376_v62  ;;  %v2589_v46 = vpop.permute.xlu1 %2588  ;;  %v2783_v39 = vld [vmem:[#allocation2 + $0x140] sm:$0xff] }
 0x2e6   : > { %2692 = vst.msk [vmem:[#allocation2 + $0x150] sm:$0xff] %vm2650_vm8, %v2589_v46 }
 0x2e8   : > { %v2567_v14 = vpop.permute.xlu0 %2566  ;;  %v2772_v59 = vld [vmem:[#allocation2 + $0xe8] sm:$0xff] }
 0x2e9   : > { %v2724_v15 = vld [vmem:[#allocation2 + $0xe7] sm:$0xff]  ;;  %v2725_v2 = vld [vmem:[#allocation2 + $0xef] sm:$0xff]  ;;  %2681 = vst.msk [vmem:[#allocation2 + $0xf8] sm:$0xff] %vm2650_vm8, %v2567_v14  ;;  %5998 = vmatmul.mubr.msk.f32.gmra.mrb[72].mxu0 %vm2201_vm5, %v2772_v59 }
 0x2ea   : > { %v2394_v1 = vpop.permute.xlu1 %2393  ;;  %6082 = vmatmul.mubr.msk.f32.gmra.mrb[72].mxu1 %vm2201_vm5, %v2724_v15  ;;  %6000 = vmatprep.mubr.msk.f32.mxu0 %vm2201_vm5, %v2773_v51 }
 0x2eb   : > { %2498 = vst.msk [vmem:[#allocation2 + $0x160] sm:$0xff] %vm2457_vm7, %v2394_v1  ;;  %6084 = vmatprep.mubr.msk.f32.mxu1 %vm2201_vm5, %v2725_v2 }
 0x2ec   : > { %v2380_v28 = vpop.permute.xlu0 %2379 }
 0x2ed   : > { %2491 = vst.msk [vmem:[#allocation2 + $0x128] sm:$0xff] %vm2457_vm7, %v2380_v28  ;;  %v2785_v8 = vld [vmem:[#allocation2 + $0x150] sm:$0xff] }
 0x2ee   : > { %v2593_v41 = vpop.permute.xlu1 %2592 }
 0x2ef   : > { %2694 = vst.msk [vmem:[#allocation2 + $0x160] sm:$0xff] %vm2650_vm8, %v2593_v41 }
 0x2f0   : > { %v2571_v49 = vpop.permute.xlu0 %2570  ;;  %v2774_v22 = vld [vmem:[#allocation2 + $0xf8] sm:$0xff] }
 0x2f1   : > { %v2726_v25 = vld [vmem:[#allocation2 + $0xf7] sm:$0xff]  ;;  %v2727_v34 = vld [vmem:[#allocation2 + $0xff] sm:$0xff]  ;;  %2683 = vst.msk [vmem:[#allocation2 + $0x108] sm:$0xff] %vm2650_vm8, %v2571_v49  ;;  %6001 = vmatmul.mubr.msk.f32.gmra.mrb[74].mxu0 %vm2201_vm5, %v2774_v22  ;;  %v2796_v22 = vld [vmem:[#allocation2 + $0x29] sm:$0xff] }
 0x2f2   : > { %v2398_v10 = vpop.permute.xlu1 %2397  ;;  %6085 = vmatmul.mubr.msk.f32.gmra.mrb[74].mxu1 %vm2201_vm5, %v2726_v25  ;;  %6003 = vmatprep.mubr.msk.f32.mxu0 %vm2201_vm5, %v2775_v55  ;;  %v2795_v49 = vld [vmem:[#allocation2 + $0x21] sm:$0xff]  ;;  %v2797_v25 = vld [vmem:[#allocation2 + $0x31] sm:$0xff]  ;;  %v2800_v55 = vld [vmem:[#allocation2 + $0x49] sm:$0xff] }
 0x2f3   : > { %2500 = vst.msk [vmem:[#allocation2 + $0x170] sm:$0xff] %vm2457_vm7, %v2398_v10  ;;  %6087 = vmatprep.mubr.msk.f32.mxu1 %vm2201_vm5, %v2727_v34  ;;  %v2798_v34 = vld [vmem:[#allocation2 + $0x39] sm:$0xff]  ;;  %v2799_v10 = vld [vmem:[#allocation2 + $0x41] sm:$0xff] }
 0x2f4   : > { %v2384_v53 = vpop.permute.xlu0 %2383 }
 0x2f5   : > { %2493 = vst.msk [vmem:[#allocation2 + $0x138] sm:$0xff] %vm2457_vm7, %v2384_v53  ;;  %v2801_v53 = vld [vmem:[#allocation2 + $0x51] sm:$0xff] }
 0x2f6   : > { %v2597_v13 = vpop.permute.xlu1 %2596  ;;  %v2787_v29 = vld [vmem:[#allocation2 + $0x160] sm:$0xff] }
 0x2f7   : > { %2696 = vst.msk [vmem:[#allocation2 + $0x170] sm:$0xff] %vm2650_vm8, %v2597_v13  ;;  %v2802_v13 = vld [vmem:[#allocation2 + $0x59] sm:$0xff] }
 0x2f8   : > { %v2575_v30 = vpop.permute.xlu0 %2574  ;;  %v2776_v44 = vld [vmem:[#allocation2 + $0x108] sm:$0xff] }
 0x2f9   : > { %v2728_v33 = vld [vmem:[#allocation2 + $0x107] sm:$0xff]  ;;  %v2729_v48 = vld [vmem:[#allocation2 + $0x10f] sm:$0xff]  ;;  %2685 = vst.msk [vmem:[#allocation2 + $0x118] sm:$0xff] %vm2650_vm8, %v2575_v30  ;;  %6004 = vmatmul.mubr.msk.f32.gmra.mrb[76].mxu0 %vm2201_vm5, %v2776_v44 }
 0x2fa   : > { %v2402_v63 = vpop.permute.xlu1 %2401  ;;  %6088 = vmatmul.mubr.msk.f32.gmra.mrb[76].mxu1 %vm2201_vm5, %v2728_v33  ;;  %6006 = vmatprep.mubr.msk.f32.mxu0 %vm2201_vm5, %v2777_v18  ;;  %v2803_v30 = vld [vmem:[#allocation2 + $0x61] sm:$0xff]  ;;  %v2804_v44 = vld [vmem:[#allocation2 + $0x69] sm:$0xff]  ;;  %v2805_v33 = vld [vmem:[#allocation2 + $0x71] sm:$0xff] }
 0x2fb   : > { %2502 = vst.msk [vmem:[#allocation2 + $0x180] sm:$0xff] %vm2457_vm7, %v2402_v63  ;;  %6090 = vmatprep.mubr.msk.f32.mxu1 %vm2201_vm5, %v2729_v48  ;;  %v2806_v18 = vld [vmem:[#allocation2 + $0x79] sm:$0xff] }
 0x2fc   : > { %v2388_v19 = vpop.permute.xlu0 %2387 }
 0x2fd   : > { %2495 = vst.msk [vmem:[#allocation2 + $0x148] sm:$0xff] %vm2457_vm7, %v2388_v19  ;;  %v2807_v19 = vld [vmem:[#allocation2 + $0x81] sm:$0xff] }
 0x2fe   : > { %v2404_v7 = vpop.permute.xlu1 %2403  ;;  %v2789_v32 = vld [vmem:[#allocation2 + $0x170] sm:$0xff] }
 0x2ff   : > { %2503 = vst.msk [vmem:[#allocation2 + $0x188] sm:$0xff] %vm2457_vm7, %v2404_v7  ;;  %v2808_v7 = vld [vmem:[#allocation2 + $0x89] sm:$0xff] }
 0x300   : > { %v2579_v24 = vpop.permute.xlu0 %2578  ;;  %v2778_v26 = vld [vmem:[#allocation2 + $0x118] sm:$0xff] }
 0x301   : > { %v2730_v12 = vld [vmem:[#allocation2 + $0x117] sm:$0xff]  ;;  %v2731_v6 = vld [vmem:[#allocation2 + $0x11f] sm:$0xff]  ;;  %2687 = vst.msk [vmem:[#allocation2 + $0x128] sm:$0xff] %vm2650_vm8, %v2579_v24  ;;  %6007 = vmatmul.mubr.msk.f32.gmra.mrb[78].mxu0 %vm2201_vm5, %v2778_v26 }
 0x302   : > { %v2408_v40 = vpop.permute.xlu1 %2407  ;;  %6091 = vmatmul.mubr.msk.f32.gmra.mrb[78].mxu1 %vm2201_vm5, %v2730_v12  ;;  %6009 = vmatprep.mubr.msk.f32.mxu0 %vm2201_vm5, %v2779_v21  ;;  %v2809_v24 = vld [vmem:[#allocation2 + $0x91] sm:$0xff]  ;;  %v2810_v26 = vld [vmem:[#allocation2 + $0x99] sm:$0xff]  ;;  %v2811_v12 = vld [vmem:[#allocation2 + $0xa1] sm:$0xff] }
 0x303   : > { %2505 = vst.msk [vmem:[#allocation2 + $0x198] sm:$0xff] %vm2457_vm7, %v2408_v40  ;;  %6093 = vmatprep.mubr.msk.f32.mxu1 %vm2201_vm5, %v2731_v6  ;;  %v2812_v21 = vld [vmem:[#allocation2 + $0xa9] sm:$0xff] }
 0x304   : > { %v2392_v61 = vpop.permute.xlu0 %2391 }
 0x305   : > { %2497 = vst.msk [vmem:[#allocation2 + $0x158] sm:$0xff] %vm2457_vm7, %v2392_v61  ;;  %v2813_v61 = vld [vmem:[#allocation2 + $0xb1] sm:$0xff] }
 0x306   : > { %v2792_v2 = vld [vmem:[#allocation2 + $0x188] sm:$0xff] }
 0x308   : > { %v2583_v47 = vpop.permute.xlu0 %2582  ;;  %v2780_v50 = vld [vmem:[#allocation2 + $0x128] sm:$0xff] }
 0x309   : > { %v2732_v17 = vld [vmem:[#allocation2 + $0x127] sm:$0xff]  ;;  %v2733_v38 = vld [vmem:[#allocation2 + $0x12f] sm:$0xff]  ;;  %2689 = vst.msk [vmem:[#allocation2 + $0x138] sm:$0xff] %vm2650_vm8, %v2583_v47  ;;  %6010 = vmatmul.mubr.msk.f32.gmra.mrb[80].mxu0 %vm2201_vm5, %v2780_v50  ;;  %v2814_v47 = vld [vmem:[#allocation2 + $0xb9] sm:$0xff] }
 0x30a   : > { %6094 = vmatmul.mubr.msk.f32.gmra.mrb[80].mxu1 %vm2201_vm5, %v2732_v17  ;;  %6012 = vmatprep.mubr.msk.f32.mxu0 %vm2201_vm5, %v2781_v57  ;;  %v2794_v41 = vld [vmem:[#allocation2 + $0x198] sm:$0xff]  ;;  %v2815_v50 = vld [vmem:[#allocation2 + $0xc1] sm:$0xff]  ;;  %v2816_v17 = vld [vmem:[#allocation2 + $0xc9] sm:$0xff] }
 0x30b   : > { %6096 = vmatprep.mubr.msk.f32.mxu1 %vm2201_vm5, %v2733_v38  ;;  %v2817_v38 = vld [vmem:[#allocation2 + $0xd1] sm:$0xff] }
 0x30c   : > { %v2396_v56 = vpop.permute.xlu0 %2395 }
 0x30d   : > { %2499 = vst.msk [vmem:[#allocation2 + $0x168] sm:$0xff] %vm2457_vm7, %v2396_v56 }
 0x310   : > { %v2587_v42 = vpop.permute.xlu0 %2586  ;;  %v2782_v11 = vld [vmem:[#allocation2 + $0x138] sm:$0xff] }
 0x311   : > { %v2734_v54 = vld [vmem:[#allocation2 + $0x137] sm:$0xff]  ;;  %v2735_v0 = vld [vmem:[#allocation2 + $0x13f] sm:$0xff]  ;;  %2691 = vst.msk [vmem:[#allocation2 + $0x148] sm:$0xff] %vm2650_vm8, %v2587_v42  ;;  %6013 = vmatmul.mubr.msk.f32.gmra.mrb[82].mxu0 %vm2201_vm5, %v2782_v11 }
 0x312   : > { %6097 = vmatmul.mubr.msk.f32.gmra.mrb[82].mxu1 %vm2201_vm5, %v2734_v54  ;;  %6015 = vmatprep.mubr.msk.f32.mxu0 %vm2201_vm5, %v2783_v39  ;;  %v2818_v42 = vld [vmem:[#allocation2 + $0xd9] sm:$0xff]  ;;  %v2819_v11 = vld [vmem:[#allocation2 + $0xe1] sm:$0xff]  ;;  %v2820_v54 = vld [vmem:[#allocation2 + $0xe9] sm:$0xff] }
 0x313   : > { %6099 = vmatprep.mubr.msk.f32.mxu1 %vm2201_vm5, %v2735_v0  ;;  %v2821_v0 = vld [vmem:[#allocation2 + $0xf1] sm:$0xff]  ;;  %v2822_v39 = vld [vmem:[#allocation2 + $0xf9] sm:$0xff] }
 0x314   : > { %v2400_v43 = vpop.permute.xlu0 %2399 }
 0x315   : > { %2501 = vst.msk [vmem:[#allocation2 + $0x178] sm:$0xff] %vm2457_vm7, %v2400_v43  ;;  %v2823_v43 = vld [vmem:[#allocation2 + $0x101] sm:$0xff] }
 0x318   : > { %v2591_v60 = vpop.permute.xlu0 %2590  ;;  %v2784_v36 = vld [vmem:[#allocation2 + $0x148] sm:$0xff] }
 0x319   : > { %v2736_v52 = vld [vmem:[#allocation2 + $0x147] sm:$0xff]  ;;  %v2737_v5 = vld [vmem:[#allocation2 + $0x14f] sm:$0xff]  ;;  %2693 = vst.msk [vmem:[#allocation2 + $0x158] sm:$0xff] %vm2650_vm8, %v2591_v60  ;;  %6016 = vmatmul.mubr.msk.f32.gmra.mrb[84].mxu0 %vm2201_vm5, %v2784_v36 }
 0x31a   : > { %6100 = vmatmul.mubr.msk.f32.gmra.mrb[84].mxu1 %vm2201_vm5, %v2736_v52  ;;  %6018 = vmatprep.mubr.msk.f32.mxu0 %vm2201_vm5, %v2785_v8  ;;  %v2824_v52 = vld [vmem:[#allocation2 + $0x109] sm:$0xff]  ;;  %v2826_v8 = vld [vmem:[#allocation2 + $0x119] sm:$0xff] }
 0x31b   : > { %6102 = vmatprep.mubr.msk.f32.mxu1 %vm2201_vm5, %v2737_v5  ;;  %v2825_v5 = vld [vmem:[#allocation2 + $0x111] sm:$0xff] }
 0x31c   : > { %v2595_v3 = vpop.permute.xlu0 %2594 }
 0x31d   : > { %2695 = vst.msk [vmem:[#allocation2 + $0x168] sm:$0xff] %vm2650_vm8, %v2595_v3  ;;  %v2827_v3 = vld [vmem:[#allocation2 + $0x121] sm:$0xff] }
 0x320   : > { %v2599_v23 = vpop.permute.xlu0 %2598  ;;  %v2786_v35 = vld [vmem:[#allocation2 + $0x158] sm:$0xff] }
 0x321   : > { %v2738_v4 = vld [vmem:[#allocation2 + $0x157] sm:$0xff]  ;;  %v2739_v9 = vld [vmem:[#allocation2 + $0x15f] sm:$0xff]  ;;  %2697 = vst.msk [vmem:[#allocation2 + $0x178] sm:$0xff] %vm2650_vm8, %v2599_v23  ;;  %6019 = vmatmul.mubr.msk.f32.gmra.mrb[86].mxu0 %vm2201_vm5, %v2786_v35  ;;  %v2828_v23 = vld [vmem:[#allocation2 + $0x129] sm:$0xff] }
 0x322   : > { %6103 = vmatmul.mubr.msk.f32.gmra.mrb[86].mxu1 %vm2201_vm5, %v2738_v4  ;;  %6021 = vmatprep.mubr.msk.f32.mxu0 %vm2201_vm5, %v2787_v29  ;;  %v2829_v35 = vld [vmem:[#allocation2 + $0x131] sm:$0xff]  ;;  %v2830_v4 = vld [vmem:[#allocation2 + $0x139] sm:$0xff] }
 0x323   : > { %6105 = vmatprep.mubr.msk.f32.mxu1 %vm2201_vm5, %v2739_v9  ;;  %v2831_v9 = vld [vmem:[#allocation2 + $0x141] sm:$0xff] }
 0x324   : > { %v2601_v31 = vpop.permute.xlu0 %2600  ;;  %v2788_v37 = vld [vmem:[#allocation2 + $0x168] sm:$0xff] }
 0x325   : > { %v2740_v16 = vld [vmem:[#allocation2 + $0x167] sm:$0xff]  ;;  %v2741_v58 = vld [vmem:[#allocation2 + $0x16f] sm:$0xff]  ;;  %2698 = vst.msk [vmem:[#allocation2 + $0x180] sm:$0xff] %vm2650_vm8, %v2601_v31  ;;  %6022 = vmatmul.mubr.msk.f32.gmra.mrb[88].mxu0 %vm2201_vm5, %v2788_v37 }
 0x326   : > { %6106 = vmatmul.mubr.msk.f32.gmra.mrb[88].mxu1 %vm2201_vm5, %v2740_v16  ;;  %6024 = vmatprep.mubr.msk.f32.mxu0 %vm2201_vm5, %v2789_v32  ;;  %v2832_v37 = vld [vmem:[#allocation2 + $0x149] sm:$0xff]  ;;  %v2833_v16 = vld [vmem:[#allocation2 + $0x151] sm:$0xff]  ;;  %v2835_v32 = vld [vmem:[#allocation2 + $0x161] sm:$0xff] }
 0x327   : > { %6108 = vmatprep.mubr.msk.f32.mxu1 %vm2201_vm5, %v2741_v58  ;;  %v2834_v58 = vld [vmem:[#allocation2 + $0x159] sm:$0xff] }
 0x328   : > { %v2406_v45 = vpop.permute.xlu0 %2405  ;;  %v2790_v62 = vld [vmem:[#allocation2 + $0x178] sm:$0xff] }
 0x329   : > { %v2742_v46 = vld [vmem:[#allocation2 + $0x177] sm:$0xff]  ;;  %2504 = vst.msk [vmem:[#allocation2 + $0x190] sm:$0xff] %vm2457_vm7, %v2406_v45  ;;  %6025 = vmatmul.mubr.msk.f32.gmra.mrb[90].mxu0 %vm2201_vm5, %v2790_v62 }
 0x32a   : > { %6109 = vmatmul.mubr.msk.f32.gmra.mrb[90].mxu1 %vm2201_vm5, %v2742_v46  ;;  %v2836_v46 = vld [vmem:[#allocation2 + $0x169] sm:$0xff] }
 0x32c   : > { %v2791_v14 = vld [vmem:[#allocation2 + $0x180] sm:$0xff] }
 0x32d   : > { %v2743_v59 = vld [vmem:[#allocation2 + $0x17f] sm:$0xff]  ;;  %v2744_v15 = vld [vmem:[#allocation2 + $0x187] sm:$0xff]  ;;  %6027 = vmatprep.mubr.msk.f32.mxu0 %vm2201_vm5, %v2791_v14  ;;  %v2837_v14 = vld [vmem:[#allocation2 + $0x171] sm:$0xff] }
 0x32e   : > { %6111 = vmatprep.mubr.msk.f32.mxu1 %vm2201_vm5, %v2743_v59  ;;  %6028 = vmatmul.mubr.msk.f32.gmra.mrb[92].mxu0 %vm2201_vm5, %v2792_v2  ;;  %v2838_v59 = vld [vmem:[#allocation2 + $0x179] sm:$0xff] }
 0x32f   : > { %6112 = vmatmul.mubr.msk.f32.gmra.mrb[92].mxu1 %vm2201_vm5, %v2744_v15  ;;  %v2839_v15 = vld [vmem:[#allocation2 + $0x181] sm:$0xff] }
 0x330   : > { %v2793_v1 = vld [vmem:[#allocation2 + $0x190] sm:$0xff] }
 0x331   : > { %v2745_v51 = vld [vmem:[#allocation2 + $0x18f] sm:$0xff]  ;;  %v2746_v28 = vld [vmem:[#allocation2 + $0x197] sm:$0xff]  ;;  %6030 = vmatprep.mubr.msk.f32.mxu0 %vm2201_vm5, %v2793_v1 }
 0x332   : > { %6114 = vmatprep.mubr.msk.f32.mxu1 %vm2201_vm5, %v2745_v51  ;;  %6031 = vmatmul.mubr.msk.f32.gmra.mrb[94].mxu0 %vm2201_vm5, %v2794_v41  ;;  %v2840_v51 = vld [vmem:[#allocation2 + $0x189] sm:$0xff]  ;;  %v2842_v41 = vld [vmem:[#allocation2 + $0x199] sm:$0xff] }
 0x333   : > { %6115 = vmatmul.mubr.msk.f32.gmra.mrb[94].mxu1 %vm2201_vm5, %v2746_v28  ;;  %v2841_v28 = vld [vmem:[#allocation2 + $0x191] sm:$0xff] }
 0x334   : > { %6129 = vmatprep.mubr.msk.f32.mxu1 %vm2201_vm5, %v2795_v49 }
 0x337   : > { %6130 = vmatmul.mubr.msk.f32.vlgmr.msra.gmra.mrb[48].mxu1 %vm2201_vm5, %v2796_v22 }
 0x338   : > { %6132 = vmatprep.mubr.msk.f32.mxu1 %vm2201_vm5, %v2797_v25 }
 0x33b   : > { %6133 = vmatmul.mubr.msk.f32.gmra.mrb[50].mxu1 %vm2201_vm5, %v2798_v34 }
 0x33c   : > { %6135 = vmatprep.mubr.msk.f32.mxu1 %vm2201_vm5, %v2799_v10 }
 0x33f   : > { %6136 = vmatmul.mubr.msk.f32.gmra.mrb[52].mxu1 %vm2201_vm5, %v2800_v55 }
 0x340   : > { %6138 = vmatprep.mubr.msk.f32.mxu1 %vm2201_vm5, %v2801_v53 }
 0x343   : > { %6139 = vmatmul.mubr.msk.f32.gmra.mrb[54].mxu1 %vm2201_vm5, %v2802_v13 }
 0x344   : > { %6141 = vmatprep.mubr.msk.f32.mxu1 %vm2201_vm5, %v2803_v30 }
 0x347   : > { %6142 = vmatmul.mubr.msk.f32.gmra.mrb[56].mxu1 %vm2201_vm5, %v2804_v44 }
 0x348   : > { %6144 = vmatprep.mubr.msk.f32.mxu1 %vm2201_vm5, %v2805_v33  ;;  %v8207_v48 = vpop.f32.mrb[48].mxu0 }
 0x349   : > { %v8209_v63 = vpop.f32.mrb[49].mxu0 }
 0x34b   : > { %6145 = vmatmul.mubr.msk.f32.gmra.mrb[58].mxu1 %vm2201_vm5, %v2806_v18 }
 0x34c   : > { %6147 = vmatprep.mubr.msk.f32.mxu1 %vm2201_vm5, %v2807_v19 }
 0x34f   : > { %6148 = vmatmul.mubr.msk.f32.gmra.mrb[60].mxu1 %vm2201_vm5, %v2808_v7 }
 0x350   : > { %6150 = vmatprep.mubr.msk.f32.mxu1 %vm2201_vm5, %v2809_v24 }
 0x353   : > { %6151 = vmatmul.mubr.msk.f32.gmra.mrb[62].mxu1 %vm2201_vm5, %v2810_v26 }
 0x354   : > { %6153 = vmatprep.mubr.msk.f32.mxu1 %vm2201_vm5, %v2811_v12  ;;  %v8217_v6 = vpop.f32.mrb[50].mxu0 }
 0x355   : > { %v8219_v40 = vpop.f32.mrb[51].mxu0 }
 0x357   : > { %6154 = vmatmul.mubr.msk.f32.gmra.mrb[64].mxu1 %vm2201_vm5, %v2812_v21 }
 0x358   : > { %6156 = vmatprep.mubr.msk.f32.mxu1 %vm2201_vm5, %v2813_v61 }
 0x35b   : > { %6157 = vmatmul.mubr.msk.f32.gmra.mrb[66].mxu1 %vm2201_vm5, %v2814_v47 }
 0x35c   : > { %6159 = vmatprep.mubr.msk.f32.mxu1 %vm2201_vm5, %v2815_v50 }
 0x35f   : > { %6160 = vmatmul.mubr.msk.f32.gmra.mrb[68].mxu1 %vm2201_vm5, %v2816_v17 }
 0x360   : > { %6162 = vmatprep.mubr.msk.f32.mxu1 %vm2201_vm5, %v2817_v38  ;;  %v8227_v57 = vpop.f32.mrb[52].mxu0 }
 0x361   : > { %v8229_v56 = vpop.f32.mrb[53].mxu0 }
 0x363   : > { %6163 = vmatmul.mubr.msk.f32.gmra.mrb[70].mxu1 %vm2201_vm5, %v2818_v42 }
 0x364   : > { %6165 = vmatprep.mubr.msk.f32.mxu1 %vm2201_vm5, %v2819_v11 }
 0x367   : > { %6166 = vmatmul.mubr.msk.f32.gmra.mrb[72].mxu1 %vm2201_vm5, %v2820_v54 }
 0x368   : > { %6168 = vmatprep.mubr.msk.f32.mxu1 %vm2201_vm5, %v2821_v0 }
 0x36b   : > { %6169 = vmatmul.mubr.msk.f32.gmra.mrb[74].mxu1 %vm2201_vm5, %v2822_v39 }
 0x36c   : > { %6171 = vmatprep.mubr.msk.f32.mxu1 %vm2201_vm5, %v2823_v43  ;;  %v8237_v60 = vpop.f32.mrb[54].mxu0 }
 0x36d   : > { %v8239_v36 = vpop.f32.mrb[55].mxu0 }
 0x36f   : > { %6172 = vmatmul.mubr.msk.f32.gmra.mrb[76].mxu1 %vm2201_vm5, %v2824_v52  ;;  %v8333_v52 = vld [vmem:[%s8957_s9] sm:$0xff] }
 0x370   : > { %6174 = vmatprep.mubr.msk.f32.mxu1 %vm2201_vm5, %v2825_v5  ;;  %8967 = vst [vmem:[#allocation5_spill] sm:$0xff] %v8333_v52  ;;  %5767 = vmatprep.mubr.msk.f32.mxu0 %vm2216_vm6, %v8333_v52 }
 0x373   : > { %6175 = vmatmul.mubr.msk.f32.gmra.mrb[78].mxu1 %vm2201_vm5, %v2826_v8 }
 0x374   : > { %6177 = vmatprep.mubr.msk.f32.mxu1 %vm2201_vm5, %v2827_v3 }
 0x377   : > { %6178 = vmatmul.mubr.msk.f32.gmra.mrb[80].mxu1 %vm2201_vm5, %v2828_v23 }
 0x378   : > { %6180 = vmatprep.mubr.msk.f32.mxu1 %vm2201_vm5, %v2829_v35 }
 0x37b   : > { %6181 = vmatmul.mubr.msk.f32.gmra.mrb[82].mxu1 %vm2201_vm5, %v2830_v4 }
 0x37c   : > { %6183 = vmatprep.mubr.msk.f32.mxu1 %vm2201_vm5, %v2831_v9  ;;  %v8249_v29 = vpop.f32.mrb[56].mxu0  ;;  %v8350_v9 = vld [vmem:[%s8956_s8] ss:$0 sm:$0xff] }
 0x37d   : > { %v8251_v31 = vpop.f32.mrb[57].mxu0 }
 0x37f   : > { %6184 = vmatmul.mubr.msk.f32.gmra.mrb[84].mxu1 %vm2201_vm5, %v2832_v37 }
 0x380   : > { %6186 = vmatprep.mubr.msk.f32.mxu1 %vm2201_vm5, %v2833_v16 }
 0x383   : > { %6187 = vmatmul.mubr.msk.f32.gmra.mrb[86].mxu1 %vm2201_vm5, %v2834_v58 }
 0x384   : > { %6189 = vmatprep.mubr.msk.f32.mxu1 %vm2201_vm5, %v2835_v32  ;;  %v8257_v45 = vpop.f32.mrb[58].mxu0 }
 0x385   : > { %v8259_v62 = vpop.f32.mrb[59].mxu0 }
 0x387   : > { %6190 = vmatmul.mubr.msk.f32.gmra.mrb[88].mxu1 %vm2201_vm5, %v2836_v46 }
 0x388   : > { %6192 = vmatprep.mubr.msk.f32.mxu1 %vm2201_vm5, %v2837_v14 }
 0x38b   : > { %6193 = vmatmul.mubr.msk.f32.gmra.mrb[90].mxu1 %vm2201_vm5, %v2838_v59 }
 0x38c   : > { %6195 = vmatprep.mubr.msk.f32.mxu1 %vm2201_vm5, %v2839_v15  ;;  %v8265_v2 = vpop.f32.mrb[60].mxu0 }
 0x38d   : > { %v8267_v1 = vpop.f32.mrb[61].mxu0 }
 0x38f   : > { %6196 = vmatmul.mubr.msk.f32.gmra.mrb[92].mxu1 %vm2201_vm5, %v2840_v51 }
 0x390   : > { %6198 = vmatprep.mubr.msk.f32.mxu1 %vm2201_vm5, %v2841_v28 }
 0x393   : > { %6199 = vmatmul.mubr.msk.f32.gmra.mrb[94].mxu1 %vm2201_vm5, %v2842_v41 }
 0x394   : > { %v8272_v49 = vpop.f32.mrb[62].mxu0 }
 0x395   : > { %v8274_v22 = vpop.f32.mrb[63].mxu0 }
 0x39c   : > { %v8276_v25 = vpop.f32.mrb[64].mxu0 }
 0x39d   : > { %v8278_v34 = vpop.f32.mrb[65].mxu0 }
 0x3a4   : > { %v8280_v10 = vpop.f32.mrb[66].mxu0 }
 0x3a5   : > { %v8282_v55 = vpop.f32.mrb[67].mxu0 }
 0x3ac   : > { %v8284_v53 = vpop.f32.mrb[68].mxu0 }
 0x3ad   : > { %v8286_v13 = vpop.f32.mrb[69].mxu0 }
 0x3b4   : > { %v8288_v30 = vpop.f32.mrb[70].mxu0 }
 0x3b5   : > { %v8290_v44 = vpop.f32.mrb[71].mxu0 }
 0x3bc   : > { %v8292_v33 = vpop.f32.mrb[72].mxu0 }
 0x3bd   : > { %v8294_v18 = vpop.f32.mrb[73].mxu0 }
 0x3c4   : > { %v8296_v19 = vpop.f32.mrb[74].mxu0 }
 0x3c5   : > { %v8298_v7 = vpop.f32.mrb[75].mxu0 }
 0x3cc   : > { %v8300_v24 = vpop.f32.mrb[76].mxu0 }
 0x3cd   : > { %v8302_v26 = vpop.f32.mrb[77].mxu0 }
 0x3d4   : > { %v8304_v12 = vpop.f32.mrb[78].mxu0 }
 0x3d5   : > { %v8306_v21 = vpop.f32.mrb[79].mxu0 }
 0x3dc   : > { %v8308_v61 = vpop.f32.mrb[80].mxu0 }
 0x3dd   : > { %v8310_v47 = vpop.f32.mrb[81].mxu0 }
 0x3e4   : > { %v8312_v50 = vpop.f32.mrb[82].mxu0 }
 0x3e5   : > { %v8314_v17 = vpop.f32.mrb[83].mxu0 }
 0x3ec   : > { %v8316_v38 = vpop.f32.mrb[84].mxu0 }
 0x3ed   : > { %v8318_v42 = vpop.f32.mrb[85].mxu0 }
 0x3f4   : > { %v8320_v11 = vpop.f32.mrb[86].mxu0 }
 0x3f5   : > { %v8322_v54 = vpop.f32.mrb[87].mxu0 }
 0x3f8   : > { %v8324_v0 = vpop.f32.mrb[88].mxu0 }
 0x3f9   : > { %v8326_v39 = vpop.f32.mrb[89].mxu0 }
 0x3fc   : > { %v8328_v43 = vpop.f32.mrb[90].mxu0 }
 0x3fd   : > { %v8335_v5 = vpop.f32.mrb[91].mxu0 }
 0x401   : > { %v8339_v8 = vpop.f32.mrb[92].mxu0 }
 0x402   : > { %v8341_v3 = vpop.f32.mrb[93].mxu0 }
 0x405   : > { %v8343_v23 = vpop.f32.mrb[94].mxu0 }
 0x406   : > { %v8345_v35 = vpop.f32.mrb[95].mxu0 }
 0x407   : > { %8968 = vst [vmem:[#allocation6_spill] sm:$0xff] %v8345_v35 }
 0x40a   : > { %v6131_v4 = vpop.f32.mrb[48].mxu1 }
 0x40b   : > { %v6381_v37 = vadd.f32 %v6131_v4, %v8207_v48  ;;  %v3971_v16 = vpop.f32.mrb[49].mxu1 }
 0x40c   : > { %v6382_v58 = vadd.f32 %v3971_v16, %v8209_v63 }
 0x40d   : > { %v4266_v32 = vadd.f32 %v6381_v37, %v8350_v9 }
 0x40e   : > { %v4265_v46 = vadd.f32 %v6382_v58, %v8350_v9  ;;  %v6134_v14 = vpop.f32.mrb[50].mxu1 }
 0x40f   : > { %v4362_v59 = vmul.f32 0.70710677, %v4266_v32  ;;  %v6383_v15 = vadd.f32 %v6134_v14, %v8217_v6  ;;  %v3981_v51 = vpop.f32.mrb[51].mxu1  ;;  %v4314_v52 = vmul.f32 0.5, %v4266_v32 }
 0x410   : > { %v4361_v28 = vmul.f32 0.70710677, %v4265_v46  ;;  %v6384_v41 = vadd.f32 %v3981_v51, %v8219_v40 }
 0x411   : > { %6686 = verf.f32 %v4362_v59  ;;  %v4268_v20 = vadd.f32 %v6383_v15, %v8350_v9 }
 0x412   : > { %6688 = verf.f32 %v4361_v28  ;;  %v4267_v48 = vadd.f32 %v6384_v41, %v8350_v9  ;;  %v6137_v4 = vpop.f32.mrb[52].mxu1 }
 0x413   : > { %v4364_v63 = vmul.f32 0.70710677, %v4268_v20  ;;  %v6385_v37 = vadd.f32 %v6137_v4, %v8227_v57  ;;  %v3991_v16 = vpop.f32.mrb[53].mxu1 }
 0x414   : > { %v4363_v58 = vmul.f32 0.70710677, %v4267_v48  ;;  %v6386_v27 = vadd.f32 %v3991_v16, %v8229_v56 }
 0x415   : > { %6690 = verf.f32 %v4364_v63  ;;  %v4270_v6 = vadd.f32 %v6385_v37, %v8350_v9 }
 0x416   : > { %6692 = verf.f32 %v4363_v58  ;;  %v4269_v40 = vadd.f32 %v6386_v27, %v8350_v9  ;;  %v6140_v14 = vpop.f32.mrb[54].mxu1 }
 0x417   : > { %v4366_v59 = vmul.f32 0.70710677, %v4270_v6  ;;  %v6387_v15 = vadd.f32 %v6140_v14, %v8237_v60  ;;  %v4001_v51 = vpop.f32.mrb[55].mxu1 }
 0x418   : > { %v4365_v28 = vmul.f32 0.70710677, %v4269_v40  ;;  %v6388_v41 = vadd.f32 %v4001_v51, %v8239_v36 }
 0x419   : > { %6694 = verf.f32 %v4366_v59  ;;  %v4272_v57 = vadd.f32 %v6387_v15, %v8350_v9  ;;  %v4313_v59 = vmul.f32 0.5, %v4265_v46 }
 0x41a   : > { %6696 = verf.f32 %v4365_v28  ;;  %v8368_v56 = vadd.f32 %v6388_v41, %v8350_v9  ;;  %v6143_v4 = vpop.f32.mrb[56].mxu1 }
 0x41b   : > { %v6687_v63 = vpop.eup %6686  ;;  %v4368_v37 = vmul.f32 0.70710677, %v4272_v57  ;;  %v6389_v27 = vadd.f32 %v6143_v4, %v8249_v29  ;;  %v4011_v16 = vpop.f32.mrb[57].mxu1 }
 0x41c   : > { %v6689_v58 = vpop.eup %6688  ;;  %v4458_v60 = vadd.f32 1.0, %v6687_v63  ;;  %v4367_v14 = vmul.f32 0.70710677, %v8368_v56  ;;  %v6390_v36 = vadd.f32 %v4011_v16, %v8251_v31  ;;  %v4316_v63 = vmul.f32 0.5, %v4268_v20 }
 0x41d   : > { %v4457_v51 = vadd.f32 1.0, %v6689_v58  ;;  %6698 = verf.f32 %v4368_v37  ;;  %v8374_v15 = vadd.f32 %v6389_v27, %v8350_v9  ;;  %v4315_v27 = vmul.f32 0.5, %v4267_v48 }
 0x41e   : > { %v8376_v28 = vmul.f32 %v4458_v60, %v4314_v52  ;;  %6700 = verf.f32 %v4367_v14  ;;  %v8379_v41 = vadd.f32 %v6390_v36, %v8350_v9  ;;  %v6146_v29 = vpop.f32.mrb[58].mxu1 }
 0x41f   : > { %v6691_v4 = vpop.eup %6690  ;;  %v8381_v32 = vmul.f32 %v4457_v51, %v4313_v59  ;;  %v4370_v35 = vmul.f32 0.70710677, %v8374_v15  ;;  %v6391_v31 = vadd.f32 %v6146_v29, %v8257_v45  ;;  %v4021_v46 = vpop.f32.mrb[59].mxu1  ;;  %v4318_v29 = vmul.f32 0.5, %v4270_v6 }
 0x420   : > { %v6693_v37 = vpop.eup %6692  ;;  %v4460_v16 = vadd.f32 1.0, %v6691_v4  ;;  %v4369_v52 = vmul.f32 0.70710677, %v8379_v41  ;;  %v6392_v58 = vadd.f32 %v4021_v46, %v8259_v62 }
 0x421   : > { %v4459_v14 = vadd.f32 1.0, %v6693_v37  ;;  %6702 = verf.f32 %v4370_v35  ;;  %v8390_v36 = vadd.f32 %v6391_v31, %v8350_v9  ;;  %v4317_v31 = vmul.f32 0.5, %v4269_v40 }
 0x422   : > { %v8392_v20 = vmul.f32 %v4460_v16, %v4316_v63  ;;  %6704 = verf.f32 %v4369_v52  ;;  %v8395_v45 = vadd.f32 %v6392_v58, %v8350_v9  ;;  %v6149_v59 = vpop.f32.mrb[60].mxu1 }
 0x423   : > { %v6695_v48 = vpop.eup %6694  ;;  %v8397_v51 = vmul.f32 %v4459_v14, %v4315_v27  ;;  %v4372_v62 = vmul.f32 0.70710677, %v8390_v36  ;;  %v6393_v4 = vadd.f32 %v6149_v59, %v8265_v2  ;;  %v4031_v46 = vpop.f32.mrb[61].mxu1 }
 0x424   : > { %v6697_v35 = vpop.eup %6696  ;;  %v4462_v37 = vadd.f32 1.0, %v6695_v48  ;;  %v4371_v63 = vmul.f32 0.70710677, %v8395_v45  ;;  %v6394_v16 = vadd.f32 %v4031_v46, %v8267_v1  ;;  %v4320_v48 = vmul.f32 0.5, %v4272_v57 }
 0x425   : > { %v4461_v58 = vadd.f32 1.0, %v6697_v35  ;;  %6706 = verf.f32 %v4372_v62  ;;  %v8406_v27 = vadd.f32 %v6393_v4, %v8350_v9  ;;  %v4319_v4 = vmul.f32 0.5, %v8368_v56 }
 0x426   : > { %v8408_v6 = vmul.f32 %v4462_v37, %v4318_v29  ;;  %6708 = verf.f32 %v4371_v63  ;;  %v8411_v2 = vadd.f32 %v6394_v16, %v8350_v9  ;;  %v6152_v14 = vpop.f32.mrb[62].mxu1 }
 0x427   : > { %v6699_v40 = vpop.eup %6698  ;;  %v8413_v59 = vmul.f32 %v4461_v58, %v4317_v31  ;;  %v4374_v1 = vmul.f32 0.70710677, %v8406_v27  ;;  %v6395_v46 = vadd.f32 %v6152_v14, %v8272_v49  ;;  %v4041_v35 = vpop.f32.mrb[63].mxu1 }
 0x428   : > { %v6701_v62 = vpop.eup %6700  ;;  %v4464_v52 = vadd.f32 1.0, %v6699_v40  ;;  %v4373_v29 = vmul.f32 0.70710677, %v8411_v2  ;;  %v6396_v37 = vadd.f32 %v4041_v35, %v8274_v22  ;;  %v4322_v22 = vmul.f32 0.5, %v8374_v15 }
 0x429   : > { %v4463_v16 = vadd.f32 1.0, %v6701_v62  ;;  %6710 = verf.f32 %v4374_v1  ;;  %v8423_v57 = vadd.f32 %v6395_v46, %v8350_v9 }
 0x42a   : > { %v8425_v31 = vmul.f32 %v4464_v52, %v4320_v48  ;;  %6712 = verf.f32 %v4373_v29  ;;  %v8428_v49 = vadd.f32 %v6396_v37, %v8350_v9  ;;  %v6155_v58 = vpop.f32.mrb[64].mxu1  ;;  %v4321_v52 = vmul.f32 0.5, %v8379_v41 }
 0x42b   : > { %v6703_v56 = vpop.eup %6702  ;;  %v8430_v14 = vmul.f32 %v4463_v16, %v4319_v4  ;;  %v4376_v40 = vmul.f32 0.70710677, %v8423_v57  ;;  %v6397_v35 = vadd.f32 %v6155_v58, %v8276_v25  ;;  %v4051_v1 = vpop.f32.mrb[65].mxu1 }
 0x42c   : > { %v6705_v62 = vpop.eup %6704  ;;  %v4466_v46 = vadd.f32 1.0, %v6703_v56  ;;  %v4375_v48 = vmul.f32 0.70710677, %v8428_v49  ;;  %v6398_v29 = vadd.f32 %v4051_v1, %v8278_v34  ;;  %v4324_v34 = vmul.f32 0.5, %v8390_v36 }
 0x42d   : > { %v4465_v4 = vadd.f32 1.0, %v6705_v62  ;;  %6714 = verf.f32 %v4376_v40  ;;  %v8441_v15 = vadd.f32 %v6397_v35, %v8350_v9 }
 0x42e   : > { %v8443_v16 = vmul.f32 %v4466_v46, %v4322_v22  ;;  %6716 = verf.f32 %v4375_v48  ;;  %v8446_v25 = vadd.f32 %v6398_v29, %v8350_v9  ;;  %v6158_v58 = vpop.f32.mrb[66].mxu1  ;;  %v4323_v22 = vmul.f32 0.5, %v8395_v45 }
 0x42f   : > { %v6707_v41 = vpop.eup %6706  ;;  %v8448_v56 = vmul.f32 %v4465_v4, %v4321_v52  ;;  %v4378_v1 = vmul.f32 0.70710677, %v8441_v15  ;;  %v6399_v62 = vadd.f32 %v6158_v58, %v8280_v10  ;;  %v4061_v40 = vpop.f32.mrb[67].mxu1 }
 0x430   : > { %v6709_v37 = vpop.eup %6708  ;;  %v4468_v35 = vadd.f32 1.0, %v6707_v41  ;;  %v4377_v46 = vmul.f32 0.70710677, %v8446_v25  ;;  %v6400_v48 = vadd.f32 %v4061_v40, %v8282_v55  ;;  %v4326_v55 = vmul.f32 0.5, %v8406_v27 }
 0x431   : > { %v4467_v52 = vadd.f32 1.0, %v6709_v37  ;;  %6718 = verf.f32 %v4378_v1  ;;  %v8459_v36 = vadd.f32 %v6399_v62, %v8350_v9 }
 0x432   : > { %v8461_v4 = vmul.f32 %v4468_v35, %v4324_v34  ;;  %6720 = verf.f32 %v4377_v46  ;;  %v8464_v10 = vadd.f32 %v6400_v48, %v8350_v9  ;;  %v6161_v58 = vpop.f32.mrb[68].mxu1  ;;  %v4325_v34 = vmul.f32 0.5, %v8411_v2 }
 0x433   : > { %v6711_v45 = vpop.eup %6710  ;;  %v8466_v41 = vmul.f32 %v4467_v52, %v4323_v22  ;;  %v4380_v40 = vmul.f32 0.70710677, %v8459_v36  ;;  %v6401_v37 = vadd.f32 %v6161_v58, %v8284_v53  ;;  %v4071_v1 = vpop.f32.mrb[69].mxu1  ;;  %v4332_v63 = vmul.f32 0.5, %v8459_v36 }
 0x434   : > { %v6713_v29 = vpop.eup %6712  ;;  %v4470_v62 = vadd.f32 1.0, %v6711_v45  ;;  %v4379_v35 = vmul.f32 0.70710677, %v8464_v10  ;;  %v6402_v46 = vadd.f32 %v4071_v1, %v8286_v13  ;;  %v4328_v13 = vmul.f32 0.5, %v8423_v57 }
 0x435   : > { %v4469_v22 = vadd.f32 1.0, %v6713_v29  ;;  %6722 = verf.f32 %v4380_v40  ;;  %v8477_v27 = vadd.f32 %v6401_v37, %v8350_v9 }
 0x436   : > { %v8479_v52 = vmul.f32 %v4470_v62, %v4326_v55  ;;  %6724 = verf.f32 %v4379_v35  ;;  %v8482_v53 = vadd.f32 %v6402_v46, %v8350_v9  ;;  %v6164_v58 = vpop.f32.mrb[70].mxu1  ;;  %v4327_v55 = vmul.f32 0.5, %v8428_v49 }
 0x437   : > { %v6715_v2 = vpop.eup %6714  ;;  %v8484_v45 = vmul.f32 %v4469_v22, %v4325_v34  ;;  %v4382_v1 = vmul.f32 0.70710677, %v8477_v27  ;;  %v6403_v29 = vadd.f32 %v6164_v58, %v8288_v30  ;;  %v4081_v40 = vpop.f32.mrb[71].mxu1 }
 0x438   : > { %v6717_v48 = vpop.eup %6716  ;;  %v4472_v37 = vadd.f32 1.0, %v6715_v2  ;;  %v4381_v62 = vmul.f32 0.70710677, %v8482_v53  ;;  %v6404_v35 = vadd.f32 %v4081_v40, %v8290_v44  ;;  %v4330_v44 = vmul.f32 0.5, %v8441_v15 }
 0x439   : > { %v4471_v34 = vadd.f32 1.0, %v6717_v48  ;;  %6726 = verf.f32 %v4382_v1  ;;  %v8495_v57 = vadd.f32 %v6403_v29, %v8350_v9 }
 0x43a   : > { %v8497_v22 = vmul.f32 %v4472_v37, %v4328_v13  ;;  %6728 = verf.f32 %v4381_v62  ;;  %v8500_v30 = vadd.f32 %v6404_v35, %v8350_v9  ;;  %v6167_v58 = vpop.f32.mrb[72].mxu1  ;;  %v4329_v13 = vmul.f32 0.5, %v8446_v25 }
 0x43b   : > { %v6719_v49 = vpop.eup %6718  ;;  %v8502_v2 = vmul.f32 %v4471_v34, %v4327_v55  ;;  %v4384_v40 = vmul.f32 0.70710677, %v8495_v57  ;;  %v6405_v48 = vadd.f32 %v6167_v58, %v8292_v33  ;;  %v4091_v1 = vpop.f32.mrb[73].mxu1 }
 0x43c   : > { %v6721_v46 = vpop.eup %6720  ;;  %v4474_v29 = vadd.f32 1.0, %v6719_v49  ;;  %v4383_v37 = vmul.f32 0.70710677, %v8500_v30  ;;  %v6406_v62 = vadd.f32 %v4091_v1, %v8294_v18 }
 0x43d   : > { %v4473_v55 = vadd.f32 1.0, %v6721_v46  ;;  %6730 = verf.f32 %v4384_v40  ;;  %v8513_v15 = vadd.f32 %v6405_v48, %v8350_v9  ;;  %v4331_v48 = vmul.f32 0.5, %v8464_v10 }
 0x43e   : > { %v4522_v34 = vmul.f32 %v4474_v29, %v4330_v44  ;;  %6732 = verf.f32 %v4383_v37  ;;  %v8516_v33 = vadd.f32 %v6406_v62, %v8350_v9  ;;  %v6170_v58 = vpop.f32.mrb[74].mxu1 }
 0x43f   : > { %v6723_v49 = vpop.eup %6722  ;;  %v4521_v25 = vmul.f32 %v4473_v55, %v4329_v13  ;;  %v4386_v18 = vmul.f32 0.70710677, %v8513_v15  ;;  %v6407_v1 = vadd.f32 %v6170_v58, %v8296_v19  ;;  %v4101_v35 = vpop.f32.mrb[75].mxu1 }
 0x440   : > { %v6725_v46 = vpop.eup %6724  ;;  %v4476_v40 = vadd.f32 1.0, %v6723_v49  ;;  %v4385_v44 = vmul.f32 0.70710677, %v8516_v33  ;;  %v6408_v29 = vadd.f32 %v4101_v35, %v8298_v7  ;;  %v4334_v35 = vmul.f32 0.5, %v8477_v27 }
 0x441   : > { %v4475_v36 = vadd.f32 1.0, %v6725_v46  ;;  %6734 = verf.f32 %v4386_v18  ;;  %v8531_v13 = vadd.f32 %v6407_v1, %v8350_v9  ;;  %v6285_v19 = vpack.c.bf16 %v4522_v34, %v4521_v25 }
 0x442   : > { %v4524_v62 = vmul.f32 %v4476_v40, %v4332_v63  ;;  %6736 = verf.f32 %v4385_v44  ;;  %v8534_v10 = vadd.f32 %v6408_v29, %v8350_v9  ;;  %v6173_v55 = vpop.f32.mrb[76].mxu1  ;;  %v4333_v63 = vmul.f32 0.5, %v8482_v53 }
 0x443   : > { %v6727_v58 = vpop.eup %6726  ;;  %v4523_v7 = vmul.f32 %v4475_v36, %v4331_v48  ;;  %v4388_v49 = vmul.f32 0.70710677, %v8531_v13  ;;  %v6409_v60 = vadd.f32 %v6173_v55, %v8300_v24  ;;  %v4111_v46 = vpop.f32.mrb[77].mxu1  ;;  %6287 = vmatprep.subr.msk.bf16.mxu0 %vm8526_vm9, %v6285_v19  ;;  %v8971_v40 = vpack.c.bf16 %v8376_v28, %v8381_v32 }
 0x444   : > { %v6729_v18 = vpop.eup %6728  ;;  %v4478_v34 = vadd.f32 1.0, %v6727_v58  ;;  %v4387_v25 = vmul.f32 0.70710677, %v8534_v10  ;;  %v6410_v1 = vadd.f32 %v4111_v46, %v8302_v26  ;;  %v4336_v19 = vmul.f32 0.5, %v8495_v57 }
 0x445   : > { %6290 = vmatpush3.bf16.xpose.msk.msra.mxu0 %vm8526_vm9, %v8971_v40  ;;  %v4477_v27 = vadd.f32 1.0, %v6729_v18  ;;  %6738 = verf.f32 %v4388_v49  ;;  %v8550_v24 = vadd.f32 %v6409_v60, %v8350_v9  ;;  %v6291_v48 = vpack.c.bf16 %v4524_v62, %v4523_v7 }
 0x446   : > { %v4526_v44 = vmul.f32 %v4478_v34, %v4334_v35  ;;  %6740 = verf.f32 %v4387_v25  ;;  %v8553_v53 = vadd.f32 %v6410_v1, %v8350_v9  ;;  %v6176_v29 = vpop.f32.mrb[78].mxu1  ;;  %v4335_v58 = vmul.f32 0.5, %v8500_v30 }
 0x447   : > { %v6731_v36 = vpop.eup %6730  ;;  %v4525_v26 = vmul.f32 %v4477_v27, %v4333_v63  ;;  %v4390_v28 = vmul.f32 0.70710677, %v8550_v24  ;;  %v6411_v32 = vadd.f32 %v6176_v29, %v8304_v12  ;;  %v4121_v55 = vpop.f32.mrb[79].mxu1  ;;  %6293 = vmatprep.subr.msk.bf16.mxu0 %vm8526_vm9, %v6291_v48  ;;  %v4338_v30 = vmul.f32 0.5, %v8513_v15 }
 0x448   : > { %v6733_v60 = vpop.eup %6732  ;;  %v4480_v62 = vadd.f32 1.0, %v6731_v36  ;;  %v4389_v7 = vmul.f32 0.70710677, %v8553_v53  ;;  %v6412_v35 = vadd.f32 %v4121_v55, %v8306_v21  ;;  %v4337_v29 = vmul.f32 0.5, %v8516_v33 }
 0x449   : > { %v4479_v49 = vadd.f32 1.0, %v6733_v60  ;;  %6742 = verf.f32 %v4390_v28  ;;  %v8564_v57 = vadd.f32 %v6411_v32, %v8350_v9  ;;  %v6297_v46 = vpack.c.bf16 %v4526_v44, %v4525_v26 }
 0x44a   : > { %v4528_v18 = vmul.f32 %v4480_v62, %v4336_v19  ;;  %6744 = verf.f32 %v4389_v7  ;;  %v8567_v12 = vadd.f32 %v6412_v35, %v8350_v9  ;;  %v6179_v34 = vpop.f32.mrb[80].mxu1  ;;  %v8972_v26 = vpack.c.bf16 %v8392_v20, %v8397_v51 }
 0x44b   : > { %v6735_v63 = vpop.eup %6734  ;;  %v4527_v25 = vmul.f32 %v4479_v49, %v4335_v58  ;;  %v4392_v1 = vmul.f32 0.70710677, %v8564_v57  ;;  %v6413_v21 = vadd.f32 %v6179_v34, %v8308_v61  ;;  %v4131_v40 = vpop.f32.mrb[81].mxu1  ;;  %v4340_v32 = vmul.f32 0.5, %v8531_v13 }
 0x44c   : > { %v6737_v27 = vpop.eup %6736  ;;  %v4482_v48 = vadd.f32 1.0, %v6735_v63  ;;  %v4391_v44 = vmul.f32 0.70710677, %v8567_v12  ;;  %v6414_v36 = vadd.f32 %v4131_v40, %v8310_v47  ;;  %v4339_v35 = vmul.f32 0.5, %v8534_v10 }
 0x44d   : > { %6296 = vmatpush3.bf16.xpose.msk.msra.mxu0 %vm8526_vm9, %v8972_v26  ;;  %v4481_v15 = vadd.f32 1.0, %v6737_v27  ;;  %6746 = verf.f32 %v4392_v1  ;;  %v8581_v19 = vadd.f32 %v6413_v21, %v8350_v9  ;;  %v6303_v61 = vpack.c.bf16 %v4528_v18, %v4527_v25 }
 0x44e   : > { %6299 = vmatprep.subr.msk.bf16.mxu0 %vm8526_vm9, %v6297_v46  ;;  %v8585_v33 = vmul.f32 %v4482_v48, %v4338_v30  ;;  %6748 = verf.f32 %v4391_v44  ;;  %v8588_v47 = vadd.f32 %v6414_v36, %v8350_v9  ;;  %v6182_v28 = vpop.f32.mrb[82].mxu1  ;;  %v8973_v26 = vpack.c.bf16 %v8408_v6, %v8413_v59 }
 0x44f   : > { %v6739_v20 = vpop.eup %6738  ;;  %v8590_v51 = vmul.f32 %v4481_v15, %v4337_v29  ;;  %v4394_v55 = vmul.f32 0.70710677, %v8581_v19  ;;  %v6415_v60 = vadd.f32 %v6182_v28, %v8312_v50  ;;  %v4141_v62 = vpop.f32.mrb[83].mxu1  ;;  %v4341_v29 = vmul.f32 0.5, %v8553_v53 }
 0x450   : > { %v6741_v58 = vpop.eup %6740  ;;  %v4484_v7 = vadd.f32 1.0, %v6739_v20  ;;  %v4393_v49 = vmul.f32 0.70710677, %v8588_v47  ;;  %v6416_v46 = vadd.f32 %v4141_v62, %v8314_v17  ;;  %v4342_v17 = vmul.f32 0.5, %v8550_v24 }
 0x451   : > { %v4483_v18 = vadd.f32 1.0, %v6741_v58  ;;  %6750 = verf.f32 %v4394_v55  ;;  %v8599_v34 = vadd.f32 %v6415_v60, %v8350_v9  ;;  %v6309_v13 = vpack.c.bf16 %v8585_v33, %v8590_v51 }
 0x452   : > { %v8603_v63 = vmul.f32 %v4484_v7, %v4340_v32  ;;  %6752 = verf.f32 %v4393_v49  ;;  %v8606_v50 = vadd.f32 %v6416_v46, %v8350_v9  ;;  %v6185_v25 = vpop.f32.mrb[84].mxu1  ;;  %v4344_v28 = vmul.f32 0.5, %v8564_v57 }
 0x453   : > { %v6743_v10 = vpop.eup %6742  ;;  %v8608_v30 = vmul.f32 %v4483_v18, %v4339_v35  ;;  %v4396_v1 = vmul.f32 0.70710677, %v8599_v34  ;;  %v6417_v21 = vadd.f32 %v6185_v25, %v8316_v38  ;;  %v4151_v40 = vpop.f32.mrb[85].mxu1  ;;  %v4343_v60 = vmul.f32 0.5, %v8567_v12 }
 0x454   : > { %v6745_v27 = vpop.eup %6744  ;;  %v4486_v48 = vadd.f32 1.0, %v6743_v10  ;;  %v4395_v44 = vmul.f32 0.70710677, %v8606_v50  ;;  %v6418_v36 = vadd.f32 %v4151_v40, %v8318_v42  ;;  %v4345_v40 = vmul.f32 0.5, %v8588_v47 }
 0x455   : > { %6302 = vmatpush3.bf16.xpose.msk.msra.mxu0 %vm8526_vm9, %v8973_v26  ;;  %v4485_v24 = vadd.f32 1.0, %v6745_v27  ;;  %6754 = verf.f32 %v4396_v1  ;;  %v8622_v15 = vadd.f32 %v6417_v21, %v8350_v9  ;;  %v6315_v38 = vpack.c.bf16 %v8603_v63, %v8608_v30 }
 0x456   : > { %6305 = vmatprep.subr.msk.bf16.mxu0 %vm8526_vm9, %v6303_v61  ;;  %v8628_v53 = vmul.f32 %v4486_v48, %v4342_v17  ;;  %6756 = verf.f32 %v4395_v44  ;;  %v8631_v42 = vadd.f32 %v6418_v36, %v8350_v9  ;;  %v6188_v6 = vpop.f32.mrb[86].mxu1  ;;  %v4348_v26 = vmul.f32 0.5, %v8599_v34 }
 0x457   : > { %v6747_v59 = vpop.eup %6746  ;;  %v8633_v33 = vmul.f32 %v4485_v24, %v4341_v29  ;;  %v4398_v20 = vmul.f32 0.70710677, %v8622_v15  ;;  %v6419_v51 = vadd.f32 %v6188_v6, %v8320_v11  ;;  %v4161_v61 = vpop.f32.mrb[87].mxu1  ;;  %v8974_v29 = vpack.c.bf16 %v8425_v31, %v8430_v14 }
 0x458   : > { %v6749_v32 = vpop.eup %6748  ;;  %v4488_v55 = vadd.f32 1.0, %v6747_v59  ;;  %v4397_v62 = vmul.f32 0.70710677, %v8631_v42  ;;  %v6420_v58 = vadd.f32 %v4161_v61, %v8322_v54  ;;  %v4346_v54 = vmul.f32 0.5, %v8581_v19 }
 0x459   : > { %v4487_v7 = vadd.f32 1.0, %v6749_v32  ;;  %6758 = verf.f32 %v4398_v20  ;;  %v8642_v35 = vadd.f32 %v6419_v51, %v8350_v9  ;;  %v6321_v57 = vpack.c.bf16 %v8628_v53, %v8633_v33 }
 0x45a   : > { %v8646_v49 = vmul.f32 %v4488_v55, %v4344_v28  ;;  %6760 = verf.f32 %v4397_v62  ;;  %v8649_v11 = vadd.f32 %v6420_v58, %v8350_v9  ;;  %v6191_v46 = vpop.f32.mrb[88].mxu1  ;;  %v4347_v20 = vmul.f32 0.5, %v8606_v50 }
 0x45b   : > { %v6751_v12 = vpop.eup %6750  ;;  %v8651_v18 = vmul.f32 %v4487_v7, %v4343_v60  ;;  %v4400_v25 = vmul.f32 0.70710677, %v8642_v35  ;;  %v6421_v10 = vadd.f32 %v6191_v46, %v8324_v0  ;;  %v4171_v17 = vpop.f32.mrb[89].mxu1  ;;  %v4350_v46 = vmul.f32 0.5, %v8622_v15 }
 0x45c   : > { %v6753_v1 = vpop.eup %6752  ;;  %v4490_v21 = vadd.f32 1.0, %v6751_v12  ;;  %v4399_v27 = vmul.f32 0.70710677, %v8649_v11  ;;  %v6422_v48 = vadd.f32 %v4171_v17, %v8326_v39  ;;  %v4351_v30 = vmul.f32 0.5, %v8649_v11 }
 0x45d   : > { %6308 = vmatpush3.bf16.xpose.msk.msra.mxu0 %vm8526_vm9, %v8974_v29  ;;  %v4489_v19 = vadd.f32 1.0, %v6753_v1  ;;  %6762 = verf.f32 %v4400_v25  ;;  %v8665_v44 = vadd.f32 %v6421_v10, %v8350_v9  ;;  %v6327_v0 = vpack.c.bf16 %v8646_v49, %v8651_v18  ;;  %v4554_v18 = vld [vmem:[%s8957_s9 + $0x8] sm:$0xff] }
 0x45e   : > { %6311 = vmatprep.subr.msk.bf16.mxu0 %vm8526_vm9, %v6309_v13  ;;  %v4538_v47 = vmul.f32 %v4490_v21, %v4346_v54  ;;  %6764 = verf.f32 %v4399_v27  ;;  %v8672_v39 = vadd.f32 %v6422_v48, %v8350_v9  ;;  %v6194_v31 = vpop.f32.mrb[90].mxu1  ;;  %v4349_v10 = vmul.f32 0.5, %v8631_v42 }
 0x45f   : > { %v6755_v14 = vpop.eup %6754  ;;  %v4537_v36 = vmul.f32 %v4489_v19, %v4345_v40  ;;  %v4402_v24 = vmul.f32 0.70710677, %v8665_v44  ;;  %v6423_v6 = vadd.f32 %v6194_v31, %v8328_v43  ;;  %v4181_v59 = vpop.f32.mrb[91].mxu1  ;;  %v8975_v21 = vpack.c.bf16 %v8443_v16, %v8448_v56 }
 0x460   : > { %v6757_v28 = vpop.eup %6756  ;;  %v4492_v13 = vadd.f32 1.0, %v6755_v14  ;;  %v4401_v51 = vmul.f32 0.70710677, %v8672_v39  ;;  %v6424_v61 = vadd.f32 %v4181_v59, %v8335_v5  ;;  %v4352_v48 = vmul.f32 0.5, %v8642_v35  ;;  %v8976_v14 = vld [vmem:[#allocation6_spill] sm:$0xff] }
 0x461   : > { %v4491_v32 = vadd.f32 1.0, %v6757_v28  ;;  %6766 = verf.f32 %v4402_v24  ;;  %v4308_v55 = vadd.f32 %v6423_v6, %v8350_v9  ;;  %v8681_v60 = vpack.c.bf16 %v4538_v47, %v4537_v36 }
 0x462   : > { %v4540_v34 = vmul.f32 %v4492_v13, %v4348_v26  ;;  %6768 = verf.f32 %v4401_v51  ;;  %v4307_v62 = vadd.f32 %v6424_v61, %v8350_v9  ;;  %v6197_v43 = vpop.f32.mrb[92].mxu1  ;;  %v4354_v51 = vmul.f32 0.5, %v8665_v44 }
 0x463   : > { %v6759_v58 = vpop.eup %6758  ;;  %v4539_v7 = vmul.f32 %v4491_v32, %v4347_v20  ;;  %v4404_v50 = vmul.f32 0.70710677, %v4308_v55  ;;  %v6425_v12 = vadd.f32 %v6197_v43, %v8339_v8  ;;  %v4191_v54 = vpop.f32.mrb[93].mxu1  ;;  %v8977_v32 = vpack.c.bf16 %v8461_v4, %v8466_v41 }
 0x464   : > { %v6761_v5 = vpop.eup %6760  ;;  %v4494_v25 = vadd.f32 1.0, %v6759_v58  ;;  %v4403_v17 = vmul.f32 0.70710677, %v4307_v62  ;;  %v6426_v1 = vadd.f32 %v4191_v54, %v8341_v3  ;;  %v4356_v4 = vmul.f32 0.5, %v4308_v55 }
 0x465   : > { %6314 = vmatpush3.bf16.xpose.msk.msra.mxu0 %vm8526_vm9, %v8975_v21  ;;  %v4493_v40 = vadd.f32 1.0, %v6761_v5  ;;  %6770 = verf.f32 %v4404_v50  ;;  %v4310_v15 = vadd.f32 %v6425_v12, %v8350_v9  ;;  %v8699_v8 = vpack.c.bf16 %v4540_v34, %v4539_v7 }
 0x466   : > { %6317 = vmatprep.subr.msk.bf16.mxu0 %vm8526_vm9, %v6315_v38  ;;  %v4542_v42 = vmul.f32 %v4494_v25, %v4350_v46  ;;  %6772 = verf.f32 %v4403_v17  ;;  %v4309_v3 = vadd.f32 %v6426_v1, %v8350_v9  ;;  %v6200_v16 = vpop.f32.mrb[94].mxu1  ;;  %v4353_v34 = vmul.f32 0.5, %v8672_v39 }
 0x467   : > { %v6763_v56 = vpop.eup %6762  ;;  %v4541_v27 = vmul.f32 %v4493_v40, %v4349_v10  ;;  %v4406_v29 = vmul.f32 0.70710677, %v4310_v15  ;;  %v6427_v19 = vadd.f32 %v6200_v16, %v8343_v23  ;;  %v4201_v47 = vpop.f32.mrb[95].mxu1  ;;  %v4355_v50 = vmul.f32 0.5, %v4307_v62 }
 0x468   : > { %v6765_v31 = vpop.eup %6764  ;;  %v4496_v63 = vadd.f32 1.0, %v6763_v56  ;;  %v4405_v38 = vmul.f32 0.70710677, %v4309_v3  ;;  %v6428_v36 = vadd.f32 %v4201_v47, %v8976_v14  ;;  %v4358_v17 = vmul.f32 0.5, %v4310_v15 }
 0x469   : > { %v4495_v26 = vadd.f32 1.0, %v6765_v31  ;;  %6774 = verf.f32 %v4406_v29  ;;  %v4312_v24 = vadd.f32 %v6427_v19, %v8350_v9  ;;  %v8707_v6 = vpack.c.bf16 %v4542_v42, %v4541_v27  ;;  %v4887_v19 = vld [vmem:[%s8950_s2] sm:$0x7] }
 0x46a   : > { %v4544_v59 = vmul.f32 %v4496_v63, %v4352_v48  ;;  %6776 = verf.f32 %v4405_v38  ;;  %v4311_v35 = vadd.f32 %v6428_v36, %v8350_v9  ;;  %v8978_v33 = vpack.c.bf16 %v8479_v52, %v8484_v45 }
 0x46b   : > { %v6767_v28 = vpop.eup %6766  ;;  %v4543_v23 = vmul.f32 %v4495_v26, %v4351_v30  ;;  %v4408_v13 = vmul.f32 0.70710677, %v4312_v24  ;;  %v4360_v42 = vmul.f32 0.5, %v4312_v24 }
 0x46c   : > { %v6769_v20 = vpop.eup %6768  ;;  %v4498_v11 = vadd.f32 1.0, %v6767_v28  ;;  %v4407_v61 = vmul.f32 0.70710677, %v4311_v35  ;;  %v4359_v56 = vmul.f32 0.5, %v4311_v35 }
 0x46d   : > { %6320 = vmatpush3.bf16.xpose.msk.msra.mxu0 %vm8526_vm9, %v8977_v32  ;;  %v4497_v43 = vadd.f32 1.0, %v6769_v20  ;;  %6778 = verf.f32 %v4408_v13  ;;  %v6351_v9 = vpack.c.bf16 %v4544_v59, %v4543_v23 }
 0x46e   : > { %6323 = vmatprep.subr.msk.bf16.mxu0 %vm8526_vm9, %v6321_v57  ;;  %v4546_v44 = vmul.f32 %v4498_v11, %v4354_v51  ;;  %6780 = verf.f32 %v4407_v61  ;;  %v4357_v57 = vmul.f32 0.5, %v4309_v3  ;;  %v8979_v3 = vpack.c.bf16 %v8497_v22, %v8502_v2  ;;  %v4555_v22 = vld [vmem:[%s8957_s9 + $0x10] sm:$0xff]  ;;  %v4556_v2 = vld [vmem:[%s8957_s9 + $0x18] sm:$0xff] }
 0x46f   : > { %v6771_v58 = vpop.eup %6770  ;;  %v4545_v7 = vmul.f32 %v4497_v43, %v4353_v34 }
 0x470   : > { %v6773_v46 = vpop.eup %6772  ;;  %v4500_v41 = vadd.f32 1.0, %v6771_v58 }
 0x471   : > { %v4499_v12 = vadd.f32 1.0, %v6773_v46  ;;  %v6357_v54 = vpack.c.bf16 %v4546_v44, %v4545_v7 }
 0x472   : > { %v4548_v39 = vmul.f32 %v4500_v41, %v4356_v4 }
 0x473   : > { %v6775_v5 = vpop.eup %6774  ;;  %v4547_v25 = vmul.f32 %v4499_v12, %v4355_v50 }
 0x474   : > { %v6777_v10 = vpop.eup %6776  ;;  %v4502_v53 = vadd.f32 1.0, %v6775_v5 }
 0x475   : > { %6326 = vmatpush3.bf16.xpose.msk.msra.mxu0 %vm8526_vm9, %v8978_v33  ;;  %v4501_v1 = vadd.f32 1.0, %v6777_v10  ;;  %v6363_v55 = vpack.c.bf16 %v4548_v39, %v4547_v25  ;;  %v5015_v33 = vld [vmem:[%s8958_s10 + $0x18] sm:$0xff] }
 0x476   : > { %6329 = vmatprep.subr.msk.bf16.mxu0 %vm8526_vm9, %v6327_v0  ;;  %v4550_v62 = vmul.f32 %v4502_v53, %v4358_v17  ;;  %v8980_v0 = vld [vmem:[#allocation5_spill] sm:$0xff]  ;;  %v5012_v17 = vld [vmem:[%s8958_s10] sm:$0xff] }
 0x477   : > { %v6779_v21 = vpop.eup %6778  ;;  %v4549_v40 = vmul.f32 %v4501_v1, %v4357_v57  ;;  %v5014_v53 = vld [vmem:[%s8958_s10 + $0x10] sm:$0xff]  ;;  %v5049_v57 = vld [vmem:[%s8959_s11 + $0x8] sm:$0xff] }
 0x478   : > { %v6781_v15 = vpop.eup %6780  ;;  %v4504_v16 = vadd.f32 1.0, %v6779_v21  ;;  %v5013_v1 = vld [vmem:[%s8958_s10 + $0x8] sm:$0xff] }
 0x479   : > { %v4503_v52 = vadd.f32 1.0, %v6781_v15  ;;  %v6369_v45 = vpack.c.bf16 %v4550_v62, %v4549_v40 }
 0x47a   : > { %v4552_v27 = vmul.f32 %v4504_v16, %v4360_v42 }
 0x47b   : > { %v4551_v48 = vmul.f32 %v4503_v52, %v4359_v56 }
 0x47d   : > { %6332 = vmatpush3.bf16.xpose.msk.msra.mxu0 %vm8526_vm9, %v8979_v3  ;;  %v6375_v49 = vpack.c.bf16 %v4552_v27, %v4551_v48 }
 0x47e   : > { %6335 = vmatprep.subr.msk.bf16.mxu0 %vm8526_vm9, %v8681_v60 }
 0x484   : > { %5768 = vmatmul.mubr.msk.f32.vlgmr.msra.gmra.mrb[96].mxu0 %vm2216_vm6, %v8980_v0 }
 0x485   : > { %6338 = vmatpush3.bf16.xpose.msk.msra.mxu0 %vm8526_vm9, %v8681_v60  ;;  %5769 = vmatprep.mubr.msk.f32.mxu0 %vm2216_vm6, %v4554_v18  ;;  %v4889_v60 = vlaneseq }
 0x486   : > { %6341 = vmatprep.subr.msk.bf16.mxu0 %vm8526_vm9, %v8699_v8 }
 0x488   : > { %5770 = vmatmul.mubr.msk.f32.gmra.mrb[98].mxu0 %vm2216_vm6, %v4554_v18 }
 0x489   : > { %5771 = vmatprep.mubr.msk.f32.mxu0 %vm2216_vm6, %v4555_v22 }
 0x48c   : > { %5772 = vmatmul.mubr.msk.f32.gmra.mrb[100].mxu0 %vm2216_vm6, %v4555_v22 }
 0x48d   : > { %6344 = vmatpush3.bf16.xpose.msk.msra.mxu0 %vm8526_vm9, %v8699_v8  ;;  %5773 = vmatprep.mubr.msk.f32.mxu0 %vm2216_vm6, %v4556_v2  ;;  %v4890_v8 = vshrl.u32 %v4889_v60, 7 }
 0x48e   : > { %6347 = vmatprep.subr.msk.bf16.mxu0 %vm8526_vm9, %v8707_v6 }
 0x48f   : > { %v4891_v29 = vsub.s32 0, %v4890_v8  ;;  %v4895_v47 = vsub.s32 1, %v4890_v8 }
 0x490   : > { %5774 = vmatmul.mubr.msk.f32.gmra.mrb[102].mxu0 %vm2216_vm6, %v4556_v2 }
 0x491   : > { %6233 = vmatprep.mubr.msk.f32.mxu0 %vm2216_vm6, %v8980_v0  ;;  %v8800_v31 = vrot.slane %v4887_v19, %v4891_v29  ;;  %v8802_v63 = vrot.slane %v4887_v19, %v4895_v47 }
 0x495   : > { %6350 = vmatpush3.bf16.xpose.msk.msra.mxu0 %vm8526_vm9, %v8707_v6 }
 0x496   : > { %6353 = vmatprep.subr.msk.bf16.mxu0 %vm8526_vm9, %v6351_v9 }
 0x49d   : > { %6356 = vmatpush3.bf16.xpose.msk.msra.mxu0 %vm8526_vm9, %v6351_v9  ;;  %v4899_v9 = vsub.s32 2, %v4890_v8 }
 0x49e   : > { %6359 = vmatprep.subr.msk.bf16.mxu0 %vm8526_vm9, %v6357_v54 }
 0x49f   : > { %v8821_v44 = vrot.slane %v4887_v19, %v4899_v9  ;;  %v5051_v9 = vld [vmem:[%s8959_s11 + $0x18] sm:$0xff] }
 0x4a5   : > { %6362 = vmatpush3.bf16.xpose.msk.msra.mxu0 %vm8526_vm9, %v6357_v54 }
 0x4a6   : > { %6365 = vmatprep.subr.msk.bf16.mxu0 %vm8526_vm9, %v6363_v55 }
 0x4ad   : > { %6368 = vmatpush3.bf16.xpose.msk.msra.mxu0 %vm8526_vm9, %v6363_v55  ;;  %v5048_v55 = vld [vmem:[%s8959_s11] sm:$0xff] }
 0x4ae   : > { %6371 = vmatprep.subr.msk.bf16.mxu0 %vm8526_vm9, %v6369_v45 }
 0x4b5   : > { %6374 = vmatpush3.bf16.xpose.msk.msra.mxu0 %vm8526_vm9, %v6369_v45 }
 0x4b6   : > { %6377 = vmatprep.subr.msk.bf16.mxu0 %vm8526_vm9, %v6375_v49 }
 0x4bd   : > { %6380 = vmatpush3.bf16.xpose.msk.msra.mxu0 %vm8526_vm9, %v6375_v49 }
 0x4c4   : > { %6234 = vmatmul.mubr.msk.f32.vlgmr.msra.gmra.mrb[104].mxu0 %vm2216_vm6, %v4554_v18 }
 0x4c5   : > { %6236 = vmatprep.mubr.msk.f32.mxu0 %vm2216_vm6, %v4555_v22 }
 0x4c8   : > { %6237 = vmatmul.mubr.msk.f32.gmra.mrb[106].mxu0 %vm2216_vm6, %v4556_v2 }
 0x557   : > { %v4779_v37 = vpop.f32.mrb[96].mxu0 }
 0x558   : > { %v4904_v30 = vmul.f32 %v8800_v31, %v4779_v37  ;;  %v4781_v38 = vpop.f32.mrb[97].mxu0 }
 0x559   : > { %v4905_v14 = vmul.f32 %v8802_v63, %v4781_v38 }
 0x55b   : > { %v4916_v36 = vadd.f32 %v4905_v14, %v4904_v30  ;;  %v4785_v26 = vpop.f32.mrb[98].mxu0 }
 0x55c   : > { %v4907_v24 = vmul.f32 %v8800_v31, %v4785_v26  ;;  %v4787_v6 = vpop.f32.mrb[99].mxu0 }
 0x55d   : > { %v4908_v59 = vmul.f32 %v8802_v63, %v4787_v6 }
 0x55f   : > { %v4920_v35 = vadd.f32 %v4908_v59, %v4907_v24  ;;  %v8808_v28 = vpop.f32.mrb[100].mxu0 }
 0x560   : > { %v4910_v23 = vmul.f32 %v8800_v31, %v8808_v28  ;;  %v8812_v13 = vpop.f32.mrb[101].mxu0 }
 0x561   : > { %v4911_v20 = vmul.f32 %v8802_v63, %v8812_v13 }
 0x563   : > { %v4924_v51 = vadd.f32 %v4911_v20, %v4910_v23  ;;  %v8816_v11 = vpop.f32.mrb[102].mxu0 }
 0x564   : > { %v4913_v61 = vmul.f32 %v8800_v31, %v8816_v11  ;;  %v4799_v32 = vpop.f32.mrb[103].mxu0 }
 0x565   : > { %v4914_v34 = vmul.f32 %v8802_v63, %v4799_v32 }
 0x567   : > { %v4928_v43 = vadd.f32 %v4914_v34, %v4913_v61 }
 0x597   : > { %v6235_v58 = vpop.f32.mrb[104].mxu0 }
 0x598   : > { %v4909_v7 = vmul.f32 %v6235_v58, %v8821_v44  ;;  %v4868_v46 = vpop.f32.mrb[105].mxu0 }
 0x599   : > { %v4906_v4 = vmul.f32 %v8821_v44, %v4868_v46 }
 0x59a   : > { %v4921_v41 = vadd.f32 %v4920_v35, %v4909_v7 }
 0x59b   : > { %v4917_v50 = vadd.f32 %v4916_v36, %v4906_v4  ;;  %v6238_v12 = vpop.f32.mrb[106].mxu0 }
 0x59c   : > { %v4915_v54 = vmul.f32 %v6238_v12, %v8821_v44  ;;  %4922 = vadd.xlane.f32.xlu1 %v4921_v41  ;;  %v8826_v39 = vpop.f32.mrb[107].mxu0 }
 0x59d   : > { %v4912_v5 = vmul.f32 %v8821_v44, %v8826_v39  ;;  %4918 = vadd.xlane.f32.xlu0 %v4917_v50 }
 0x59e   : > { %v4929_v25 = vadd.f32 %v4928_v43, %v4915_v54 }
 0x59f   : > { %v4925_v10 = vadd.f32 %v4924_v51, %v4912_v5 }
 0x5a1   : > { %4926 = vadd.xlane.f32.xlu0 %v4925_v10 }
 0x5a5   : > { %4930 = vadd.xlane.f32.xlu0 %v4929_v25 }
 0x5ad   : > { %5018 = vperm.xlu1 %6493, %v5012_v17  }
 0x5b1   : > { %5028 = vperm.xlu1 %6493, %v5014_v53  }
 0x5b5   : > { %5033 = vperm.xlu1 %6493, %v5015_v33  }
 0x5b9   : > { %5059 = vperm.xlu1 %6493, %v5049_v57  }
 0x5bb   : > { %5023 = vperm.xlu0 %6492, %v5013_v1  }
 0x5bf   : > { %5054 = vperm.xlu0 %6492, %v5048_v55  }
 0x629   : > { %v4923_v62 = vpop.xlane.xlu1 %4922 }
 0x62a   : > { %v4933_v21 = vmul.f32 0.00390625, %v4923_v62  ;;  %v4919_v40 = vpop.xlane.xlu0 %4918 }
 0x62b   : > { %v4932_v15 = vmul.f32 0.00390625, %v4919_v40 }
 0x62c   : > { %v8848_v42 = vsub.f32 %v4785_v26, %v4933_v21  ;;  %v8850_v16 = vsub.f32 %v4787_v6, %v4933_v21  ;;  %v8852_v56 = vsub.f32 %v6235_v58, %v4933_v21  ;;  %v5050_v58 = vld [vmem:[%s8959_s11 + $0x10] sm:$0xff] }
 0x62d   : > { %v8854_v52 = vsub.f32 %v4779_v37, %v4932_v15  ;;  %v8856_v45 = vsub.f32 %v4781_v38, %v4932_v15  ;;  %v8858_v27 = vsub.f32 %v4868_v46, %v4932_v15  ;;  %v8981_v46 = vld [vmem:[#allocation4_spill] sm:$0xff]  ;;  %v5019_v33 = vpop.permute.xlu1 %5018 }
 0x62e   : > { %v4951_v48 = vmul.f32 %v8848_v42, %v8800_v31  ;;  %v4952_v3 = vmul.f32 %v8850_v16, %v8802_v63  ;;  %v4927_v49 = vpop.xlane.xlu0 %4926  ;;  %v4953_v18 = vmul.f32 %v8852_v56, %v8821_v44 }
 0x62f   : > { %v4948_v0 = vmul.f32 %v8854_v52, %v8800_v31  ;;  %v4949_v22 = vmul.f32 %v8856_v45, %v8802_v63  ;;  %v4950_v8 = vmul.f32 %v8858_v27, %v8821_v44  ;;  %v4934_v7 = vmul.f32 0.00390625, %v4927_v49 }
 0x630   : > { %v4963_v2 = vmul.f32 %v4951_v48, %v4951_v48  ;;  %v4964_v60 = vmul.f32 %v4952_v3, %v4952_v3  ;;  %v4965_v37 = vmul.f32 %v4953_v18, %v4953_v18 }
 0x631   : > { %v4960_v29 = vmul.f32 %v4948_v0, %v4948_v0  ;;  %v4961_v19 = vmul.f32 %v4949_v22, %v4949_v22  ;;  %v4962_v26 = vmul.f32 %v4950_v8, %v4950_v8  ;;  %v8894_v4 = vsub.f32 %v8808_v28, %v4934_v7 }
 0x632   : > { %v4931_v47 = vpop.xlane.xlu0 %4930  ;;  %v4976_v30 = vadd.f32 %v4964_v60, %v4963_v2  ;;  %v8897_v41 = vsub.f32 %v8812_v13, %v4934_v7  ;;  %v8904_v54 = vsub.f32 %v8826_v39, %v4934_v7  ;;  %v8982_v13 = vld [vmem:[#allocation3_spill] sm:$0xff] }
 0x633   : > { %v4935_v38 = vmul.f32 0.00390625, %v4931_v47  ;;  %v4972_v14 = vadd.f32 %v4961_v19, %v4960_v29  ;;  %v4954_v50 = vmul.f32 %v8894_v4, %v8800_v31 }
 0x634   : > { %v4977_v36 = vadd.f32 %v4976_v30, %v4965_v37  ;;  %v4956_v10 = vmul.f32 %v8904_v54, %v8821_v44 }
 0x635   : > { %v8873_v24 = vsub.f32 %v8816_v11, %v4935_v38  ;;  %v8875_v6 = vsub.f32 %v4799_v32, %v4935_v38  ;;  %v8877_v59 = vsub.f32 %v6238_v12, %v4935_v38  ;;  %v4973_v35 = vadd.f32 %v4972_v14, %v4962_v26 }
 0x636   : > { %4978 = vadd.xlane.f32.xlu0 %v4977_v36  ;;  %v4955_v12 = vmul.f32 %v8897_v41, %v8802_v63  ;;  %v4966_v5 = vmul.f32 %v4954_v50, %v4954_v50  ;;  %v4968_v28 = vmul.f32 %v4956_v10, %v4956_v10 }
 0x637   : > { %v4957_v23 = vmul.f32 %v8873_v24, %v8800_v31  ;;  %v4958_v20 = vmul.f32 %v8875_v6, %v8802_v63  ;;  %4974 = vadd.xlane.f32.xlu1 %v4973_v35  ;;  %v4959_v51 = vmul.f32 %v8877_v59, %v8821_v44  ;;  %v8910_v31 = vpop.permute.xlu1 %5028 }
 0x638   : > { %v4967_v25 = vmul.f32 %v4955_v12, %v4955_v12 }
 0x639   : > { %v4969_v61 = vmul.f32 %v4957_v23, %v4957_v23  ;;  %v4970_v34 = vmul.f32 %v4958_v20, %v4958_v20  ;;  %v4971_v11 = vmul.f32 %v4959_v51, %v4959_v51 }
 0x63a   : > { %v4980_v17 = vadd.f32 %v4967_v25, %v4966_v5  ;;  %v5024_v57 = vpop.permute.xlu0 %5023 }
 0x63b   : > { %v4984_v43 = vadd.f32 %v4970_v34, %v4969_v61  ;;  %v5034_v63 = vpop.permute.xlu1 %5033 }
 0x63c   : > { %v4981_v53 = vadd.f32 %v4980_v17, %v4968_v28 }
 0x63d   : > { %v4985_v32 = vadd.f32 %v4984_v43, %v4971_v11 }
 0x63e   : > { %v5055_v39 = vpop.permute.xlu0 %5054 }
 0x63f   : > { %4986 = vadd.xlane.f32.xlu0 %v4985_v32  ;;  %v5060_v1 = vpop.permute.xlu1 %5059 }
 0x648   : > { %5069 = vperm.xlu1 %6493, %v5051_v9  }
 0x655   : > { %5064 = vperm.xlu0 %6492, %v5050_v58  }
 0x659   : > { %2506 = vrot.lane.b32.xlu0 %v8981_v46, %s6803_s26 }
 0x66c   : > { %4982 = vadd.xlane.f32.xlu1 %v4981_v53 }
 0x67d   : > { %2508 = vrot.lane.b32.xlu1 %v8982_v13, %s6803_s26  ;;  %s6478_s26 = smul.u32 96, %s8984_s22 }
 0x67f   : > { %s8920_s15 = scalar_lea.vmem %s8960_s12, %s6478_s26 }
 0x6c3   : > { %v4979_v55 = vpop.xlane.xlu0 %4978 }
 0x6c4   : > { %v4989_v62 = vmul.f32 0.00390625, %v4979_v55  ;;  %v4975_v21 = vpop.xlane.xlu1 %4974 }
 0x6c5   : > { %v4988_v44 = vmul.f32 0.00390625, %v4975_v21 }
 0x6c6   : > { %v4993_v40 = vadd.f32 1e-05, %v4989_v62 }
 0x6c7   : > { %v4992_v15 = vadd.f32 1e-05, %v4988_v44 }
 0x6c8   : > { %6782 = vrsqrt.f32 %v4993_v40  ;;  %v5070_v32 = vpop.permute.xlu1 %5069 }
 0x6c9   : > { %6784 = vrsqrt.f32 %v4992_v15 }
 0x6cc   : > { %v4987_v48 = vpop.xlane.xlu0 %4986 }
 0x6cd   : > { %v4991_v3 = vmul.f32 0.00390625, %v4987_v48 }
 0x6cf   : > { %v4995_v49 = vadd.f32 1e-05, %v4991_v3 }
 0x6d1   : > { %6786 = vrsqrt.f32 %v4995_v49 }
 0x6d2   : > { %v6783_v18 = vpop.eup %6782 }
 0x6d3   : > { %v5003_v0 = vmul.f32 %v6783_v18, %v8848_v42  ;;  %v5004_v22 = vmul.f32 %v6783_v18, %v8850_v16  ;;  %v5005_v2 = vmul.f32 %v6783_v18, %v8852_v56  ;;  %v6785_v60 = vpop.eup %6784 }
 0x6d4   : > { %v5065_v8 = vpop.permute.xlu0 %5064  ;;  %v5000_v37 = vmul.f32 %v6785_v60, %v8854_v52  ;;  %v5001_v42 = vmul.f32 %v6785_v60, %v8856_v45  ;;  %v5002_v16 = vmul.f32 %v6785_v60, %v8858_v27 }
 0x6d5   : > { %v5039_v29 = vmul.f32 %v5024_v57, %v5003_v0  ;;  %v5040_v19 = vmul.f32 %v5024_v57, %v5004_v22  ;;  %v5041_v47 = vmul.f32 %v5024_v57, %v5005_v2 }
 0x6d6   : > { %v5036_v14 = vmul.f32 %v5019_v33, %v5000_v37  ;;  %v5037_v52 = vmul.f32 %v5019_v33, %v5001_v42  ;;  %v5038_v36 = vmul.f32 %v5019_v33, %v5002_v16 }
 0x6d7   : > { %v5075_v56 = vadd.f32 %v5060_v1, %v5039_v29  ;;  %v5076_v30 = vadd.f32 %v5060_v1, %v5040_v19  ;;  %v5077_v38 = vadd.f32 %v5060_v1, %v5041_v47 }
 0x6d8   : > { %v2507_v26 = vpop.permute.xlu0 %2506  ;;  %v5072_v35 = vadd.f32 %v5055_v39, %v5036_v14  ;;  %v5073_v23 = vadd.f32 %v5055_v39, %v5037_v52  ;;  %v5074_v20 = vadd.f32 %v5055_v39, %v5038_v36 }
 0x6d9   : > { %5087 = vst [vmem:[%s8920_s15 + $0x18] sm:$0xff] %v5075_v56  ;;  %5088 = vst [vmem:[%s8920_s15 + $0x20] sm:$0xff] %v5076_v30 }
 0x6da   : > { %5089 = vst [vmem:[%s8920_s15 + $0x28] sm:$0xff] %v5077_v38  ;;  %5084 = vst [vmem:[%s8920_s15] sm:$0xff] %v5072_v35 }
 0x6db   : > { %v6787_v45 = vpop.eup %6786  ;;  %5085 = vst [vmem:[%s8920_s15 + $0x8] sm:$0xff] %v5073_v23  ;;  %5086 = vst [vmem:[%s8920_s15 + $0x10] sm:$0xff] %v5074_v20 }
 0x6dc   : > { %v5009_v27 = vmul.f32 %v6787_v45, %v8873_v24  ;;  %v5010_v51 = vmul.f32 %v6787_v45, %v8875_v6  ;;  %v5011_v61 = vmul.f32 %v6787_v45, %v8877_v59 }
 0x6de   : > { %v5045_v34 = vmul.f32 %v5034_v63, %v5009_v27  ;;  %v5046_v11 = vmul.f32 %v5034_v63, %v5010_v51  ;;  %v5047_v43 = vmul.f32 %v5034_v63, %v5011_v61 }
 0x6e0   : > { %v5081_v9 = vadd.f32 %v5070_v32, %v5045_v34  ;;  %v5082_v58 = vadd.f32 %v5070_v32, %v5046_v11  ;;  %v5083_v7 = vadd.f32 %v5070_v32, %v5047_v43 }
 0x6e2   : > { %5093 = vst [vmem:[%s8920_s15 + $0x48] sm:$0xff] %v5081_v9  ;;  %5094 = vst [vmem:[%s8920_s15 + $0x50] sm:$0xff] %v5082_v58 }
 0x6e3   : > { %5095 = vst [vmem:[%s8920_s15 + $0x58] sm:$0xff] %v5083_v7 }
 0x6f9   : > { %v4983_v46 = vpop.xlane.xlu1 %4982 }
 0x6fa   : > { %v4990_v50 = vmul.f32 0.00390625, %v4983_v46 }
 0x6fc   : > { %v4994_v24 = vadd.f32 1e-05, %v4990_v50 }
 0x6fd   : > { %v2509_v12 = vpop.permute.xlu1 %2508 }
 0x6fe   : > { %6788 = vrsqrt.f32 %v4994_v24 }
 0x708   : > { %v6789_v6 = vpop.eup %6788 }
 0x709   : > { %v5006_v59 = vmul.f32 %v6789_v6, %v8894_v4  ;;  %v5007_v5 = vmul.f32 %v6789_v6, %v8897_v41  ;;  %v5008_v25 = vmul.f32 %v6789_v6, %v8904_v54 }
 0x70b   : > { %v5042_v10 = vmul.f32 %v8910_v31, %v5006_v59  ;;  %v5043_v17 = vmul.f32 %v8910_v31, %v5007_v5  ;;  %v5044_v28 = vmul.f32 %v8910_v31, %v5008_v25 }
 0x70d   : > { %v5078_v53 = vadd.f32 %v5065_v8, %v5042_v10  ;;  %v5079_v13 = vadd.f32 %v5065_v8, %v5043_v17  ;;  %v5080_v33 = vadd.f32 %v5065_v8, %v5044_v28 }
 0x70f   : > { %5090 = vst [vmem:[%s8920_s15 + $0x30] sm:$0xff] %v5078_v53  ;;  %5091 = vst [vmem:[%s8920_s15 + $0x38] sm:$0xff] %v5079_v13 }
 0x710   : > { %5092 = vst [vmem:[%s8920_s15 + $0x40] sm:$0xff] %v5080_v33 }
 0x711 PF: > { %s22_s21 = sadd.s32 1, %s6797_s21  }
 0x712   : > { %p19_p4 = scmp.ge.s32.totalorder %s22_s21, 4  }
 0x714   :  { %21 = sbr.rel (!%p19_p4) target bundleno = 1 (0x1), region = 100 }

</bundles_post_ra>
